<compile_context>
chip_gen: v7x
topology: tpu7x:2x2x1
jax: 0.10.0
libtpu: 0.0.40
codegen_flags: <defaults>
</compile_context>

<pallas_src>
import math
import functools

import jax
import jax.numpy as jnp
from jax import lax
from jax.experimental import pallas as pl
from jax.experimental.pallas import tpu as pltpu  # noqa: F401  (TPU backend)

D_MODEL = 128
NHEAD = 4
HEAD_DIM = D_MODEL // NHEAD
FF = 512
NUM_LAYERS = 2
NUM_CLASSES = 1
LN_EPS = 1e-5


# ---------------------------------------------------------------------------
# Fused kernel: input proj + PE -> 2 x encoder layer -> mean pool -> head
# ---------------------------------------------------------------------------
def _layer_norm(x, w, b):
    mu = jnp.mean(x, axis=-1, keepdims=True)
    var = jnp.mean((x - mu) ** 2, axis=-1, keepdims=True)
    return (x - mu) * lax.rsqrt(var + LN_EPS) * w + b


def _make_fused_kernel(B, S):
    scale = 1.0 / math.sqrt(HEAD_DIM)

    def kernel(seq_ref, in_w_ref, in_b_ref, pe_ref,
               wqkv_ref, bqkv_ref, wo_ref, bo_ref,
               ln1w_ref, ln1b_ref, w1_ref, b1_ref, w2_ref, b2_ref,
               ln2w_ref, ln2b_ref, cls_w_ref, cls_b_ref, o_ref):
        # ---- input projection + positional encoding (batch*seq flattened) ----
        x = (jnp.dot(seq_ref[...], in_w_ref[...],
                     preferred_element_type=jnp.float32)
             + in_b_ref[...] + pe_ref[...])                          # (B*S, D)

        # ---- encoder layers: static unroll, weights stay resident in VMEM ----
        for li in range(NUM_LAYERS):
            qkv = (jnp.dot(x, wqkv_ref[li],
                           preferred_element_type=jnp.float32)
                   + bqkv_ref[li])                                   # (B*S, 3D)
            q = qkv[:, :D_MODEL]
            k = qkv[:, D_MODEL:2 * D_MODEL]
            v = qkv[:, 2 * D_MODEL:]
            wo = wo_ref[li]                                          # (D, D)

            attn_rows = []
            for b in range(B):                   # attention is per sequence
                rows = slice(b * S, (b + 1) * S)
                acc = None
                for h in range(NHEAD):           # static unroll, NHEAD = 4
                    cols = slice(h * HEAD_DIM, (h + 1) * HEAD_DIM)
                    qh = q[rows, cols]
                    kh = k[rows, cols]
                    vh = v[rows, cols]
                    s = lax.dot_general(
                        qh, kh, (((1,), (1,)), ((), ())),
                        preferred_element_type=jnp.float32) * scale  # (S, S)
                    s = s - jnp.max(s, axis=-1, keepdims=True)
                    p = jnp.exp(s)
                    p = p * pl.reciprocal(
                        jnp.sum(p, axis=-1, keepdims=True), approx=True)
                    ctx = jnp.dot(p, vh,
                                  preferred_element_type=jnp.float32)  # (S, hd)
                    # fold output projection into the head loop -> no lane concat
                    contrib = jnp.dot(ctx, wo[cols, :],
                                      preferred_element_type=jnp.float32)  # (S, D)
                    acc = contrib if acc is None else acc + contrib
                attn_rows.append(acc)
            attn = jnp.concatenate(attn_rows, axis=0) + bo_ref[li]   # (B*S, D)

            # dropout = identity (eval mode)
            x = _layer_norm(x + attn, ln1w_ref[li], ln1b_ref[li])

            # ---- feed-forward (ReLU) ----
            h1 = (jnp.dot(x, w1_ref[li], preferred_element_type=jnp.float32)
                  + b1_ref[li])
            h1 = jnp.maximum(h1, 0.0)
            ff = (jnp.dot(h1, w2_ref[li], preferred_element_type=jnp.float32)
                  + b2_ref[li])

            x = _layer_norm(x + ff, ln2w_ref[li], ln2b_ref[li])

        # ---- mean-pool over sequence + classifier head ----
        pooled = []
        for b in range(B):
            pooled.append(jnp.mean(x[b * S:(b + 1) * S, :],
                                   axis=0, keepdims=True))
        pooled = jnp.concatenate(pooled, axis=0)                     # (B, D)
        o_ref[...] = (jnp.dot(pooled, cls_w_ref[...],
                              preferred_element_type=jnp.float32)
                      + cls_b_ref[...])

    return kernel


@jax.jit
def transformer_classifier(seq, params):
    B, S, F = seq.shape
    layers = params["layers"]
    stack = lambda name: jnp.stack([lp[name] for lp in layers])      # (L, ...)
    kernel = _make_fused_kernel(B, S)
    return pl.pallas_call(
        kernel,
        out_shape=jax.ShapeDtypeStruct((B, NUM_CLASSES), jnp.float32),
    )(seq.reshape(B * S, F),
      params["in_w"], params["in_b"],
      jnp.tile(params["pe"], (B, 1)),                                # (B*S, D)
      stack("wqkv"), stack("bqkv"), stack("wo"), stack("bo"),
      stack("ln1w"), stack("ln1b"), stack("w1"), stack("b1"),
      stack("w2"), stack("b2"), stack("ln2w"), stack("ln2b"),
      params["cls_w"], params["cls_b"])


# ---------------------------------------------------------------------------
# Pure-JAX reference (correctness check)
# ---------------------------------------------------------------------------
def reference_forward(seq, params):
    x = seq @ params["in_w"] + params["in_b"] + params["pe"][None]
    for p in params["layers"]:
        qkv = x @ p["wqkv"] + p["bqkv"]
        q, k, v = jnp.split(qkv, 3, axis=-1)
        B, S, _ = x.shape
        qh = q.reshape(B, S, NHEAD, HEAD_DIM).transpose(0, 2, 1, 3)
        kh = k.reshape(B, S, NHEAD, HEAD_DIM).transpose(0, 2, 1, 3)
        vh = v.reshape(B, S, NHEAD, HEAD_DIM).transpose(0, 2, 1, 3)
        s = jnp.einsum("bhqd,bhkd->bhqk", qh, kh) / math.sqrt(HEAD_DIM)
        patt = jax.nn.softmax(s, axis=-1)
        ctx = jnp.einsum("bhqk,bhkd->bhqd", patt, vh)
        ctx = ctx.transpose(0, 2, 1, 3).reshape(B, S, D_MODEL)
        attn = ctx @ p["wo"] + p["bo"]

        def ln(y, w, b):
            mu = y.mean(-1, keepdims=True)
            var = ((y - mu) ** 2).mean(-1, keepdims=True)
            return (y - mu) / jnp.sqrt(var + LN_EPS) * w + b

        x = ln(x + attn, p["ln1w"], p["ln1b"])
        ff = jax.nn.relu(x @ p["w1"] + p["b1"]) @ p["w2"] + p["b2"]
        x = ln(x + ff, p["ln2w"], p["ln2b"])
    pooled = x.mean(axis=1)
    return pooled @ params["cls_w"] + params["cls_b"]


# ---------------------------------------------------------------------------
# Deterministic parameter construction
# ---------------------------------------------------------------------------
def init_params(key, feat_dim, seq_len):
    def linear(k, fan_in, fan_out, scale=0.05):
        k1, k2 = jax.random.split(k)
        w = jax.random.normal(k1, (fan_in, fan_out), jnp.float32) * scale
        b = jax.random.normal(k2, (1, fan_out), jnp.float32) * scale
        return w, b

    keys = jax.random.split(key, 2 + NUM_LAYERS)
    in_w, in_b = linear(keys[0], feat_dim, D_MODEL)
    cls_w, cls_b = linear(keys[1], D_MODEL, NUM_CLASSES)

    layers = []
    for li in range(NUM_LAYERS):
        lk = jax.random.split(keys[2 + li], 4)
        wqkv, bqkv = linear(lk[0], D_MODEL, 3 * D_MODEL)
        wo, bo = linear(lk[1], D_MODEL, D_MODEL)
        w1, b1 = linear(lk[2], D_MODEL, FF)
        w2, b2 = linear(lk[3], FF, D_MODEL)
        layers.append(dict(
            wqkv=wqkv, bqkv=bqkv, wo=wo, bo=bo,
            ln1w=jnp.ones((1, D_MODEL), jnp.float32),
            ln1b=jnp.zeros((1, D_MODEL), jnp.float32),
            w1=w1, b1=b1, w2=w2, b2=b2,
            ln2w=jnp.ones((1, D_MODEL), jnp.float32),
            ln2b=jnp.zeros((1, D_MODEL), jnp.float32),
        ))

    # sinusoidal positional encoding (same construction as PositionalEncoding)
    pos = jnp.arange(seq_len, dtype=jnp.float32)[:, None]
    div = jnp.exp(jnp.arange(0, D_MODEL, 2, dtype=jnp.float32)
                  * (-math.log(10000.0) / D_MODEL))
    pe = jnp.zeros((seq_len, D_MODEL), jnp.float32)
    pe = pe.at[:, 0::2].set(jnp.sin(pos * div))
    pe = pe.at[:, 1::2].set(jnp.cos(pos * div))

    return dict(in_w=in_w, in_b=in_b, pe=pe, layers=layers,
                cls_w=cls_w, cls_b=cls_b)


if __name__ == "__main__":
    B, S, FEAT = 2, 8, 16
    key = jax.random.PRNGKey(0)
    k_x, k_p = jax.random.split(key)
    seq = jax.random.normal(k_x, (B, S, FEAT), jnp.float32)
    params = init_params(k_p, FEAT, S)

    out = jax.block_until_ready(transformer_classifier(seq, params))
    ref = jax.block_until_ready(reference_forward(seq, params))

    assert out.shape == (B, NUM_CLASSES)
    assert bool(jnp.all(jnp.isfinite(out)))
    assert bool(jnp.allclose(out, ref, atol=2e-3, rtol=2e-3)), (out, ref)
    print("KERNEL_OK")
</pallas_src>

<mosaic_0001>
module attributes {stable_mosaic.version = 11 : i64} {
  func.func @kernel(%arg0: memref<16x16xf32, #tpu.memory_space<vmem>>, %arg1: memref<16x128xf32, #tpu.memory_space<vmem>>, %arg2: memref<1x128xf32, #tpu.memory_space<vmem>>, %arg3: memref<16x128xf32, #tpu.memory_space<vmem>>, %arg4: memref<2x128x384xf32, #tpu.memory_space<vmem>>, %arg5: memref<2x1x384xf32, #tpu.memory_space<vmem>>, %arg6: memref<2x128x128xf32, #tpu.memory_space<vmem>>, %arg7: memref<2x1x128xf32, #tpu.memory_space<vmem>>, %arg8: memref<2x1x128xf32, #tpu.memory_space<vmem>>, %arg9: memref<2x1x128xf32, #tpu.memory_space<vmem>>, %arg10: memref<2x128x512xf32, #tpu.memory_space<vmem>>, %arg11: memref<2x1x512xf32, #tpu.memory_space<vmem>>, %arg12: memref<2x512x128xf32, #tpu.memory_space<vmem>>, %arg13: memref<2x1x128xf32, #tpu.memory_space<vmem>>, %arg14: memref<2x1x128xf32, #tpu.memory_space<vmem>>, %arg15: memref<2x1x128xf32, #tpu.memory_space<vmem>>, %arg16: memref<128x1xf32, #tpu.memory_space<vmem>>, %arg17: memref<1x1xf32, #tpu.memory_space<vmem>>, %arg18: memref<2x1xf32, #tpu.memory_space<vmem>>) attributes {dimension_semantics = [], scalar_prefetch = 0 : i64, scratch_operands = 0 : i64, tpu.core_type = #tpu.core_type<tc>} {
    %c0 = arith.constant 0 : index
    %c0_0 = arith.constant 0 : index
    %0 = vector.load %arg0[%c0, %c0_0] : memref<16x16xf32, #tpu.memory_space<vmem>>, vector<16x16xf32>
    %c0_1 = arith.constant 0 : index
    %c0_2 = arith.constant 0 : index
    %1 = vector.load %arg1[%c0_1, %c0_2] : memref<16x128xf32, #tpu.memory_space<vmem>>, vector<16x128xf32>
    %cst = arith.constant dense<0.000000e+00> : vector<16x128xf32>
    %2 = tpu.matmul %0, %1, %cst {dimension_numbers = #tpu.dot_dimension_numbers<[1], [0], [0], [1], [0, 0, 1, 1], [], []>} : vector<16x16xf32>, vector<16x128xf32>, vector<16x128xf32> -> vector<16x128xf32>
    %c0_3 = arith.constant 0 : index
    %c0_4 = arith.constant 0 : index
    %3 = vector.load %arg2[%c0_3, %c0_4] : memref<1x128xf32, #tpu.memory_space<vmem>>, vector<1x128xf32>
    %4 = vector.broadcast %3 : vector<1x128xf32> to vector<16x128xf32>
    %5 = arith.addf %2, %4 : vector<16x128xf32>
    %c0_5 = arith.constant 0 : index
    %c0_6 = arith.constant 0 : index
    %6 = vector.load %arg3[%c0_5, %c0_6] : memref<16x128xf32, #tpu.memory_space<vmem>>, vector<16x128xf32>
    %7 = arith.addf %5, %6 : vector<16x128xf32>
    %c0_7 = arith.constant 0 : index
    %c0_8 = arith.constant 0 : index
    %c0_9 = arith.constant 0 : index
    %8 = vector.load %arg4[%c0_7, %c0_8, %c0_9] : memref<2x128x384xf32, #tpu.memory_space<vmem>>, vector<1x128x384xf32>
    %9 = vector.shape_cast %8 : vector<1x128x384xf32> to vector<128x384xf32>
    %cst_10 = arith.constant dense<0.000000e+00> : vector<16x384xf32>
    %10 = tpu.matmul %7, %9, %cst_10 {dimension_numbers = #tpu.dot_dimension_numbers<[1], [0], [0], [1], [0, 0, 1, 1], [], []>} : vector<16x128xf32>, vector<128x384xf32>, vector<16x384xf32> -> vector<16x384xf32>
    %c0_11 = arith.constant 0 : index
    %c0_12 = arith.constant 0 : index
    %c0_13 = arith.constant 0 : index
    %11 = vector.load %arg5[%c0_11, %c0_12, %c0_13] : memref<2x1x384xf32, #tpu.memory_space<vmem>>, vector<1x1x384xf32>
    %12 = vector.shape_cast %11 : vector<1x1x384xf32> to vector<1x384xf32>
    %13 = vector.broadcast %12 : vector<1x384xf32> to vector<16x384xf32>
    %14 = arith.addf %10, %13 : vector<16x384xf32>
    %15 = vector.extract_strided_slice %14 {offsets = [0, 0], sizes = [16, 128], strides = [1, 1]} : vector<16x384xf32> to vector<16x128xf32>
    %16 = vector.extract_strided_slice %14 {offsets = [0, 128], sizes = [16, 128], strides = [1, 1]} : vector<16x384xf32> to vector<16x128xf32>
    %17 = vector.extract_strided_slice %14 {offsets = [0, 256], sizes = [16, 128], strides = [1, 1]} : vector<16x384xf32> to vector<16x128xf32>
    %c0_14 = arith.constant 0 : index
    %c0_15 = arith.constant 0 : index
    %c0_16 = arith.constant 0 : index
    %18 = vector.load %arg6[%c0_14, %c0_15, %c0_16] : memref<2x128x128xf32, #tpu.memory_space<vmem>>, vector<1x128x128xf32>
    %19 = vector.shape_cast %18 : vector<1x128x128xf32> to vector<128x128xf32>
    %20 = vector.extract_strided_slice %15 {offsets = [0, 0], sizes = [8, 32], strides = [1, 1]} : vector<16x128xf32> to vector<8x32xf32>
    %21 = vector.extract_strided_slice %16 {offsets = [0, 0], sizes = [8, 32], strides = [1, 1]} : vector<16x128xf32> to vector<8x32xf32>
    %22 = vector.extract_strided_slice %17 {offsets = [0, 0], sizes = [8, 32], strides = [1, 1]} : vector<16x128xf32> to vector<8x32xf32>
    %cst_17 = arith.constant dense<0.000000e+00> : vector<8x8xf32>
    %23 = tpu.matmul %20, %21, %cst_17 {dimension_numbers = #tpu.dot_dimension_numbers<[1], [1], [0], [0], [0, 0, 1, 0], [], []>} : vector<8x32xf32>, vector<8x32xf32>, vector<8x8xf32> -> vector<8x8xf32>
    %cst_18 = arith.constant 0.176776692 : f32
    %24 = vector.broadcast %cst_18 : f32 to vector<8x8xf32>
    %25 = arith.mulf %23, %24 : vector<8x8xf32>
    %cst_19 = arith.constant dense<0xFF800000> : vector<8xf32>
    %26 = vector.multi_reduction <maximumf>, %25, %cst_19 [1] : vector<8x8xf32> to vector<8xf32>
    %27 = vector.shape_cast %26 : vector<8xf32> to vector<8x1xf32>
    %28 = vector.broadcast %27 : vector<8x1xf32> to vector<8x8xf32>
    %29 = arith.subf %25, %28 : vector<8x8xf32>
    %30 = math.exp %29 : vector<8x8xf32>
    %cst_20 = arith.constant dense<0.000000e+00> : vector<8xf32>
    %31 = vector.multi_reduction <add>, %30, %cst_20 [1] : vector<8x8xf32> to vector<8xf32>
    %32 = vector.shape_cast %31 : vector<8xf32> to vector<8x1xf32>
    %33 = tpu.reciprocal %32 {approx = true} : vector<8x1xf32> -> vector<8x1xf32>
    %34 = vector.broadcast %33 : vector<8x1xf32> to vector<8x8xf32>
    %35 = arith.mulf %30, %34 : vector<8x8xf32>
    %cst_21 = arith.constant dense<0.000000e+00> : vector<8x32xf32>
    %36 = tpu.matmul %35, %22, %cst_21 {dimension_numbers = #tpu.dot_dimension_numbers<[1], [0], [0], [1], [0, 0, 1, 1], [], []>} : vector<8x8xf32>, vector<8x32xf32>, vector<8x32xf32> -> vector<8x32xf32>
    %37 = vector.extract_strided_slice %19 {offsets = [0, 0], sizes = [32, 128], strides = [1, 1]} : vector<128x128xf32> to vector<32x128xf32>
    %cst_22 = arith.constant dense<0.000000e+00> : vector<8x128xf32>
    %38 = tpu.matmul %36, %37, %cst_22 {dimension_numbers = #tpu.dot_dimension_numbers<[1], [0], [0], [1], [0, 0, 1, 1], [], []>} : vector<8x32xf32>, vector<32x128xf32>, vector<8x128xf32> -> vector<8x128xf32>
    %39 = vector.extract_strided_slice %15 {offsets = [0, 32], sizes = [8, 32], strides = [1, 1]} : vector<16x128xf32> to vector<8x32xf32>
    %40 = vector.extract_strided_slice %16 {offsets = [0, 32], sizes = [8, 32], strides = [1, 1]} : vector<16x128xf32> to vector<8x32xf32>
    %41 = vector.extract_strided_slice %17 {offsets = [0, 32], sizes = [8, 32], strides = [1, 1]} : vector<16x128xf32> to vector<8x32xf32>
    %cst_23 = arith.constant dense<0.000000e+00> : vector<8x8xf32>
    %42 = tpu.matmul %39, %40, %cst_23 {dimension_numbers = #tpu.dot_dimension_numbers<[1], [1], [0], [0], [0, 0, 1, 0], [], []>} : vector<8x32xf32>, vector<8x32xf32>, vector<8x8xf32> -> vector<8x8xf32>
    %cst_24 = arith.constant 0.176776692 : f32
    %43 = vector.broadcast %cst_24 : f32 to vector<8x8xf32>
    %44 = arith.mulf %42, %43 : vector<8x8xf32>
    %cst_25 = arith.constant dense<0xFF800000> : vector<8xf32>
    %45 = vector.multi_reduction <maximumf>, %44, %cst_25 [1] : vector<8x8xf32> to vector<8xf32>
    %46 = vector.shape_cast %45 : vector<8xf32> to vector<8x1xf32>
    %47 = vector.broadcast %46 : vector<8x1xf32> to vector<8x8xf32>
    %48 = arith.subf %44, %47 : vector<8x8xf32>
    %49 = math.exp %48 : vector<8x8xf32>
    %cst_26 = arith.constant dense<0.000000e+00> : vector<8xf32>
    %50 = vector.multi_reduction <add>, %49, %cst_26 [1] : vector<8x8xf32> to vector<8xf32>
    %51 = vector.shape_cast %50 : vector<8xf32> to vector<8x1xf32>
    %52 = tpu.reciprocal %51 {approx = true} : vector<8x1xf32> -> vector<8x1xf32>
    %53 = vector.broadcast %52 : vector<8x1xf32> to vector<8x8xf32>
    %54 = arith.mulf %49, %53 : vector<8x8xf32>
    %cst_27 = arith.constant dense<0.000000e+00> : vector<8x32xf32>
    %55 = tpu.matmul %54, %41, %cst_27 {dimension_numbers = #tpu.dot_dimension_numbers<[1], [0], [0], [1], [0, 0, 1, 1], [], []>} : vector<8x8xf32>, vector<8x32xf32>, vector<8x32xf32> -> vector<8x32xf32>
    %56 = vector.extract_strided_slice %19 {offsets = [32, 0], sizes = [32, 128], strides = [1, 1]} : vector<128x128xf32> to vector<32x128xf32>
    %cst_28 = arith.constant dense<0.000000e+00> : vector<8x128xf32>
    %57 = tpu.matmul %55, %56, %cst_28 {dimension_numbers = #tpu.dot_dimension_numbers<[1], [0], [0], [1], [0, 0, 1, 1], [], []>} : vector<8x32xf32>, vector<32x128xf32>, vector<8x128xf32> -> vector<8x128xf32>
    %58 = arith.addf %38, %57 : vector<8x128xf32>
    %59 = vector.extract_strided_slice %15 {offsets = [0, 64], sizes = [8, 32], strides = [1, 1]} : vector<16x128xf32> to vector<8x32xf32>
    %60 = vector.extract_strided_slice %16 {offsets = [0, 64], sizes = [8, 32], strides = [1, 1]} : vector<16x128xf32> to vector<8x32xf32>
    %61 = vector.extract_strided_slice %17 {offsets = [0, 64], sizes = [8, 32], strides = [1, 1]} : vector<16x128xf32> to vector<8x32xf32>
    %cst_29 = arith.constant dense<0.000000e+00> : vector<8x8xf32>
    %62 = tpu.matmul %59, %60, %cst_29 {dimension_numbers = #tpu.dot_dimension_numbers<[1], [1], [0], [0], [0, 0, 1, 0], [], []>} : vector<8x32xf32>, vector<8x32xf32>, vector<8x8xf32> -> vector<8x8xf32>
    %cst_30 = arith.constant 0.176776692 : f32
    %63 = vector.broadcast %cst_30 : f32 to vector<8x8xf32>
    %64 = arith.mulf %62, %63 : vector<8x8xf32>
    %cst_31 = arith.constant dense<0xFF800000> : vector<8xf32>
    %65 = vector.multi_reduction <maximumf>, %64, %cst_31 [1] : vector<8x8xf32> to vector<8xf32>
    %66 = vector.shape_cast %65 : vector<8xf32> to vector<8x1xf32>
    %67 = vector.broadcast %66 : vector<8x1xf32> to vector<8x8xf32>
    %68 = arith.subf %64, %67 : vector<8x8xf32>
    %69 = math.exp %68 : vector<8x8xf32>
    %cst_32 = arith.constant dense<0.000000e+00> : vector<8xf32>
    %70 = vector.multi_reduction <add>, %69, %cst_32 [1] : vector<8x8xf32> to vector<8xf32>
    %71 = vector.shape_cast %70 : vector<8xf32> to vector<8x1xf32>
    %72 = tpu.reciprocal %71 {approx = true} : vector<8x1xf32> -> vector<8x1xf32>
    %73 = vector.broadcast %72 : vector<8x1xf32> to vector<8x8xf32>
    %74 = arith.mulf %69, %73 : vector<8x8xf32>
    %cst_33 = arith.constant dense<0.000000e+00> : vector<8x32xf32>
    %75 = tpu.matmul %74, %61, %cst_33 {dimension_numbers = #tpu.dot_dimension_numbers<[1], [0], [0], [1], [0, 0, 1, 1], [], []>} : vector<8x8xf32>, vector<8x32xf32>, vector<8x32xf32> -> vector<8x32xf32>
    %76 = vector.extract_strided_slice %19 {offsets = [64, 0], sizes = [32, 128], strides = [1, 1]} : vector<128x128xf32> to vector<32x128xf32>
    %cst_34 = arith.constant dense<0.000000e+00> : vector<8x128xf32>
    %77 = tpu.matmul %75, %76, %cst_34 {dimension_numbers = #tpu.dot_dimension_numbers<[1], [0], [0], [1], [0, 0, 1, 1], [], []>} : vector<8x32xf32>, vector<32x128xf32>, vector<8x128xf32> -> vector<8x128xf32>
    %78 = arith.addf %58, %77 : vector<8x128xf32>
    %79 = vector.extract_strided_slice %15 {offsets = [0, 96], sizes = [8, 32], strides = [1, 1]} : vector<16x128xf32> to vector<8x32xf32>
    %80 = vector.extract_strided_slice %16 {offsets = [0, 96], sizes = [8, 32], strides = [1, 1]} : vector<16x128xf32> to vector<8x32xf32>
    %81 = vector.extract_strided_slice %17 {offsets = [0, 96], sizes = [8, 32], strides = [1, 1]} : vector<16x128xf32> to vector<8x32xf32>
    %cst_35 = arith.constant dense<0.000000e+00> : vector<8x8xf32>
    %82 = tpu.matmul %79, %80, %cst_35 {dimension_numbers = #tpu.dot_dimension_numbers<[1], [1], [0], [0], [0, 0, 1, 0], [], []>} : vector<8x32xf32>, vector<8x32xf32>, vector<8x8xf32> -> vector<8x8xf32>
    %cst_36 = arith.constant 0.176776692 : f32
    %83 = vector.broadcast %cst_36 : f32 to vector<8x8xf32>
    %84 = arith.mulf %82, %83 : vector<8x8xf32>
    %cst_37 = arith.constant dense<0xFF800000> : vector<8xf32>
    %85 = vector.multi_reduction <maximumf>, %84, %cst_37 [1] : vector<8x8xf32> to vector<8xf32>
    %86 = vector.shape_cast %85 : vector<8xf32> to vector<8x1xf32>
    %87 = vector.broadcast %86 : vector<8x1xf32> to vector<8x8xf32>
    %88 = arith.subf %84, %87 : vector<8x8xf32>
    %89 = math.exp %88 : vector<8x8xf32>
    %cst_38 = arith.constant dense<0.000000e+00> : vector<8xf32>
    %90 = vector.multi_reduction <add>, %89, %cst_38 [1] : vector<8x8xf32> to vector<8xf32>
    %91 = vector.shape_cast %90 : vector<8xf32> to vector<8x1xf32>
    %92 = tpu.reciprocal %91 {approx = true} : vector<8x1xf32> -> vector<8x1xf32>
    %93 = vector.broadcast %92 : vector<8x1xf32> to vector<8x8xf32>
    %94 = arith.mulf %89, %93 : vector<8x8xf32>
    %cst_39 = arith.constant dense<0.000000e+00> : vector<8x32xf32>
    %95 = tpu.matmul %94, %81, %cst_39 {dimension_numbers = #tpu.dot_dimension_numbers<[1], [0], [0], [1], [0, 0, 1, 1], [], []>} : vector<8x8xf32>, vector<8x32xf32>, vector<8x32xf32> -> vector<8x32xf32>
    %96 = vector.extract_strided_slice %19 {offsets = [96, 0], sizes = [32, 128], strides = [1, 1]} : vector<128x128xf32> to vector<32x128xf32>
    %cst_40 = arith.constant dense<0.000000e+00> : vector<8x128xf32>
    %97 = tpu.matmul %95, %96, %cst_40 {dimension_numbers = #tpu.dot_dimension_numbers<[1], [0], [0], [1], [0, 0, 1, 1], [], []>} : vector<8x32xf32>, vector<32x128xf32>, vector<8x128xf32> -> vector<8x128xf32>
    %98 = arith.addf %78, %97 : vector<8x128xf32>
    %99 = vector.extract_strided_slice %15 {offsets = [8, 0], sizes = [8, 32], strides = [1, 1]} : vector<16x128xf32> to vector<8x32xf32>
    %100 = vector.extract_strided_slice %16 {offsets = [8, 0], sizes = [8, 32], strides = [1, 1]} : vector<16x128xf32> to vector<8x32xf32>
    %101 = vector.extract_strided_slice %17 {offsets = [8, 0], sizes = [8, 32], strides = [1, 1]} : vector<16x128xf32> to vector<8x32xf32>
    %cst_41 = arith.constant dense<0.000000e+00> : vector<8x8xf32>
    %102 = tpu.matmul %99, %100, %cst_41 {dimension_numbers = #tpu.dot_dimension_numbers<[1], [1], [0], [0], [0, 0, 1, 0], [], []>} : vector<8x32xf32>, vector<8x32xf32>, vector<8x8xf32> -> vector<8x8xf32>
    %cst_42 = arith.constant 0.176776692 : f32
    %103 = vector.broadcast %cst_42 : f32 to vector<8x8xf32>
    %104 = arith.mulf %102, %103 : vector<8x8xf32>
    %cst_43 = arith.constant dense<0xFF800000> : vector<8xf32>
    %105 = vector.multi_reduction <maximumf>, %104, %cst_43 [1] : vector<8x8xf32> to vector<8xf32>
    %106 = vector.shape_cast %105 : vector<8xf32> to vector<8x1xf32>
    %107 = vector.broadcast %106 : vector<8x1xf32> to vector<8x8xf32>
    %108 = arith.subf %104, %107 : vector<8x8xf32>
    %109 = math.exp %108 : vector<8x8xf32>
    %cst_44 = arith.constant dense<0.000000e+00> : vector<8xf32>
    %110 = vector.multi_reduction <add>, %109, %cst_44 [1] : vector<8x8xf32> to vector<8xf32>
    %111 = vector.shape_cast %110 : vector<8xf32> to vector<8x1xf32>
    %112 = tpu.reciprocal %111 {approx = true} : vector<8x1xf32> -> vector<8x1xf32>
    %113 = vector.broadcast %112 : vector<8x1xf32> to vector<8x8xf32>
    %114 = arith.mulf %109, %113 : vector<8x8xf32>
    %cst_45 = arith.constant dense<0.000000e+00> : vector<8x32xf32>
    %115 = tpu.matmul %114, %101, %cst_45 {dimension_numbers = #tpu.dot_dimension_numbers<[1], [0], [0], [1], [0, 0, 1, 1], [], []>} : vector<8x8xf32>, vector<8x32xf32>, vector<8x32xf32> -> vector<8x32xf32>
    %116 = vector.extract_strided_slice %19 {offsets = [0, 0], sizes = [32, 128], strides = [1, 1]} : vector<128x128xf32> to vector<32x128xf32>
    %cst_46 = arith.constant dense<0.000000e+00> : vector<8x128xf32>
    %117 = tpu.matmul %115, %116, %cst_46 {dimension_numbers = #tpu.dot_dimension_numbers<[1], [0], [0], [1], [0, 0, 1, 1], [], []>} : vector<8x32xf32>, vector<32x128xf32>, vector<8x128xf32> -> vector<8x128xf32>
    %118 = vector.extract_strided_slice %15 {offsets = [8, 32], sizes = [8, 32], strides = [1, 1]} : vector<16x128xf32> to vector<8x32xf32>
    %119 = vector.extract_strided_slice %16 {offsets = [8, 32], sizes = [8, 32], strides = [1, 1]} : vector<16x128xf32> to vector<8x32xf32>
    %120 = vector.extract_strided_slice %17 {offsets = [8, 32], sizes = [8, 32], strides = [1, 1]} : vector<16x128xf32> to vector<8x32xf32>
    %cst_47 = arith.constant dense<0.000000e+00> : vector<8x8xf32>
    %121 = tpu.matmul %118, %119, %cst_47 {dimension_numbers = #tpu.dot_dimension_numbers<[1], [1], [0], [0], [0, 0, 1, 0], [], []>} : vector<8x32xf32>, vector<8x32xf32>, vector<8x8xf32> -> vector<8x8xf32>
    %cst_48 = arith.constant 0.176776692 : f32
    %122 = vector.broadcast %cst_48 : f32 to vector<8x8xf32>
    %123 = arith.mulf %121, %122 : vector<8x8xf32>
    %cst_49 = arith.constant dense<0xFF800000> : vector<8xf32>
    %124 = vector.multi_reduction <maximumf>, %123, %cst_49 [1] : vector<8x8xf32> to vector<8xf32>
    %125 = vector.shape_cast %124 : vector<8xf32> to vector<8x1xf32>
    %126 = vector.broadcast %125 : vector<8x1xf32> to vector<8x8xf32>
    %127 = arith.subf %123, %126 : vector<8x8xf32>
    %128 = math.exp %127 : vector<8x8xf32>
    %cst_50 = arith.constant dense<0.000000e+00> : vector<8xf32>
    %129 = vector.multi_reduction <add>, %128, %cst_50 [1] : vector<8x8xf32> to vector<8xf32>
    %130 = vector.shape_cast %129 : vector<8xf32> to vector<8x1xf32>
    %131 = tpu.reciprocal %130 {approx = true} : vector<8x1xf32> -> vector<8x1xf32>
    %132 = vector.broadcast %131 : vector<8x1xf32> to vector<8x8xf32>
    %133 = arith.mulf %128, %132 : vector<8x8xf32>
    %cst_51 = arith.constant dense<0.000000e+00> : vector<8x32xf32>
    %134 = tpu.matmul %133, %120, %cst_51 {dimension_numbers = #tpu.dot_dimension_numbers<[1], [0], [0], [1], [0, 0, 1, 1], [], []>} : vector<8x8xf32>, vector<8x32xf32>, vector<8x32xf32> -> vector<8x32xf32>
    %135 = vector.extract_strided_slice %19 {offsets = [32, 0], sizes = [32, 128], strides = [1, 1]} : vector<128x128xf32> to vector<32x128xf32>
    %cst_52 = arith.constant dense<0.000000e+00> : vector<8x128xf32>
    %136 = tpu.matmul %134, %135, %cst_52 {dimension_numbers = #tpu.dot_dimension_numbers<[1], [0], [0], [1], [0, 0, 1, 1], [], []>} : vector<8x32xf32>, vector<32x128xf32>, vector<8x128xf32> -> vector<8x128xf32>
    %137 = arith.addf %117, %136 : vector<8x128xf32>
    %138 = vector.extract_strided_slice %15 {offsets = [8, 64], sizes = [8, 32], strides = [1, 1]} : vector<16x128xf32> to vector<8x32xf32>
    %139 = vector.extract_strided_slice %16 {offsets = [8, 64], sizes = [8, 32], strides = [1, 1]} : vector<16x128xf32> to vector<8x32xf32>
    %140 = vector.extract_strided_slice %17 {offsets = [8, 64], sizes = [8, 32], strides = [1, 1]} : vector<16x128xf32> to vector<8x32xf32>
    %cst_53 = arith.constant dense<0.000000e+00> : vector<8x8xf32>
    %141 = tpu.matmul %138, %139, %cst_53 {dimension_numbers = #tpu.dot_dimension_numbers<[1], [1], [0], [0], [0, 0, 1, 0], [], []>} : vector<8x32xf32>, vector<8x32xf32>, vector<8x8xf32> -> vector<8x8xf32>
    %cst_54 = arith.constant 0.176776692 : f32
    %142 = vector.broadcast %cst_54 : f32 to vector<8x8xf32>
    %143 = arith.mulf %141, %142 : vector<8x8xf32>
    %cst_55 = arith.constant dense<0xFF800000> : vector<8xf32>
    %144 = vector.multi_reduction <maximumf>, %143, %cst_55 [1] : vector<8x8xf32> to vector<8xf32>
    %145 = vector.shape_cast %144 : vector<8xf32> to vector<8x1xf32>
    %146 = vector.broadcast %145 : vector<8x1xf32> to vector<8x8xf32>
    %147 = arith.subf %143, %146 : vector<8x8xf32>
    %148 = math.exp %147 : vector<8x8xf32>
    %cst_56 = arith.constant dense<0.000000e+00> : vector<8xf32>
    %149 = vector.multi_reduction <add>, %148, %cst_56 [1] : vector<8x8xf32> to vector<8xf32>
    %150 = vector.shape_cast %149 : vector<8xf32> to vector<8x1xf32>
    %151 = tpu.reciprocal %150 {approx = true} : vector<8x1xf32> -> vector<8x1xf32>
    %152 = vector.broadcast %151 : vector<8x1xf32> to vector<8x8xf32>
    %153 = arith.mulf %148, %152 : vector<8x8xf32>
    %cst_57 = arith.constant dense<0.000000e+00> : vector<8x32xf32>
    %154 = tpu.matmul %153, %140, %cst_57 {dimension_numbers = #tpu.dot_dimension_numbers<[1], [0], [0], [1], [0, 0, 1, 1], [], []>} : vector<8x8xf32>, vector<8x32xf32>, vector<8x32xf32> -> vector<8x32xf32>
    %155 = vector.extract_strided_slice %19 {offsets = [64, 0], sizes = [32, 128], strides = [1, 1]} : vector<128x128xf32> to vector<32x128xf32>
    %cst_58 = arith.constant dense<0.000000e+00> : vector<8x128xf32>
    %156 = tpu.matmul %154, %155, %cst_58 {dimension_numbers = #tpu.dot_dimension_numbers<[1], [0], [0], [1], [0, 0, 1, 1], [], []>} : vector<8x32xf32>, vector<32x128xf32>, vector<8x128xf32> -> vector<8x128xf32>
    %157 = arith.addf %137, %156 : vector<8x128xf32>
    %158 = vector.extract_strided_slice %15 {offsets = [8, 96], sizes = [8, 32], strides = [1, 1]} : vector<16x128xf32> to vector<8x32xf32>
    %159 = vector.extract_strided_slice %16 {offsets = [8, 96], sizes = [8, 32], strides = [1, 1]} : vector<16x128xf32> to vector<8x32xf32>
    %160 = vector.extract_strided_slice %17 {offsets = [8, 96], sizes = [8, 32], strides = [1, 1]} : vector<16x128xf32> to vector<8x32xf32>
    %cst_59 = arith.constant dense<0.000000e+00> : vector<8x8xf32>
    %161 = tpu.matmul %158, %159, %cst_59 {dimension_numbers = #tpu.dot_dimension_numbers<[1], [1], [0], [0], [0, 0, 1, 0], [], []>} : vector<8x32xf32>, vector<8x32xf32>, vector<8x8xf32> -> vector<8x8xf32>
    %cst_60 = arith.constant 0.176776692 : f32
    %162 = vector.broadcast %cst_60 : f32 to vector<8x8xf32>
    %163 = arith.mulf %161, %162 : vector<8x8xf32>
    %cst_61 = arith.constant dense<0xFF800000> : vector<8xf32>
    %164 = vector.multi_reduction <maximumf>, %163, %cst_61 [1] : vector<8x8xf32> to vector<8xf32>
    %165 = vector.shape_cast %164 : vector<8xf32> to vector<8x1xf32>
    %166 = vector.broadcast %165 : vector<8x1xf32> to vector<8x8xf32>
    %167 = arith.subf %163, %166 : vector<8x8xf32>
    %168 = math.exp %167 : vector<8x8xf32>
    %cst_62 = arith.constant dense<0.000000e+00> : vector<8xf32>
    %169 = vector.multi_reduction <add>, %168, %cst_62 [1] : vector<8x8xf32> to vector<8xf32>
    %170 = vector.shape_cast %169 : vector<8xf32> to vector<8x1xf32>
    %171 = tpu.reciprocal %170 {approx = true} : vector<8x1xf32> -> vector<8x1xf32>
    %172 = vector.broadcast %171 : vector<8x1xf32> to vector<8x8xf32>
    %173 = arith.mulf %168, %172 : vector<8x8xf32>
    %cst_63 = arith.constant dense<0.000000e+00> : vector<8x32xf32>
    %174 = tpu.matmul %173, %160, %cst_63 {dimension_numbers = #tpu.dot_dimension_numbers<[1], [0], [0], [1], [0, 0, 1, 1], [], []>} : vector<8x8xf32>, vector<8x32xf32>, vector<8x32xf32> -> vector<8x32xf32>
    %175 = vector.extract_strided_slice %19 {offsets = [96, 0], sizes = [32, 128], strides = [1, 1]} : vector<128x128xf32> to vector<32x128xf32>
    %cst_64 = arith.constant dense<0.000000e+00> : vector<8x128xf32>
    %176 = tpu.matmul %174, %175, %cst_64 {dimension_numbers = #tpu.dot_dimension_numbers<[1], [0], [0], [1], [0, 0, 1, 1], [], []>} : vector<8x32xf32>, vector<32x128xf32>, vector<8x128xf32> -> vector<8x128xf32>
    %177 = arith.addf %157, %176 : vector<8x128xf32>
    %178 = tpu.concatenate %98, %177 in 0 : vector<8x128xf32>, vector<8x128xf32> -> vector<16x128xf32>
    %c0_65 = arith.constant 0 : index
    %c0_66 = arith.constant 0 : index
    %c0_67 = arith.constant 0 : index
    %179 = vector.load %arg7[%c0_65, %c0_66, %c0_67] : memref<2x1x128xf32, #tpu.memory_space<vmem>>, vector<1x1x128xf32>
    %180 = vector.shape_cast %179 : vector<1x1x128xf32> to vector<1x128xf32>
    %181 = vector.broadcast %180 : vector<1x128xf32> to vector<16x128xf32>
    %182 = arith.addf %178, %181 : vector<16x128xf32>
    %183 = arith.addf %7, %182 : vector<16x128xf32>
    %c0_68 = arith.constant 0 : index
    %c0_69 = arith.constant 0 : index
    %c0_70 = arith.constant 0 : index
    %184 = vector.load %arg8[%c0_68, %c0_69, %c0_70] : memref<2x1x128xf32, #tpu.memory_space<vmem>>, vector<1x1x128xf32>
    %185 = vector.shape_cast %184 : vector<1x1x128xf32> to vector<1x128xf32>
    %c0_71 = arith.constant 0 : index
    %c0_72 = arith.constant 0 : index
    %c0_73 = arith.constant 0 : index
    %186 = vector.load %arg9[%c0_71, %c0_72, %c0_73] : memref<2x1x128xf32, #tpu.memory_space<vmem>>, vector<1x1x128xf32>
    %187 = vector.shape_cast %186 : vector<1x1x128xf32> to vector<1x128xf32>
    %cst_74 = arith.constant dense<0.000000e+00> : vector<16xf32>
    %188 = vector.multi_reduction <add>, %183, %cst_74 [1] : vector<16x128xf32> to vector<16xf32>
    %189 = vector.shape_cast %188 : vector<16xf32> to vector<16x1xf32>
    %cst_75 = arith.constant 1.280000e+02 : f32
    %190 = vector.broadcast %cst_75 : f32 to vector<16x1xf32>
    %191 = arith.divf %189, %190 : vector<16x1xf32>
    %192 = vector.broadcast %191 : vector<16x1xf32> to vector<16x128xf32>
    %193 = arith.subf %183, %192 : vector<16x128xf32>
    %194 = arith.mulf %193, %193 : vector<16x128xf32>
    %cst_76 = arith.constant dense<0.000000e+00> : vector<16xf32>
    %195 = vector.multi_reduction <add>, %194, %cst_76 [1] : vector<16x128xf32> to vector<16xf32>
    %196 = vector.shape_cast %195 : vector<16xf32> to vector<16x1xf32>
    %cst_77 = arith.constant 1.280000e+02 : f32
    %197 = vector.broadcast %cst_77 : f32 to vector<16x1xf32>
    %198 = arith.divf %196, %197 : vector<16x1xf32>
    %199 = vector.broadcast %191 : vector<16x1xf32> to vector<16x128xf32>
    %200 = arith.subf %183, %199 : vector<16x128xf32>
    %cst_78 = arith.constant 9.99999974E-6 : f32
    %201 = vector.broadcast %cst_78 : f32 to vector<16x1xf32>
    %202 = arith.addf %198, %201 : vector<16x1xf32>
    %203 = math.rsqrt %202 : vector<16x1xf32>
    %204 = vector.broadcast %203 : vector<16x1xf32> to vector<16x128xf32>
    %205 = arith.mulf %200, %204 : vector<16x128xf32>
    %206 = vector.broadcast %185 : vector<1x128xf32> to vector<16x128xf32>
    %207 = arith.mulf %205, %206 : vector<16x128xf32>
    %208 = vector.broadcast %187 : vector<1x128xf32> to vector<16x128xf32>
    %209 = arith.addf %207, %208 : vector<16x128xf32>
    %c0_79 = arith.constant 0 : index
    %c0_80 = arith.constant 0 : index
    %c0_81 = arith.constant 0 : index
    %210 = vector.load %arg10[%c0_79, %c0_80, %c0_81] : memref<2x128x512xf32, #tpu.memory_space<vmem>>, vector<1x128x512xf32>
    %211 = vector.shape_cast %210 : vector<1x128x512xf32> to vector<128x512xf32>
    %cst_82 = arith.constant dense<0.000000e+00> : vector<16x512xf32>
    %212 = tpu.matmul %209, %211, %cst_82 {dimension_numbers = #tpu.dot_dimension_numbers<[1], [0], [0], [1], [0, 0, 1, 1], [], []>} : vector<16x128xf32>, vector<128x512xf32>, vector<16x512xf32> -> vector<16x512xf32>
    %c0_83 = arith.constant 0 : index
    %c0_84 = arith.constant 0 : index
    %c0_85 = arith.constant 0 : index
    %213 = vector.load %arg11[%c0_83, %c0_84, %c0_85] : memref<2x1x512xf32, #tpu.memory_space<vmem>>, vector<1x1x512xf32>
    %214 = vector.shape_cast %213 : vector<1x1x512xf32> to vector<1x512xf32>
    %215 = vector.broadcast %214 : vector<1x512xf32> to vector<16x512xf32>
    %216 = arith.addf %212, %215 : vector<16x512xf32>
    %cst_86 = arith.constant 0.000000e+00 : f32
    %217 = vector.broadcast %cst_86 : f32 to vector<16x512xf32>
    %218 = arith.maximumf %216, %217 : vector<16x512xf32>
    %c0_87 = arith.constant 0 : index
    %c0_88 = arith.constant 0 : index
    %c0_89 = arith.constant 0 : index
    %219 = vector.load %arg12[%c0_87, %c0_88, %c0_89] : memref<2x512x128xf32, #tpu.memory_space<vmem>>, vector<1x512x128xf32>
    %220 = vector.shape_cast %219 : vector<1x512x128xf32> to vector<512x128xf32>
    %cst_90 = arith.constant dense<0.000000e+00> : vector<16x128xf32>
    %221 = tpu.matmul %218, %220, %cst_90 {dimension_numbers = #tpu.dot_dimension_numbers<[1], [0], [0], [1], [0, 0, 1, 1], [], []>} : vector<16x512xf32>, vector<512x128xf32>, vector<16x128xf32> -> vector<16x128xf32>
    %c0_91 = arith.constant 0 : index
    %c0_92 = arith.constant 0 : index
    %c0_93 = arith.constant 0 : index
    %222 = vector.load %arg13[%c0_91, %c0_92, %c0_93] : memref<2x1x128xf32, #tpu.memory_space<vmem>>, vector<1x1x128xf32>
    %223 = vector.shape_cast %222 : vector<1x1x128xf32> to vector<1x128xf32>
    %224 = vector.broadcast %223 : vector<1x128xf32> to vector<16x128xf32>
    %225 = arith.addf %221, %224 : vector<16x128xf32>
    %226 = arith.addf %209, %225 : vector<16x128xf32>
    %c0_94 = arith.constant 0 : index
    %c0_95 = arith.constant 0 : index
    %c0_96 = arith.constant 0 : index
    %227 = vector.load %arg14[%c0_94, %c0_95, %c0_96] : memref<2x1x128xf32, #tpu.memory_space<vmem>>, vector<1x1x128xf32>
    %228 = vector.shape_cast %227 : vector<1x1x128xf32> to vector<1x128xf32>
    %c0_97 = arith.constant 0 : index
    %c0_98 = arith.constant 0 : index
    %c0_99 = arith.constant 0 : index
    %229 = vector.load %arg15[%c0_97, %c0_98, %c0_99] : memref<2x1x128xf32, #tpu.memory_space<vmem>>, vector<1x1x128xf32>
    %230 = vector.shape_cast %229 : vector<1x1x128xf32> to vector<1x128xf32>
    %cst_100 = arith.constant dense<0.000000e+00> : vector<16xf32>
    %231 = vector.multi_reduction <add>, %226, %cst_100 [1] : vector<16x128xf32> to vector<16xf32>
    %232 = vector.shape_cast %231 : vector<16xf32> to vector<16x1xf32>
    %cst_101 = arith.constant 1.280000e+02 : f32
    %233 = vector.broadcast %cst_101 : f32 to vector<16x1xf32>
    %234 = arith.divf %232, %233 : vector<16x1xf32>
    %235 = vector.broadcast %234 : vector<16x1xf32> to vector<16x128xf32>
    %236 = arith.subf %226, %235 : vector<16x128xf32>
    %237 = arith.mulf %236, %236 : vector<16x128xf32>
    %cst_102 = arith.constant dense<0.000000e+00> : vector<16xf32>
    %238 = vector.multi_reduction <add>, %237, %cst_102 [1] : vector<16x128xf32> to vector<16xf32>
    %239 = vector.shape_cast %238 : vector<16xf32> to vector<16x1xf32>
    %cst_103 = arith.constant 1.280000e+02 : f32
    %240 = vector.broadcast %cst_103 : f32 to vector<16x1xf32>
    %241 = arith.divf %239, %240 : vector<16x1xf32>
    %242 = vector.broadcast %234 : vector<16x1xf32> to vector<16x128xf32>
    %243 = arith.subf %226, %242 : vector<16x128xf32>
    %cst_104 = arith.constant 9.99999974E-6 : f32
    %244 = vector.broadcast %cst_104 : f32 to vector<16x1xf32>
    %245 = arith.addf %241, %244 : vector<16x1xf32>
    %246 = math.rsqrt %245 : vector<16x1xf32>
    %247 = vector.broadcast %246 : vector<16x1xf32> to vector<16x128xf32>
    %248 = arith.mulf %243, %247 : vector<16x128xf32>
    %249 = vector.broadcast %228 : vector<1x128xf32> to vector<16x128xf32>
    %250 = arith.mulf %248, %249 : vector<16x128xf32>
    %251 = vector.broadcast %230 : vector<1x128xf32> to vector<16x128xf32>
    %252 = arith.addf %250, %251 : vector<16x128xf32>
    %c1 = arith.constant 1 : index
    %c0_105 = arith.constant 0 : index
    %c0_106 = arith.constant 0 : index
    %253 = vector.load %arg4[%c1, %c0_105, %c0_106] : memref<2x128x384xf32, #tpu.memory_space<vmem>>, vector<1x128x384xf32>
    %254 = vector.shape_cast %253 : vector<1x128x384xf32> to vector<128x384xf32>
    %cst_107 = arith.constant dense<0.000000e+00> : vector<16x384xf32>
    %255 = tpu.matmul %252, %254, %cst_107 {dimension_numbers = #tpu.dot_dimension_numbers<[1], [0], [0], [1], [0, 0, 1, 1], [], []>} : vector<16x128xf32>, vector<128x384xf32>, vector<16x384xf32> -> vector<16x384xf32>
    %c1_108 = arith.constant 1 : index
    %c0_109 = arith.constant 0 : index
    %c0_110 = arith.constant 0 : index
    %256 = vector.load %arg5[%c1_108, %c0_109, %c0_110] : memref<2x1x384xf32, #tpu.memory_space<vmem>>, vector<1x1x384xf32>
    %257 = vector.shape_cast %256 : vector<1x1x384xf32> to vector<1x384xf32>
    %258 = vector.broadcast %257 : vector<1x384xf32> to vector<16x384xf32>
    %259 = arith.addf %255, %258 : vector<16x384xf32>
    %260 = vector.extract_strided_slice %259 {offsets = [0, 0], sizes = [16, 128], strides = [1, 1]} : vector<16x384xf32> to vector<16x128xf32>
    %261 = vector.extract_strided_slice %259 {offsets = [0, 128], sizes = [16, 128], strides = [1, 1]} : vector<16x384xf32> to vector<16x128xf32>
    %262 = vector.extract_strided_slice %259 {offsets = [0, 256], sizes = [16, 128], strides = [1, 1]} : vector<16x384xf32> to vector<16x128xf32>
    %c1_111 = arith.constant 1 : index
    %c0_112 = arith.constant 0 : index
    %c0_113 = arith.constant 0 : index
    %263 = vector.load %arg6[%c1_111, %c0_112, %c0_113] : memref<2x128x128xf32, #tpu.memory_space<vmem>>, vector<1x128x128xf32>
    %264 = vector.shape_cast %263 : vector<1x128x128xf32> to vector<128x128xf32>
    %265 = vector.extract_strided_slice %260 {offsets = [0, 0], sizes = [8, 32], strides = [1, 1]} : vector<16x128xf32> to vector<8x32xf32>
    %266 = vector.extract_strided_slice %261 {offsets = [0, 0], sizes = [8, 32], strides = [1, 1]} : vector<16x128xf32> to vector<8x32xf32>
    %267 = vector.extract_strided_slice %262 {offsets = [0, 0], sizes = [8, 32], strides = [1, 1]} : vector<16x128xf32> to vector<8x32xf32>
    %cst_114 = arith.constant dense<0.000000e+00> : vector<8x8xf32>
    %268 = tpu.matmul %265, %266, %cst_114 {dimension_numbers = #tpu.dot_dimension_numbers<[1], [1], [0], [0], [0, 0, 1, 0], [], []>} : vector<8x32xf32>, vector<8x32xf32>, vector<8x8xf32> -> vector<8x8xf32>
    %cst_115 = arith.constant 0.176776692 : f32
    %269 = vector.broadcast %cst_115 : f32 to vector<8x8xf32>
    %270 = arith.mulf %268, %269 : vector<8x8xf32>
    %cst_116 = arith.constant dense<0xFF800000> : vector<8xf32>
    %271 = vector.multi_reduction <maximumf>, %270, %cst_116 [1] : vector<8x8xf32> to vector<8xf32>
    %272 = vector.shape_cast %271 : vector<8xf32> to vector<8x1xf32>
    %273 = vector.broadcast %272 : vector<8x1xf32> to vector<8x8xf32>
    %274 = arith.subf %270, %273 : vector<8x8xf32>
    %275 = math.exp %274 : vector<8x8xf32>
    %cst_117 = arith.constant dense<0.000000e+00> : vector<8xf32>
    %276 = vector.multi_reduction <add>, %275, %cst_117 [1] : vector<8x8xf32> to vector<8xf32>
    %277 = vector.shape_cast %276 : vector<8xf32> to vector<8x1xf32>
    %278 = tpu.reciprocal %277 {approx = true} : vector<8x1xf32> -> vector<8x1xf32>
    %279 = vector.broadcast %278 : vector<8x1xf32> to vector<8x8xf32>
    %280 = arith.mulf %275, %279 : vector<8x8xf32>
    %cst_118 = arith.constant dense<0.000000e+00> : vector<8x32xf32>
    %281 = tpu.matmul %280, %267, %cst_118 {dimension_numbers = #tpu.dot_dimension_numbers<[1], [0], [0], [1], [0, 0, 1, 1], [], []>} : vector<8x8xf32>, vector<8x32xf32>, vector<8x32xf32> -> vector<8x32xf32>
    %282 = vector.extract_strided_slice %264 {offsets = [0, 0], sizes = [32, 128], strides = [1, 1]} : vector<128x128xf32> to vector<32x128xf32>
    %cst_119 = arith.constant dense<0.000000e+00> : vector<8x128xf32>
    %283 = tpu.matmul %281, %282, %cst_119 {dimension_numbers = #tpu.dot_dimension_numbers<[1], [0], [0], [1], [0, 0, 1, 1], [], []>} : vector<8x32xf32>, vector<32x128xf32>, vector<8x128xf32> -> vector<8x128xf32>
    %284 = vector.extract_strided_slice %260 {offsets = [0, 32], sizes = [8, 32], strides = [1, 1]} : vector<16x128xf32> to vector<8x32xf32>
    %285 = vector.extract_strided_slice %261 {offsets = [0, 32], sizes = [8, 32], strides = [1, 1]} : vector<16x128xf32> to vector<8x32xf32>
    %286 = vector.extract_strided_slice %262 {offsets = [0, 32], sizes = [8, 32], strides = [1, 1]} : vector<16x128xf32> to vector<8x32xf32>
    %cst_120 = arith.constant dense<0.000000e+00> : vector<8x8xf32>
    %287 = tpu.matmul %284, %285, %cst_120 {dimension_numbers = #tpu.dot_dimension_numbers<[1], [1], [0], [0], [0, 0, 1, 0], [], []>} : vector<8x32xf32>, vector<8x32xf32>, vector<8x8xf32> -> vector<8x8xf32>
    %cst_121 = arith.constant 0.176776692 : f32
    %288 = vector.broadcast %cst_121 : f32 to vector<8x8xf32>
    %289 = arith.mulf %287, %288 : vector<8x8xf32>
    %cst_122 = arith.constant dense<0xFF800000> : vector<8xf32>
    %290 = vector.multi_reduction <maximumf>, %289, %cst_122 [1] : vector<8x8xf32> to vector<8xf32>
    %291 = vector.shape_cast %290 : vector<8xf32> to vector<8x1xf32>
    %292 = vector.broadcast %291 : vector<8x1xf32> to vector<8x8xf32>
    %293 = arith.subf %289, %292 : vector<8x8xf32>
    %294 = math.exp %293 : vector<8x8xf32>
    %cst_123 = arith.constant dense<0.000000e+00> : vector<8xf32>
    %295 = vector.multi_reduction <add>, %294, %cst_123 [1] : vector<8x8xf32> to vector<8xf32>
    %296 = vector.shape_cast %295 : vector<8xf32> to vector<8x1xf32>
    %297 = tpu.reciprocal %296 {approx = true} : vector<8x1xf32> -> vector<8x1xf32>
    %298 = vector.broadcast %297 : vector<8x1xf32> to vector<8x8xf32>
    %299 = arith.mulf %294, %298 : vector<8x8xf32>
    %cst_124 = arith.constant dense<0.000000e+00> : vector<8x32xf32>
    %300 = tpu.matmul %299, %286, %cst_124 {dimension_numbers = #tpu.dot_dimension_numbers<[1], [0], [0], [1], [0, 0, 1, 1], [], []>} : vector<8x8xf32>, vector<8x32xf32>, vector<8x32xf32> -> vector<8x32xf32>
    %301 = vector.extract_strided_slice %264 {offsets = [32, 0], sizes = [32, 128], strides = [1, 1]} : vector<128x128xf32> to vector<32x128xf32>
    %cst_125 = arith.constant dense<0.000000e+00> : vector<8x128xf32>
    %302 = tpu.matmul %300, %301, %cst_125 {dimension_numbers = #tpu.dot_dimension_numbers<[1], [0], [0], [1], [0, 0, 1, 1], [], []>} : vector<8x32xf32>, vector<32x128xf32>, vector<8x128xf32> -> vector<8x128xf32>
    %303 = arith.addf %283, %302 : vector<8x128xf32>
    %304 = vector.extract_strided_slice %260 {offsets = [0, 64], sizes = [8, 32], strides = [1, 1]} : vector<16x128xf32> to vector<8x32xf32>
    %305 = vector.extract_strided_slice %261 {offsets = [0, 64], sizes = [8, 32], strides = [1, 1]} : vector<16x128xf32> to vector<8x32xf32>
    %306 = vector.extract_strided_slice %262 {offsets = [0, 64], sizes = [8, 32], strides = [1, 1]} : vector<16x128xf32> to vector<8x32xf32>
    %cst_126 = arith.constant dense<0.000000e+00> : vector<8x8xf32>
    %307 = tpu.matmul %304, %305, %cst_126 {dimension_numbers = #tpu.dot_dimension_numbers<[1], [1], [0], [0], [0, 0, 1, 0], [], []>} : vector<8x32xf32>, vector<8x32xf32>, vector<8x8xf32> -> vector<8x8xf32>
    %cst_127 = arith.constant 0.176776692 : f32
    %308 = vector.broadcast %cst_127 : f32 to vector<8x8xf32>
    %309 = arith.mulf %307, %308 : vector<8x8xf32>
    %cst_128 = arith.constant dense<0xFF800000> : vector<8xf32>
    %310 = vector.multi_reduction <maximumf>, %309, %cst_128 [1] : vector<8x8xf32> to vector<8xf32>
    %311 = vector.shape_cast %310 : vector<8xf32> to vector<8x1xf32>
    %312 = vector.broadcast %311 : vector<8x1xf32> to vector<8x8xf32>
    %313 = arith.subf %309, %312 : vector<8x8xf32>
    %314 = math.exp %313 : vector<8x8xf32>
    %cst_129 = arith.constant dense<0.000000e+00> : vector<8xf32>
    %315 = vector.multi_reduction <add>, %314, %cst_129 [1] : vector<8x8xf32> to vector<8xf32>
    %316 = vector.shape_cast %315 : vector<8xf32> to vector<8x1xf32>
    %317 = tpu.reciprocal %316 {approx = true} : vector<8x1xf32> -> vector<8x1xf32>
    %318 = vector.broadcast %317 : vector<8x1xf32> to vector<8x8xf32>
    %319 = arith.mulf %314, %318 : vector<8x8xf32>
    %cst_130 = arith.constant dense<0.000000e+00> : vector<8x32xf32>
    %320 = tpu.matmul %319, %306, %cst_130 {dimension_numbers = #tpu.dot_dimension_numbers<[1], [0], [0], [1], [0, 0, 1, 1], [], []>} : vector<8x8xf32>, vector<8x32xf32>, vector<8x32xf32> -> vector<8x32xf32>
    %321 = vector.extract_strided_slice %264 {offsets = [64, 0], sizes = [32, 128], strides = [1, 1]} : vector<128x128xf32> to vector<32x128xf32>
    %cst_131 = arith.constant dense<0.000000e+00> : vector<8x128xf32>
    %322 = tpu.matmul %320, %321, %cst_131 {dimension_numbers = #tpu.dot_dimension_numbers<[1], [0], [0], [1], [0, 0, 1, 1], [], []>} : vector<8x32xf32>, vector<32x128xf32>, vector<8x128xf32> -> vector<8x128xf32>
    %323 = arith.addf %303, %322 : vector<8x128xf32>
    %324 = vector.extract_strided_slice %260 {offsets = [0, 96], sizes = [8, 32], strides = [1, 1]} : vector<16x128xf32> to vector<8x32xf32>
    %325 = vector.extract_strided_slice %261 {offsets = [0, 96], sizes = [8, 32], strides = [1, 1]} : vector<16x128xf32> to vector<8x32xf32>
    %326 = vector.extract_strided_slice %262 {offsets = [0, 96], sizes = [8, 32], strides = [1, 1]} : vector<16x128xf32> to vector<8x32xf32>
    %cst_132 = arith.constant dense<0.000000e+00> : vector<8x8xf32>
    %327 = tpu.matmul %324, %325, %cst_132 {dimension_numbers = #tpu.dot_dimension_numbers<[1], [1], [0], [0], [0, 0, 1, 0], [], []>} : vector<8x32xf32>, vector<8x32xf32>, vector<8x8xf32> -> vector<8x8xf32>
    %cst_133 = arith.constant 0.176776692 : f32
    %328 = vector.broadcast %cst_133 : f32 to vector<8x8xf32>
    %329 = arith.mulf %327, %328 : vector<8x8xf32>
    %cst_134 = arith.constant dense<0xFF800000> : vector<8xf32>
    %330 = vector.multi_reduction <maximumf>, %329, %cst_134 [1] : vector<8x8xf32> to vector<8xf32>
    %331 = vector.shape_cast %330 : vector<8xf32> to vector<8x1xf32>
    %332 = vector.broadcast %331 : vector<8x1xf32> to vector<8x8xf32>
    %333 = arith.subf %329, %332 : vector<8x8xf32>
    %334 = math.exp %333 : vector<8x8xf32>
    %cst_135 = arith.constant dense<0.000000e+00> : vector<8xf32>
    %335 = vector.multi_reduction <add>, %334, %cst_135 [1] : vector<8x8xf32> to vector<8xf32>
    %336 = vector.shape_cast %335 : vector<8xf32> to vector<8x1xf32>
    %337 = tpu.reciprocal %336 {approx = true} : vector<8x1xf32> -> vector<8x1xf32>
    %338 = vector.broadcast %337 : vector<8x1xf32> to vector<8x8xf32>
    %339 = arith.mulf %334, %338 : vector<8x8xf32>
    %cst_136 = arith.constant dense<0.000000e+00> : vector<8x32xf32>
    %340 = tpu.matmul %339, %326, %cst_136 {dimension_numbers = #tpu.dot_dimension_numbers<[1], [0], [0], [1], [0, 0, 1, 1], [], []>} : vector<8x8xf32>, vector<8x32xf32>, vector<8x32xf32> -> vector<8x32xf32>
    %341 = vector.extract_strided_slice %264 {offsets = [96, 0], sizes = [32, 128], strides = [1, 1]} : vector<128x128xf32> to vector<32x128xf32>
    %cst_137 = arith.constant dense<0.000000e+00> : vector<8x128xf32>
    %342 = tpu.matmul %340, %341, %cst_137 {dimension_numbers = #tpu.dot_dimension_numbers<[1], [0], [0], [1], [0, 0, 1, 1], [], []>} : vector<8x32xf32>, vector<32x128xf32>, vector<8x128xf32> -> vector<8x128xf32>
    %343 = arith.addf %323, %342 : vector<8x128xf32>
    %344 = vector.extract_strided_slice %260 {offsets = [8, 0], sizes = [8, 32], strides = [1, 1]} : vector<16x128xf32> to vector<8x32xf32>
    %345 = vector.extract_strided_slice %261 {offsets = [8, 0], sizes = [8, 32], strides = [1, 1]} : vector<16x128xf32> to vector<8x32xf32>
    %346 = vector.extract_strided_slice %262 {offsets = [8, 0], sizes = [8, 32], strides = [1, 1]} : vector<16x128xf32> to vector<8x32xf32>
    %cst_138 = arith.constant dense<0.000000e+00> : vector<8x8xf32>
    %347 = tpu.matmul %344, %345, %cst_138 {dimension_numbers = #tpu.dot_dimension_numbers<[1], [1], [0], [0], [0, 0, 1, 0], [], []>} : vector<8x32xf32>, vector<8x32xf32>, vector<8x8xf32> -> vector<8x8xf32>
    %cst_139 = arith.constant 0.176776692 : f32
    %348 = vector.broadcast %cst_139 : f32 to vector<8x8xf32>
    %349 = arith.mulf %347, %348 : vector<8x8xf32>
    %cst_140 = arith.constant dense<0xFF800000> : vector<8xf32>
    %350 = vector.multi_reduction <maximumf>, %349, %cst_140 [1] : vector<8x8xf32> to vector<8xf32>
    %351 = vector.shape_cast %350 : vector<8xf32> to vector<8x1xf32>
    %352 = vector.broadcast %351 : vector<8x1xf32> to vector<8x8xf32>
    %353 = arith.subf %349, %352 : vector<8x8xf32>
    %354 = math.exp %353 : vector<8x8xf32>
    %cst_141 = arith.constant dense<0.000000e+00> : vector<8xf32>
    %355 = vector.multi_reduction <add>, %354, %cst_141 [1] : vector<8x8xf32> to vector<8xf32>
    %356 = vector.shape_cast %355 : vector<8xf32> to vector<8x1xf32>
    %357 = tpu.reciprocal %356 {approx = true} : vector<8x1xf32> -> vector<8x1xf32>
    %358 = vector.broadcast %357 : vector<8x1xf32> to vector<8x8xf32>
    %359 = arith.mulf %354, %358 : vector<8x8xf32>
    %cst_142 = arith.constant dense<0.000000e+00> : vector<8x32xf32>
    %360 = tpu.matmul %359, %346, %cst_142 {dimension_numbers = #tpu.dot_dimension_numbers<[1], [0], [0], [1], [0, 0, 1, 1], [], []>} : vector<8x8xf32>, vector<8x32xf32>, vector<8x32xf32> -> vector<8x32xf32>
    %361 = vector.extract_strided_slice %264 {offsets = [0, 0], sizes = [32, 128], strides = [1, 1]} : vector<128x128xf32> to vector<32x128xf32>
    %cst_143 = arith.constant dense<0.000000e+00> : vector<8x128xf32>
    %362 = tpu.matmul %360, %361, %cst_143 {dimension_numbers = #tpu.dot_dimension_numbers<[1], [0], [0], [1], [0, 0, 1, 1], [], []>} : vector<8x32xf32>, vector<32x128xf32>, vector<8x128xf32> -> vector<8x128xf32>
    %363 = vector.extract_strided_slice %260 {offsets = [8, 32], sizes = [8, 32], strides = [1, 1]} : vector<16x128xf32> to vector<8x32xf32>
    %364 = vector.extract_strided_slice %261 {offsets = [8, 32], sizes = [8, 32], strides = [1, 1]} : vector<16x128xf32> to vector<8x32xf32>
    %365 = vector.extract_strided_slice %262 {offsets = [8, 32], sizes = [8, 32], strides = [1, 1]} : vector<16x128xf32> to vector<8x32xf32>
    %cst_144 = arith.constant dense<0.000000e+00> : vector<8x8xf32>
    %366 = tpu.matmul %363, %364, %cst_144 {dimension_numbers = #tpu.dot_dimension_numbers<[1], [1], [0], [0], [0, 0, 1, 0], [], []>} : vector<8x32xf32>, vector<8x32xf32>, vector<8x8xf32> -> vector<8x8xf32>
    %cst_145 = arith.constant 0.176776692 : f32
    %367 = vector.broadcast %cst_145 : f32 to vector<8x8xf32>
    %368 = arith.mulf %366, %367 : vector<8x8xf32>
    %cst_146 = arith.constant dense<0xFF800000> : vector<8xf32>
    %369 = vector.multi_reduction <maximumf>, %368, %cst_146 [1] : vector<8x8xf32> to vector<8xf32>
    %370 = vector.shape_cast %369 : vector<8xf32> to vector<8x1xf32>
    %371 = vector.broadcast %370 : vector<8x1xf32> to vector<8x8xf32>
    %372 = arith.subf %368, %371 : vector<8x8xf32>
    %373 = math.exp %372 : vector<8x8xf32>
    %cst_147 = arith.constant dense<0.000000e+00> : vector<8xf32>
    %374 = vector.multi_reduction <add>, %373, %cst_147 [1] : vector<8x8xf32> to vector<8xf32>
    %375 = vector.shape_cast %374 : vector<8xf32> to vector<8x1xf32>
    %376 = tpu.reciprocal %375 {approx = true} : vector<8x1xf32> -> vector<8x1xf32>
    %377 = vector.broadcast %376 : vector<8x1xf32> to vector<8x8xf32>
    %378 = arith.mulf %373, %377 : vector<8x8xf32>
    %cst_148 = arith.constant dense<0.000000e+00> : vector<8x32xf32>
    %379 = tpu.matmul %378, %365, %cst_148 {dimension_numbers = #tpu.dot_dimension_numbers<[1], [0], [0], [1], [0, 0, 1, 1], [], []>} : vector<8x8xf32>, vector<8x32xf32>, vector<8x32xf32> -> vector<8x32xf32>
    %380 = vector.extract_strided_slice %264 {offsets = [32, 0], sizes = [32, 128], strides = [1, 1]} : vector<128x128xf32> to vector<32x128xf32>
    %cst_149 = arith.constant dense<0.000000e+00> : vector<8x128xf32>
    %381 = tpu.matmul %379, %380, %cst_149 {dimension_numbers = #tpu.dot_dimension_numbers<[1], [0], [0], [1], [0, 0, 1, 1], [], []>} : vector<8x32xf32>, vector<32x128xf32>, vector<8x128xf32> -> vector<8x128xf32>
    %382 = arith.addf %362, %381 : vector<8x128xf32>
    %383 = vector.extract_strided_slice %260 {offsets = [8, 64], sizes = [8, 32], strides = [1, 1]} : vector<16x128xf32> to vector<8x32xf32>
    %384 = vector.extract_strided_slice %261 {offsets = [8, 64], sizes = [8, 32], strides = [1, 1]} : vector<16x128xf32> to vector<8x32xf32>
    %385 = vector.extract_strided_slice %262 {offsets = [8, 64], sizes = [8, 32], strides = [1, 1]} : vector<16x128xf32> to vector<8x32xf32>
    %cst_150 = arith.constant dense<0.000000e+00> : vector<8x8xf32>
    %386 = tpu.matmul %383, %384, %cst_150 {dimension_numbers = #tpu.dot_dimension_numbers<[1], [1], [0], [0], [0, 0, 1, 0], [], []>} : vector<8x32xf32>, vector<8x32xf32>, vector<8x8xf32> -> vector<8x8xf32>
    %cst_151 = arith.constant 0.176776692 : f32
    %387 = vector.broadcast %cst_151 : f32 to vector<8x8xf32>
    %388 = arith.mulf %386, %387 : vector<8x8xf32>
    %cst_152 = arith.constant dense<0xFF800000> : vector<8xf32>
    %389 = vector.multi_reduction <maximumf>, %388, %cst_152 [1] : vector<8x8xf32> to vector<8xf32>
    %390 = vector.shape_cast %389 : vector<8xf32> to vector<8x1xf32>
    %391 = vector.broadcast %390 : vector<8x1xf32> to vector<8x8xf32>
    %392 = arith.subf %388, %391 : vector<8x8xf32>
    %393 = math.exp %392 : vector<8x8xf32>
    %cst_153 = arith.constant dense<0.000000e+00> : vector<8xf32>
    %394 = vector.multi_reduction <add>, %393, %cst_153 [1] : vector<8x8xf32> to vector<8xf32>
    %395 = vector.shape_cast %394 : vector<8xf32> to vector<8x1xf32>
    %396 = tpu.reciprocal %395 {approx = true} : vector<8x1xf32> -> vector<8x1xf32>
    %397 = vector.broadcast %396 : vector<8x1xf32> to vector<8x8xf32>
    %398 = arith.mulf %393, %397 : vector<8x8xf32>
    %cst_154 = arith.constant dense<0.000000e+00> : vector<8x32xf32>
    %399 = tpu.matmul %398, %385, %cst_154 {dimension_numbers = #tpu.dot_dimension_numbers<[1], [0], [0], [1], [0, 0, 1, 1], [], []>} : vector<8x8xf32>, vector<8x32xf32>, vector<8x32xf32> -> vector<8x32xf32>
    %400 = vector.extract_strided_slice %264 {offsets = [64, 0], sizes = [32, 128], strides = [1, 1]} : vector<128x128xf32> to vector<32x128xf32>
    %cst_155 = arith.constant dense<0.000000e+00> : vector<8x128xf32>
    %401 = tpu.matmul %399, %400, %cst_155 {dimension_numbers = #tpu.dot_dimension_numbers<[1], [0], [0], [1], [0, 0, 1, 1], [], []>} : vector<8x32xf32>, vector<32x128xf32>, vector<8x128xf32> -> vector<8x128xf32>
    %402 = arith.addf %382, %401 : vector<8x128xf32>
    %403 = vector.extract_strided_slice %260 {offsets = [8, 96], sizes = [8, 32], strides = [1, 1]} : vector<16x128xf32> to vector<8x32xf32>
    %404 = vector.extract_strided_slice %261 {offsets = [8, 96], sizes = [8, 32], strides = [1, 1]} : vector<16x128xf32> to vector<8x32xf32>
    %405 = vector.extract_strided_slice %262 {offsets = [8, 96], sizes = [8, 32], strides = [1, 1]} : vector<16x128xf32> to vector<8x32xf32>
    %cst_156 = arith.constant dense<0.000000e+00> : vector<8x8xf32>
    %406 = tpu.matmul %403, %404, %cst_156 {dimension_numbers = #tpu.dot_dimension_numbers<[1], [1], [0], [0], [0, 0, 1, 0], [], []>} : vector<8x32xf32>, vector<8x32xf32>, vector<8x8xf32> -> vector<8x8xf32>
    %cst_157 = arith.constant 0.176776692 : f32
    %407 = vector.broadcast %cst_157 : f32 to vector<8x8xf32>
    %408 = arith.mulf %406, %407 : vector<8x8xf32>
    %cst_158 = arith.constant dense<0xFF800000> : vector<8xf32>
    %409 = vector.multi_reduction <maximumf>, %408, %cst_158 [1] : vector<8x8xf32> to vector<8xf32>
    %410 = vector.shape_cast %409 : vector<8xf32> to vector<8x1xf32>
    %411 = vector.broadcast %410 : vector<8x1xf32> to vector<8x8xf32>
    %412 = arith.subf %408, %411 : vector<8x8xf32>
    %413 = math.exp %412 : vector<8x8xf32>
    %cst_159 = arith.constant dense<0.000000e+00> : vector<8xf32>
    %414 = vector.multi_reduction <add>, %413, %cst_159 [1] : vector<8x8xf32> to vector<8xf32>
    %415 = vector.shape_cast %414 : vector<8xf32> to vector<8x1xf32>
    %416 = tpu.reciprocal %415 {approx = true} : vector<8x1xf32> -> vector<8x1xf32>
    %417 = vector.broadcast %416 : vector<8x1xf32> to vector<8x8xf32>
    %418 = arith.mulf %413, %417 : vector<8x8xf32>
    %cst_160 = arith.constant dense<0.000000e+00> : vector<8x32xf32>
    %419 = tpu.matmul %418, %405, %cst_160 {dimension_numbers = #tpu.dot_dimension_numbers<[1], [0], [0], [1], [0, 0, 1, 1], [], []>} : vector<8x8xf32>, vector<8x32xf32>, vector<8x32xf32> -> vector<8x32xf32>
    %420 = vector.extract_strided_slice %264 {offsets = [96, 0], sizes = [32, 128], strides = [1, 1]} : vector<128x128xf32> to vector<32x128xf32>
    %cst_161 = arith.constant dense<0.000000e+00> : vector<8x128xf32>
    %421 = tpu.matmul %419, %420, %cst_161 {dimension_numbers = #tpu.dot_dimension_numbers<[1], [0], [0], [1], [0, 0, 1, 1], [], []>} : vector<8x32xf32>, vector<32x128xf32>, vector<8x128xf32> -> vector<8x128xf32>
    %422 = arith.addf %402, %421 : vector<8x128xf32>
    %423 = tpu.concatenate %343, %422 in 0 : vector<8x128xf32>, vector<8x128xf32> -> vector<16x128xf32>
    %c1_162 = arith.constant 1 : index
    %c0_163 = arith.constant 0 : index
    %c0_164 = arith.constant 0 : index
    %424 = vector.load %arg7[%c1_162, %c0_163, %c0_164] : memref<2x1x128xf32, #tpu.memory_space<vmem>>, vector<1x1x128xf32>
    %425 = vector.shape_cast %424 : vector<1x1x128xf32> to vector<1x128xf32>
    %426 = vector.broadcast %425 : vector<1x128xf32> to vector<16x128xf32>
    %427 = arith.addf %423, %426 : vector<16x128xf32>
    %428 = arith.addf %252, %427 : vector<16x128xf32>
    %c1_165 = arith.constant 1 : index
    %c0_166 = arith.constant 0 : index
    %c0_167 = arith.constant 0 : index
    %429 = vector.load %arg8[%c1_165, %c0_166, %c0_167] : memref<2x1x128xf32, #tpu.memory_space<vmem>>, vector<1x1x128xf32>
    %430 = vector.shape_cast %429 : vector<1x1x128xf32> to vector<1x128xf32>
    %c1_168 = arith.constant 1 : index
    %c0_169 = arith.constant 0 : index
    %c0_170 = arith.constant 0 : index
    %431 = vector.load %arg9[%c1_168, %c0_169, %c0_170] : memref<2x1x128xf32, #tpu.memory_space<vmem>>, vector<1x1x128xf32>
    %432 = vector.shape_cast %431 : vector<1x1x128xf32> to vector<1x128xf32>
    %cst_171 = arith.constant dense<0.000000e+00> : vector<16xf32>
    %433 = vector.multi_reduction <add>, %428, %cst_171 [1] : vector<16x128xf32> to vector<16xf32>
    %434 = vector.shape_cast %433 : vector<16xf32> to vector<16x1xf32>
    %cst_172 = arith.constant 1.280000e+02 : f32
    %435 = vector.broadcast %cst_172 : f32 to vector<16x1xf32>
    %436 = arith.divf %434, %435 : vector<16x1xf32>
    %437 = vector.broadcast %436 : vector<16x1xf32> to vector<16x128xf32>
    %438 = arith.subf %428, %437 : vector<16x128xf32>
    %439 = arith.mulf %438, %438 : vector<16x128xf32>
    %cst_173 = arith.constant dense<0.000000e+00> : vector<16xf32>
    %440 = vector.multi_reduction <add>, %439, %cst_173 [1] : vector<16x128xf32> to vector<16xf32>
    %441 = vector.shape_cast %440 : vector<16xf32> to vector<16x1xf32>
    %cst_174 = arith.constant 1.280000e+02 : f32
    %442 = vector.broadcast %cst_174 : f32 to vector<16x1xf32>
    %443 = arith.divf %441, %442 : vector<16x1xf32>
    %444 = vector.broadcast %436 : vector<16x1xf32> to vector<16x128xf32>
    %445 = arith.subf %428, %444 : vector<16x128xf32>
    %cst_175 = arith.constant 9.99999974E-6 : f32
    %446 = vector.broadcast %cst_175 : f32 to vector<16x1xf32>
    %447 = arith.addf %443, %446 : vector<16x1xf32>
    %448 = math.rsqrt %447 : vector<16x1xf32>
    %449 = vector.broadcast %448 : vector<16x1xf32> to vector<16x128xf32>
    %450 = arith.mulf %445, %449 : vector<16x128xf32>
    %451 = vector.broadcast %430 : vector<1x128xf32> to vector<16x128xf32>
    %452 = arith.mulf %450, %451 : vector<16x128xf32>
    %453 = vector.broadcast %432 : vector<1x128xf32> to vector<16x128xf32>
    %454 = arith.addf %452, %453 : vector<16x128xf32>
    %c1_176 = arith.constant 1 : index
    %c0_177 = arith.constant 0 : index
    %c0_178 = arith.constant 0 : index
    %455 = vector.load %arg10[%c1_176, %c0_177, %c0_178] : memref<2x128x512xf32, #tpu.memory_space<vmem>>, vector<1x128x512xf32>
    %456 = vector.shape_cast %455 : vector<1x128x512xf32> to vector<128x512xf32>
    %cst_179 = arith.constant dense<0.000000e+00> : vector<16x512xf32>
    %457 = tpu.matmul %454, %456, %cst_179 {dimension_numbers = #tpu.dot_dimension_numbers<[1], [0], [0], [1], [0, 0, 1, 1], [], []>} : vector<16x128xf32>, vector<128x512xf32>, vector<16x512xf32> -> vector<16x512xf32>
    %c1_180 = arith.constant 1 : index
    %c0_181 = arith.constant 0 : index
    %c0_182 = arith.constant 0 : index
    %458 = vector.load %arg11[%c1_180, %c0_181, %c0_182] : memref<2x1x512xf32, #tpu.memory_space<vmem>>, vector<1x1x512xf32>
    %459 = vector.shape_cast %458 : vector<1x1x512xf32> to vector<1x512xf32>
    %460 = vector.broadcast %459 : vector<1x512xf32> to vector<16x512xf32>
    %461 = arith.addf %457, %460 : vector<16x512xf32>
    %cst_183 = arith.constant 0.000000e+00 : f32
    %462 = vector.broadcast %cst_183 : f32 to vector<16x512xf32>
    %463 = arith.maximumf %461, %462 : vector<16x512xf32>
    %c1_184 = arith.constant 1 : index
    %c0_185 = arith.constant 0 : index
    %c0_186 = arith.constant 0 : index
    %464 = vector.load %arg12[%c1_184, %c0_185, %c0_186] : memref<2x512x128xf32, #tpu.memory_space<vmem>>, vector<1x512x128xf32>
    %465 = vector.shape_cast %464 : vector<1x512x128xf32> to vector<512x128xf32>
    %cst_187 = arith.constant dense<0.000000e+00> : vector<16x128xf32>
    %466 = tpu.matmul %463, %465, %cst_187 {dimension_numbers = #tpu.dot_dimension_numbers<[1], [0], [0], [1], [0, 0, 1, 1], [], []>} : vector<16x512xf32>, vector<512x128xf32>, vector<16x128xf32> -> vector<16x128xf32>
    %c1_188 = arith.constant 1 : index
    %c0_189 = arith.constant 0 : index
    %c0_190 = arith.constant 0 : index
    %467 = vector.load %arg13[%c1_188, %c0_189, %c0_190] : memref<2x1x128xf32, #tpu.memory_space<vmem>>, vector<1x1x128xf32>
    %468 = vector.shape_cast %467 : vector<1x1x128xf32> to vector<1x128xf32>
    %469 = vector.broadcast %468 : vector<1x128xf32> to vector<16x128xf32>
    %470 = arith.addf %466, %469 : vector<16x128xf32>
    %471 = arith.addf %454, %470 : vector<16x128xf32>
    %c1_191 = arith.constant 1 : index
    %c0_192 = arith.constant 0 : index
    %c0_193 = arith.constant 0 : index
    %472 = vector.load %arg14[%c1_191, %c0_192, %c0_193] : memref<2x1x128xf32, #tpu.memory_space<vmem>>, vector<1x1x128xf32>
    %473 = vector.shape_cast %472 : vector<1x1x128xf32> to vector<1x128xf32>
    %c1_194 = arith.constant 1 : index
    %c0_195 = arith.constant 0 : index
    %c0_196 = arith.constant 0 : index
    %474 = vector.load %arg15[%c1_194, %c0_195, %c0_196] : memref<2x1x128xf32, #tpu.memory_space<vmem>>, vector<1x1x128xf32>
    %475 = vector.shape_cast %474 : vector<1x1x128xf32> to vector<1x128xf32>
    %cst_197 = arith.constant dense<0.000000e+00> : vector<16xf32>
    %476 = vector.multi_reduction <add>, %471, %cst_197 [1] : vector<16x128xf32> to vector<16xf32>
    %477 = vector.shape_cast %476 : vector<16xf32> to vector<16x1xf32>
    %cst_198 = arith.constant 1.280000e+02 : f32
    %478 = vector.broadcast %cst_198 : f32 to vector<16x1xf32>
    %479 = arith.divf %477, %478 : vector<16x1xf32>
    %480 = vector.broadcast %479 : vector<16x1xf32> to vector<16x128xf32>
    %481 = arith.subf %471, %480 : vector<16x128xf32>
    %482 = arith.mulf %481, %481 : vector<16x128xf32>
    %cst_199 = arith.constant dense<0.000000e+00> : vector<16xf32>
    %483 = vector.multi_reduction <add>, %482, %cst_199 [1] : vector<16x128xf32> to vector<16xf32>
    %484 = vector.shape_cast %483 : vector<16xf32> to vector<16x1xf32>
    %cst_200 = arith.constant 1.280000e+02 : f32
    %485 = vector.broadcast %cst_200 : f32 to vector<16x1xf32>
    %486 = arith.divf %484, %485 : vector<16x1xf32>
    %487 = vector.broadcast %479 : vector<16x1xf32> to vector<16x128xf32>
    %488 = arith.subf %471, %487 : vector<16x128xf32>
    %cst_201 = arith.constant 9.99999974E-6 : f32
    %489 = vector.broadcast %cst_201 : f32 to vector<16x1xf32>
    %490 = arith.addf %486, %489 : vector<16x1xf32>
    %491 = math.rsqrt %490 : vector<16x1xf32>
    %492 = vector.broadcast %491 : vector<16x1xf32> to vector<16x128xf32>
    %493 = arith.mulf %488, %492 : vector<16x128xf32>
    %494 = vector.broadcast %473 : vector<1x128xf32> to vector<16x128xf32>
    %495 = arith.mulf %493, %494 : vector<16x128xf32>
    %496 = vector.broadcast %475 : vector<1x128xf32> to vector<16x128xf32>
    %497 = arith.addf %495, %496 : vector<16x128xf32>
    %498 = vector.extract_strided_slice %497 {offsets = [0, 0], sizes = [8, 128], strides = [1, 1]} : vector<16x128xf32> to vector<8x128xf32>
    %cst_202 = arith.constant dense<0.000000e+00> : vector<128xf32>
    %499 = vector.multi_reduction <add>, %498, %cst_202 [0] : vector<8x128xf32> to vector<128xf32>
    %500 = vector.shape_cast %499 : vector<128xf32> to vector<1x128xf32>
    %cst_203 = arith.constant 8.000000e+00 : f32
    %501 = vector.broadcast %cst_203 : f32 to vector<1x128xf32>
    %502 = arith.divf %500, %501 : vector<1x128xf32>
    %503 = vector.extract_strided_slice %497 {offsets = [8, 0], sizes = [8, 128], strides = [1, 1]} : vector<16x128xf32> to vector<8x128xf32>
    %cst_204 = arith.constant dense<0.000000e+00> : vector<128xf32>
    %504 = vector.multi_reduction <add>, %503, %cst_204 [0] : vector<8x128xf32> to vector<128xf32>
    %505 = vector.shape_cast %504 : vector<128xf32> to vector<1x128xf32>
    %cst_205 = arith.constant 8.000000e+00 : f32
    %506 = vector.broadcast %cst_205 : f32 to vector<1x128xf32>
    %507 = arith.divf %505, %506 : vector<1x128xf32>
    %508 = tpu.concatenate %502, %507 in 0 : vector<1x128xf32>, vector<1x128xf32> -> vector<2x128xf32>
    %c0_206 = arith.constant 0 : index
    %c0_207 = arith.constant 0 : index
    %509 = vector.load %arg16[%c0_206, %c0_207] : memref<128x1xf32, #tpu.memory_space<vmem>>, vector<128x1xf32>
    %cst_208 = arith.constant dense<0.000000e+00> : vector<2x1xf32>
    %510 = tpu.matmul %508, %509, %cst_208 {dimension_numbers = #tpu.dot_dimension_numbers<[1], [0], [0], [1], [0, 0, 1, 1], [], []>} : vector<2x128xf32>, vector<128x1xf32>, vector<2x1xf32> -> vector<2x1xf32>
    %c0_209 = arith.constant 0 : index
    %c0_210 = arith.constant 0 : index
    %511 = vector.load %arg17[%c0_209, %c0_210] : memref<1x1xf32, #tpu.memory_space<vmem>>, vector<1x1xf32>
    %512 = vector.broadcast %511 : vector<1x1xf32> to vector<2x1xf32>
    %513 = arith.addf %510, %512 : vector<2x1xf32>
    %c0_211 = arith.constant 0 : index
    %c0_212 = arith.constant 0 : index
    %514 = vector.load %arg18[%c0_211, %c0_212] : memref<2x1xf32, #tpu.memory_space<vmem>>, vector<2x1xf32>
    tpu.vector_store %arg18[%c0_211, %c0_212], %513 {strides = array<i32>} : memref<2x1xf32, #tpu.memory_space<vmem>>, vector<2x1xf32>,
    return
  }
}

</mosaic_0001>

<bundles_post_ra>
// kernel: transformer_classifier.1
= control target key start
LH: loop header
LB: loop body
LE: loop exit
PB: predicated region body
PF: predicated region fallthrough
CT: control target
= control target key end

     0   :  { %vm72_vm0 = vcmask 130048   ;;  %vm7371_vm1 = vmmov 0   ;;  %vm391_vm2 = vcmask 261120   ;;  %s7372_s28 = smov 64   ;;  %vm469_vm3 = vcmask 64512   ;;  %s7374_s30 = smov 32   ;;  %s9356_s1 = inlined_call_operand.vmem [shape: f32[16,128], index: 1, kind: input, shape index: {}]   ;;  %s9357_s0 = inlined_call_operand.vmem [shape: f32[16,16], index: 0, kind: input, shape index: {}]   ;;  %s9358_s4 = inlined_call_operand.vmem [shape: f32[2,128,384], index: 4, kind: input, shape index: {}]   ;;  %s9359_s2 = inlined_call_operand.vmem [shape: f32[1,128], index: 2, kind: input, shape index: {}]   ;;  %s9360_s3 = inlined_call_operand.vmem [shape: f32[16,128], index: 3, kind: input, shape index: {}]   ;;  %s9361_s5 = inlined_call_operand.vmem [shape: f32[2,1,384], index: 5, kind: input, shape index: {}]   ;;  %s9362_s6 = inlined_call_operand.vmem [shape: f32[2,128,128], index: 6, kind: input, shape index: {}]   ;;  %s9363_s7 = inlined_call_operand.vmem [shape: f32[2,1,128], index: 7, kind: input, shape index: {}]   ;;  %s9364_s10 = inlined_call_operand.vmem [shape: f32[2,128,512], index: 10, kind: input, shape index: {}]   ;;  %s9365_s8 = inlined_call_operand.vmem [shape: f32[2,1,128], index: 8, kind: input, shape index: {}]   ;;  %s9366_s9 = inlined_call_operand.vmem [shape: f32[2,1,128], index: 9, kind: input, shape index: {}]   ;;  %s9367_s12 = inlined_call_operand.vmem [shape: f32[2,512,128], index: 12, kind: input, shape index: {}]   ;;  %s9368_s11 = inlined_call_operand.vmem [shape: f32[2,1,512], index: 11, kind: input, shape index: {}]   ;;  %s9369_s13 = inlined_call_operand.vmem [shape: f32[2,1,128], index: 13, kind: input, shape index: {}]   ;;  %s9370_s14 = inlined_call_operand.vmem [shape: f32[2,1,128], index: 14, kind: input, shape index: {}]   ;;  %s9371_s15 = inlined_call_operand.vmem [shape: f32[2,1,128], index: 15, kind: input, shape index: {}]   ;;  %s9372_s16 = inlined_call_operand.vmem [shape: f32[128,1], index: 16, kind: input, shape index: {}]   ;;  %s9373_s17 = inlined_call_operand.<no memory space> [shape: f32[1,1], index: 17, kind: input, shape index: {}]   ;;  %s9374_s18 = inlined_call_operand.vmem [shape: f32[2,1], index: 18, kind: output, shape index: {}]  }
   0x1   :  { %9378 = sst [smem:[#allocation3_spill]] %s9356_s1  ;;  %vm5594_vm4 = vcmask 1040384   ;;  %vm5689_vm5 = vcmask 1024  }
   0x2   :  { %9379 = sst [smem:[#allocation4_spill]] %s9357_s0  ;;  %s9381_s29 = sld [smem:[#allocation3_spill]] }
   0x3   :  { %9380 = sst [smem:[#allocation5_spill]] %s9358_s4  ;;  %s9382_s20 = sld [smem:[#allocation4_spill]] }
   0x4   :  { %s9383_s4 = sld [smem:[#allocation5_spill]] }
   0x8   :  { %v63_v0 = vld [vmem:[%s9381_s29] sm:$0xff]  ;;  %v64_v1 = vld [vmem:[%s9381_s29 + $0x8] sm:$0xff]  ;;  %s7373_s29 = smov 96  }
   0x9   :  { %v61_v2 = vld [vmem:[%s9382_s20] sm:$0xff]  ;;  %v6776_v3 = vpack.c.bf16 %v64_v1, %v63_v0  ;;  %v62_v13 = vld [vmem:[%s9382_s20 + $0x8] sm:$0xff] }
   0xa   :  { %6332 = vmatprep.mubr.msk.f32.mxu1 %vm72_vm0, %v61_v2  ;;  %v159_v4 = vld [vmem:[%s9383_s4 + $0x8] sm:$0xff]  ;;  %v162_v5 = vld [vmem:[%s9383_s4 + $0x20] sm:$0xff]  ;;  %v161_v8 = vld [vmem:[%s9383_s4 + $0x18] sm:$0xff] }
   0xb   :  { %v6780_v6 = vpack.c.bf16 %v162_v5, %v159_v4  ;;  %v158_v7 = vld [vmem:[%s9383_s4] sm:$0xff]  ;;  %v160_v9 = vld [vmem:[%s9383_s4 + $0x10] sm:$0xff]  ;;  %6777 = vmatprep.subr.bf16.mxu1 %v6776_v3  ;;  %v163_v10 = vld [vmem:[%s9383_s4 + $0x28] sm:$0xff] }
   0xc   :  { %v165_v11 = vld [vmem:[%s9383_s4 + $0x38] sm:$0xff]  ;;  %v168_v12 = vld [vmem:[%s9383_s4 + $0x50] sm:$0xff]  ;;  %6779 = vmatpush3.bf16.msra.mxu1 %v6776_v3  ;;  %v6782_v14 = vpack.c.bf16 %v161_v8, %v158_v7  ;;  %v6812_v15 = vpack.c.bf16 %v163_v10, %v160_v9  ;;  %v166_v16 = vld [vmem:[%s9383_s4 + $0x40] sm:$0xff] }
   0xd   :  { %6781 = vmatprep.subr.bf16.mxu1 %v6780_v6  ;;  %v6784_v17 = vpack.c.bf16 %v168_v12, %v165_v11  ;;  %v164_v18 = vld [vmem:[%s9383_s4 + $0x30] sm:$0xff]  ;;  %v167_v19 = vld [vmem:[%s9383_s4 + $0x48] sm:$0xff]  ;;  %v169_v20 = vld [vmem:[%s9383_s4 + $0x58] sm:$0xff] }
   0xe   :  { %6813 = vmatprep.subr.bf16.mxu0 %v6812_v15  ;;  %v6816_v21 = vpack.c.bf16 %v169_v20, %v166_v16  ;;  %v171_v22 = vld [vmem:[%s9383_s4 + $0x68] sm:$0xff]  ;;  %v174_v23 = vld [vmem:[%s9383_s4 + $0x80] sm:$0xff]  ;;  %v172_v24 = vld [vmem:[%s9383_s4 + $0x70] sm:$0xff]  ;;  %v6786_v26 = vpack.c.bf16 %v167_v19, %v164_v18 }
   0xf   :  { %6333 = vmatmul.mubr.msk.f32.vlgmr.msra.gmra.mrb[0].mxu1 %vm72_vm0, %v62_v13  ;;  %6815 = vmatpush3.bf16.msra.mxu0 %v6812_v15  ;;  %v175_v25 = vld [vmem:[%s9383_s4 + $0x88] sm:$0xff]  ;;  %v170_v27 = vld [vmem:[%s9383_s4 + $0x60] sm:$0xff]  ;;  %v6788_v29 = vpack.c.bf16 %v174_v23, %v171_v22  ;;  %v173_v30 = vld [vmem:[%s9383_s4 + $0x78] sm:$0xff]  ;;  %v7370_v13 = vmov 0.0   ;;  %v208_v23 = vlaneseq }
  0x10   :  { %6783 = vmatpush1.bf16.msra.mxu1 %v6782_v14  ;;  %6817 = vmatprep.subr.bf16.mxu0 %v6816_v21  ;;  %v6820_v28 = vpack.c.bf16 %v175_v25, %v172_v24  ;;  %v178_v31 = vld [vmem:[%s9383_s4 + $0xa0] sm:$0xff]  ;;  %v181_v32 = vld [vmem:[%s9383_s4 + $0xb8] sm:$0xff]  ;;  %v180_v34 = vld [vmem:[%s9383_s4 + $0xb0] sm:$0xff]  ;;  %v6790_v35 = vpack.c.bf16 %v173_v30, %v170_v27 }
  0x11   :  { %6785 = vmatprep.subr.bf16.mxu1 %v6784_v17  ;;  %v177_v33 = vld [vmem:[%s9383_s4 + $0x98] sm:$0xff]  ;;  %v176_v36 = vld [vmem:[%s9383_s4 + $0x90] sm:$0xff]  ;;  %v6824_v37 = vpack.c.bf16 %v181_v32, %v178_v31  ;;  %v179_v39 = vld [vmem:[%s9383_s4 + $0xa8] sm:$0xff]  ;;  %287 = vmatprep.mubr.f32.mxu1 %v7370_v13  ;;  %v7654_v24 = vshrl.u32 %v208_v23, 7 }
  0x12   :  { %v6792_v38 = vpack.c.bf16 %v180_v34, %v177_v33  ;;  %v184_v40 = vld [vmem:[%s9383_s4 + $0xd0] sm:$0xff]  ;;  %v187_v41 = vld [vmem:[%s9383_s4 + $0xe8] sm:$0xff]  ;;  %v186_v43 = vld [vmem:[%s9383_s4 + $0xe0] sm:$0xff]  ;;  %v6794_v44 = vpack.c.bf16 %v179_v39, %v176_v36 }
  0x13   :  { %6819 = vmatpush3.bf16.msra.mxu0 %v6816_v21  ;;  %v183_v42 = vld [vmem:[%s9383_s4 + $0xc8] sm:$0xff]  ;;  %v182_v45 = vld [vmem:[%s9383_s4 + $0xc0] sm:$0xff]  ;;  %v6828_v46 = vpack.c.bf16 %v187_v41, %v184_v40  ;;  %v185_v48 = vld [vmem:[%s9383_s4 + $0xd8] sm:$0xff]  ;;  %v7657_v25 = vsub.s32 1, %v7654_v24 }
  0x14   :  { %6787 = vmatpush1.bf16.msra.mxu1 %v6786_v26  ;;  %6821 = vmatprep.subr.bf16.mxu0 %v6820_v28  ;;  %v6796_v47 = vpack.c.bf16 %v186_v43, %v183_v42  ;;  %v190_v49 = vld [vmem:[%s9383_s4 + $0x100] sm:$0xff]  ;;  %v193_v50 = vld [vmem:[%s9383_s4 + $0x118] sm:$0xff]  ;;  %v192_v52 = vld [vmem:[%s9383_s4 + $0x110] sm:$0xff]  ;;  %v6798_v53 = vpack.c.bf16 %v185_v48, %v182_v45  ;;  %v7660_v26 = vsub.s32 2, %v7654_v24 }
  0x15   :  { %6789 = vmatprep.subr.bf16.mxu1 %v6788_v29  ;;  %v189_v51 = vld [vmem:[%s9383_s4 + $0xf8] sm:$0xff]  ;;  %v188_v54 = vld [vmem:[%s9383_s4 + $0xf0] sm:$0xff]  ;;  %v6832_v55 = vpack.c.bf16 %v193_v50, %v190_v49  ;;  %v191_v57 = vld [vmem:[%s9383_s4 + $0x108] sm:$0xff] }
  0x16   :  { %v6800_v56 = vpack.c.bf16 %v192_v52, %v189_v51  ;;  %v196_v58 = vld [vmem:[%s9383_s4 + $0x130] sm:$0xff]  ;;  %v199_v59 = vld [vmem:[%s9383_s4 + $0x148] sm:$0xff]  ;;  %v198_v61 = vld [vmem:[%s9383_s4 + $0x140] sm:$0xff]  ;;  %v6802_v62 = vpack.c.bf16 %v191_v57, %v188_v54 }
  0x17   :  { %6823 = vmatpush3.bf16.msra.mxu0 %v6820_v28  ;;  %v195_v60 = vld [vmem:[%s9383_s4 + $0x128] sm:$0xff]  ;;  %v6836_v63 = vpack.c.bf16 %v199_v59, %v196_v58  ;;  %v194_v1 = vld [vmem:[%s9383_s4 + $0x120] sm:$0xff]  ;;  %v197_v2 = vld [vmem:[%s9383_s4 + $0x138] sm:$0xff]  ;;  %v7666_v28 = vsub.s32 0, %v7654_v24 }
  0x18   :  { %6791 = vmatpush1.bf16.msra.mxu1 %v6790_v35  ;;  %6825 = vmatprep.subr.bf16.mxu0 %v6824_v37  ;;  %v6804_v0 = vpack.c.bf16 %v198_v61, %v195_v60  ;;  %v6806_v3 = vpack.c.bf16 %v197_v2, %v194_v1  ;;  %v201_v4 = vld [vmem:[%s9383_s4 + $0x158] sm:$0xff]  ;;  %v204_v5 = vld [vmem:[%s9383_s4 + $0x170] sm:$0xff]  ;;  %v203_v8 = vld [vmem:[%s9383_s4 + $0x168] sm:$0xff] }
  0x19   :  { %6793 = vmatprep.subr.bf16.mxu1 %v6792_v38  ;;  %v6808_v6 = vpack.c.bf16 %v204_v5, %v201_v4  ;;  %v200_v7 = vld [vmem:[%s9383_s4 + $0x150] sm:$0xff]  ;;  %v202_v10 = vld [vmem:[%s9383_s4 + $0x160] sm:$0xff]  ;;  %v205_v11 = vld [vmem:[%s9383_s4 + $0x178] sm:$0xff] }
  0x1a   :  { %v6810_v9 = vpack.c.bf16 %v203_v8, %v200_v7  ;;  %v6840_v12 = vpack.c.bf16 %v205_v11, %v202_v10  ;;  %v5695_v14 = vld [vmem:[%s9359_s2] ss:$0 sm:$0xff]  ;;  %v155_v19 = vld [vmem:[%s9360_s3 + $0x8] sm:$0xff] }
  0x1b   :  { %6827 = vmatpush3.bf16.msra.mxu0 %v6824_v37  ;;  %v154_v18 = vld [vmem:[%s9360_s3] sm:$0xff]  ;;  %v380_v23 = vld [vmem:[%s9362_s6 + $0x28] sm:$0xff] }
  0x1c   :  { %6795 = vmatpush1.bf16.msra.mxu1 %v6794_v44  ;;  %6829 = vmatprep.subr.bf16.mxu0 %v6828_v46  ;;  %v206_v27 = vld [vmem:[%s9361_s5] sm:$0x7] }
  0x1d   :  { %6797 = vmatprep.subr.bf16.mxu1 %v6796_v47  ;;  %v215_v29 = vrot.slane %v206_v27, %v7657_v25  ;;  %v219_v30 = vrot.slane %v206_v27, %v7660_v26  ;;  %v211_v34 = vrot.slane %v206_v27, %v7666_v28  ;;  %v381_v27 = vld [vmem:[%s9362_s6 + $0x30] sm:$0xff] }
  0x1f   :  { %6831 = vmatpush3.bf16.msra.mxu0 %v6828_v46 }
  0x20   :  { %6799 = vmatpush1.bf16.msra.mxu1 %v6798_v53  ;;  %6833 = vmatprep.subr.bf16.mxu0 %v6832_v55 }
  0x21   :  { %6801 = vmatprep.subr.bf16.mxu1 %v6800_v56 }
  0x23   :  { %6835 = vmatpush3.bf16.msra.mxu0 %v6832_v55 }
  0x24   :  { %6803 = vmatpush1.bf16.msra.mxu1 %v6802_v62  ;;  %6837 = vmatprep.subr.bf16.mxu0 %v6836_v63 }
  0x25   :  { %6805 = vmatprep.subr.bf16.mxu1 %v6804_v0 }
  0x27   :  { %6839 = vmatpush3.bf16.msra.mxu0 %v6836_v63 }
  0x28   :  { %6807 = vmatpush1.bf16.msra.mxu1 %v6806_v3  ;;  %6841 = vmatprep.subr.bf16.mxu0 %v6840_v12 }
  0x29   :  { %6809 = vmatprep.subr.bf16.mxu1 %v6808_v6 }
  0x2b   :  { %6843 = vmatpush3.bf16.msra.mxu0 %v6840_v12 }
  0x2c   :  { %6811 = vmatpush1.bf16.msra.mxu1 %v6810_v9  ;;  %6370 = vmatprep.subr.mxu0 %v7370_v13 }
  0x2d   :  { %6375 = vmatprep.subr.mxu1 %v7370_v13 }
  0xe2   :  { %v6334_v15 = vpop.f32.mrb[0].mxu1 }
  0xe3   :  { %v151_v16 = vadd.f32 %v6334_v15, %v5695_v14  ;;  %v145_v17 = vpop.f32.mrb[1].mxu1 }
  0xe4   :  { %v146_v20 = vadd.f32 %v5695_v14, %v145_v17 }
  0xe5   :  { %v7643_v22 = vadd.f32 %v155_v19, %v151_v16  ;;  %v7375_v19 = vmov 0.0|0.0  }
  0xe6   :  { %v7641_v21 = vadd.f32 %v154_v18, %v146_v20  ;;  %v379_v20 = vld [vmem:[%s9362_s6 + $0x20] sm:$0xff] }
  0xe8   :  { %288 = vmatmul.mubr.f32.vlgmr.msra.gmra.mrb[2].mxu1 %v7641_v21  ;;  %6367 = vmatprep.mubr.f32.mxu0 %v7641_v21 }
  0xe9   :  { %6368 = vmatmul.mubr.f32.vlgmr.msra.gmra.mrb[0].mxu0 %v7643_v22  ;;  %293 = vmatprep.mubr.f32.mxu1 %v7370_v13 }
  0xea   :  { %6372 = vmatprep.mubr.msk.f32.mxu0 %vm7371_vm1, %v7370_v13 }
  0xec   :  { %294 = vmatmul.mubr.f32.gmra.mrb[4].mxu1 %v7643_v22 }
  0xed   :  { %6377 = vmatprep.mubr.msk.f32.mxu1 %vm7371_vm1, %v7370_v13 }
 0x1bb   :  { %v289_v31 = vpop.f32.mrb[2].mxu1 }
 0x1bc   :  { %v291_v32 = vpop.f32.mrb[3].mxu1  ;;  %v6369_v33 = vpop.f32.mrb[0].mxu0  ;;  %v290_v42 = vadd.f32 %v289_v31, %v211_v34 }
 0x1bd   :  { %v292_v35 = vadd.f32 %v291_v32, %v215_v29  ;;  %v7671_v36 = vadd.f32 %v6369_v33, %v219_v30  ;;  %v366_v37 = vpop.f32.mrb[1].mxu0 }
 0x1be   :  { %v7673_v38 = vadd.f32 %v366_v37, %v219_v30  ;;  %v382_v30 = vld [vmem:[%s9362_s6 + $0x38] sm:$0xff]  ;;  %v376_v37 = vld [vmem:[%s9362_s6 + $0x8] sm:$0xff] }
 0x1bf   :  { %v295_v39 = vpop.f32.mrb[4].mxu1  ;;  %869 = vrot.lane.b32.xlu1 %v292_v35, %s7372_s28  ;;  %556 = vrot.lane.b32.xlu0 %v292_v35, %s7373_s29  ;;  %v7734_v31 = vpack.c.bf16 %v382_v30, %v381_v27 }
 0x1c0   :  { %v7677_v40 = vadd.f32 %v295_v39, %v211_v34  ;;  %6371 = vmatpush3.xpose.msk.msra.mxu0 %vm391_vm2, %v292_v35  ;;  %v297_v41 = vpop.f32.mrb[5].mxu1  ;;  %6376 = vmatpush3.msra.mxu1 %v7673_v38 }
 0x1c1   :  { %v7681_v43 = vadd.f32 %v297_v41, %v215_v29  ;;  %6380 = vmatprep.subr.mxu0 %v7370_v13  ;;  %6385 = vmatprep.subr.mxu1 %v7370_v13  ;;  %v7728_v29 = vpack.c.bf16 %v380_v23, %v379_v20  ;;  %v377_v41 = vld [vmem:[%s9362_s6 + $0x10] sm:$0xff] }
 0x1c3   :  { %6373 = vmatmul.mubr.msk.f32.vlgmr.msra.gmra.mrb[2].mxu0 %vm391_vm2, %v290_v42  ;;  %867 = vrot.lane.b32.xlu1 %v290_v42, %s7372_s28 }
 0x1c4   :  { %554 = vrot.lane.b32.xlu0 %v290_v42, %s7373_s29  ;;  %6382 = vmatprep.mubr.msk.f32.mxu0 %vm7371_vm1, %v7370_v13 }
 0x231   :  { %v557_v44 = vpop.permute.xlu0 %556  ;;  %v870_v45 = vpop.permute.xlu1 %869 }
 0x232   :  { %6381 = vmatpush3.xpose.msk.msra.mxu0 %vm391_vm2, %v557_v44 }
 0x233   :  { %6412 = vmatprep.subr.mxu0 %v7370_v13 }
 0x235   :  { %v868_v47 = vpop.permute.xlu1 %867 }
 0x236   :  { %v555_v46 = vpop.permute.xlu0 %554 }
 0x237   :  { %6383 = vmatmul.mubr.msk.f32.vlgmr.msra.gmra.mrb[4].mxu0 %vm391_vm2, %v555_v46 }
 0x238   :  { %6413 = vmatpush3.xpose.msk.msra.mxu0 %vm391_vm2, %v870_v45  ;;  %6414 = vmatprep.mubr.msk.f32.mxu0 %vm7371_vm1, %v7370_v13 }
 0x239   :  { %6856 = vmatprep.subr.bf16.mxu0 %v7375_v19 }
 0x23b   :  { %6415 = vmatmul.mubr.msk.f32.vlgmr.msra.gmra.mrb[6].mxu0 %vm391_vm2, %v868_v47 }
 0x23c   :  { %6430 = vmatprep.mubr.msk.f32.mxu0 %vm7371_vm1, %v7370_v13 }
 0x296   :  { %v464_v48 = vpop.f32.mrb[2].mxu0 }
 0x297   :  { %v468_v49 = vmul.f32 0.17677669, %v464_v48  ;;  %v6374_v50 = vpop.f32.mrb[3].mxu0 }
 0x299   :  { %v470_v51 = vsel %vm469_vm3, %v468_v49, -inf }
 0x29a   :  { %471 = vmax.xlane.f32.xlu0 %v470_v51 }
 0x30a   :  { %v628_v52 = vpop.f32.mrb[4].mxu0 }
 0x30b   :  { %v632_v53 = vmul.f32 0.17677669, %v628_v52  ;;  %v6384_v54 = vpop.f32.mrb[5].mxu0  ;;  %v383_v52 = vld [vmem:[%s9362_s6 + $0x40] sm:$0xff] }
 0x30d   :  { %v633_v55 = vsel %vm469_vm3, %v632_v53, -inf }
 0x30e   :  { %634 = vmax.xlane.f32.xlu1 %v633_v55  ;;  %v941_v56 = vpop.f32.mrb[6].mxu0  ;;  %v385_v55 = vld [vmem:[%s9362_s6 + $0x50] sm:$0xff] }
 0x30f   :  { %v6416_v57 = vpop.f32.mrb[7].mxu0  ;;  %v945_v3 = vmul.f32 0.17677669, %v941_v56  ;;  %v386_v56 = vld [vmem:[%s9362_s6 + $0x58] sm:$0xff] }
 0x310   :  { %v7790_v57 = vpack.c.bf16 %v386_v56, %v385_v55 }
 0x311   :  { %v946_v5 = vsel %vm469_vm3, %v945_v3, -inf }
 0x31f   :  { %645 = vrot.lane.b32.xlu1 %v7673_v38, %s7373_s29 }
 0x323   :  { %1109 = vrot.lane.b32.xlu1 %v292_v35, %s7374_s30  ;;  %v375_v35 = vld [vmem:[%s9362_s6] sm:$0xff] }
 0x324   :  { %v7745_v39 = vpack.c.bf16 %v376_v37, %v375_v35 }
 0x327   :  { %v472_v58 = vpop.xlane.xlu0 %471  ;;  %1107 = vrot.lane.b32.xlu1 %v290_v42, %s7374_s30  ;;  %v378_v42 = vld [vmem:[%s9362_s6 + $0x18] sm:$0xff] }
 0x328   :  { %v473_v59 = vsub.f32 %v468_v49, %v472_v58  ;;  %v7755_v46 = vpack.c.bf16 %v378_v42, %v377_v41 }
 0x32a   :  { %v474_v60 = vmul.f32 1.442695, %v473_v59 }
 0x32c   :  { %7290 = vpow2.f32 %v474_v60 }
 0x336   :  { %v7291_v61 = vpop.eup %7290 }
 0x337   :  { %v476_v62 = vsel %vm469_vm3, %v7291_v61, 0.0 }
 0x338   :  { %477 = vadd.xlane.f32.xlu0 %v476_v62 }
 0x39b   :  { %v635_v63 = vpop.xlane.xlu1 %634 }
 0x39c   :  { %v636_v0 = vsub.f32 %v632_v53, %v635_v63  ;;  %v384_v53 = vld [vmem:[%s9362_s6 + $0x48] sm:$0xff] }
 0x39d   :  { %v7780_v54 = vpack.c.bf16 %v384_v53, %v383_v52 }
 0x39e   :  { %v637_v1 = vmul.f32 1.442695, %v636_v0 }
 0x39f   :  { %v646_v9 = vpop.permute.xlu1 %645  ;;  %6858 = vmatpush3.bf16.msra.mxu0 %v7780_v54 }
 0x3a0   :  { %7292 = vpow2.f32 %v637_v1  ;;  %6859 = vmatprep.subr.bf16.mxu0 %v7375_v19 }
 0x3a3   :  { %v1110_v50 = vpop.permute.xlu1 %1109  ;;  %6861 = vmatpush3.bf16.msra.mxu0 %v7790_v57 }
 0x3a4   :  { %6862 = vmatprep.subr.bf16.mxu0 %v7375_v19 }
 0x3a7   :  { %v1108_v51 = vpop.permute.xlu1 %1107 }
 0x3aa   :  { %v7293_v2 = vpop.eup %7292 }
 0x3ab   :  { %v639_v4 = vsel %vm469_vm3, %v7293_v2, 0.0 }
 0x3ac   :  { %640 = vadd.xlane.f32.xlu0 %v639_v4 }
 0x3b0   :  { %947 = vmax.xlane.f32.xlu0 %v946_v5 }
 0x3c5   :  { %v478_v6 = vpop.xlane.xlu0 %477 }
 0x3c6   :  { %7294 = vrcp.f32 %v478_v6 }
 0x3d0   :  { %v7295_v7 = vpop.eup %7294 }
 0x3d1   :  { %v480_v8 = vmul.f32 %v7295_v7, %v7291_v61 }
 0x3d3   :  { %6378 = vmatmul.mubr.msk.f32.vlgmr.msra.gmra.mrb[6].mxu1 %vm469_vm3, %v480_v8 }
 0x3d4   :  { %6386 = vmatpush3.msra.mxu1 %v646_v9  ;;  %6387 = vmatprep.mubr.msk.f32.mxu1 %vm7371_vm1, %v7370_v13 }
 0x3d5   :  { %6844 = vmatprep.subr.bf16.mxu1 %v7375_v19 }
 0x439   :  { %v641_v10 = vpop.xlane.xlu0 %640 }
 0x43a   :  { %7296 = vrcp.f32 %v641_v10 }
 0x43d   :  { %v948_v11 = vpop.xlane.xlu0 %947 }
 0x43e   :  { %v949_v12 = vsub.f32 %v945_v3, %v948_v11  ;;  %v388_v11 = vld [vmem:[%s9362_s6 + $0x68] sm:$0xff] }
 0x440   :  { %v950_v14 = vmul.f32 1.442695, %v949_v12  ;;  %v389_v12 = vld [vmem:[%s9362_s6 + $0x70] sm:$0xff] }
 0x442   :  { %7298 = vpow2.f32 %v950_v14 }
 0x444   :  { %v7297_v15 = vpop.eup %7296 }
 0x445   :  { %v643_v16 = vmul.f32 %v7297_v15, %v7293_v2  ;;  %v390_v15 = vld [vmem:[%s9362_s6 + $0x78] sm:$0xff] }
 0x447   :  { %6388 = vmatmul.mubr.msk.f32.vlgmr.msra.gmra.mrb[8].mxu1 %vm469_vm3, %v643_v16  ;;  %v7821_v16 = vpack.c.bf16 %v390_v15, %v389_v12 }
 0x448   :  { %6398 = vmatprep.mubr.msk.f32.mxu1 %vm7371_vm1, %v7370_v13  ;;  %6846 = vmatpush3.bf16.msra.mxu1 %v7728_v29 }
 0x449   :  { %6847 = vmatprep.subr.bf16.mxu1 %v7375_v19 }
 0x44c   :  { %v7299_v17 = vpop.eup %7298  ;;  %6849 = vmatpush3.bf16.msra.mxu1 %v7734_v31 }
 0x44d   :  { %v952_v18 = vsel %vm469_vm3, %v7299_v17, 0.0  ;;  %6850 = vmatprep.subr.bf16.mxu1 %v7375_v19 }
 0x44e   :  { %953 = vadd.xlane.f32.xlu0 %v952_v18 }
 0x464   :  { %957 = vrot.lane.b32.xlu0 %v7673_v38, %s7372_s28 }
 0x4a6   :  { %v550_v32 = vpop.f32.mrb[6].mxu1 }
 0x4a7   :  { %v6379_v33 = vpop.f32.mrb[7].mxu1 }
 0x4db   :  { %v954_v34 = vpop.xlane.xlu0 %953 }
 0x4dc   :  { %7300 = vrcp.f32 %v954_v34 }
 0x4df   :  { %v958_v48 = vpop.permute.xlu0 %957 }
 0x4e6   :  { %v7301_v47 = vpop.eup %7300 }
 0x4e7   :  { %v956_v49 = vmul.f32 %v7301_v47, %v7299_v17 }
 0x51a   :  { %v717_v44 = vpop.f32.mrb[8].mxu1 }
 0x51b   :  { %v6389_v45 = vpop.f32.mrb[9].mxu1  ;;  %6399 = vmatmul.mubr.msk.f32.vlgmr.msra.gmra.mrb[10].mxu1 %vm391_vm2, %v717_v44 }
 0x51c   :  { %6852 = vmatpush3.bf16.msra.mxu1 %v7745_v39  ;;  %6409 = vmatprep.mubr.msk.f32.mxu1 %vm7371_vm1, %v7370_v13 }
 0x51d   :  { %6853 = vmatprep.subr.bf16.mxu1 %v7375_v19 }
 0x520   :  { %6855 = vmatpush3.bf16.msra.mxu1 %v7755_v46 }
 0x521   :  { %6417 = vmatprep.subr.mxu1 %v7370_v13 }
 0x523   :  { %6410 = vmatmul.mubr.msk.f32.vlgmr.msra.gmra.mrb[12].mxu1 %vm391_vm2, %v550_v32 }
 0x524   :  { %6418 = vmatpush3.msra.mxu1 %v958_v48  ;;  %6419 = vmatprep.mubr.msk.f32.mxu1 %vm7371_vm1, %v7370_v13 }
 0x525   :  { %6433 = vmatprep.subr.mxu1 %v7370_v13 }
 0x527   :  { %6420 = vmatmul.mubr.msk.f32.vlgmr.msra.gmra.mrb[14].mxu1 %vm469_vm3, %v956_v49 }
 0x528   :  { %6435 = vmatprep.mubr.msk.f32.mxu1 %vm7371_vm1, %v7370_v13 }
 0x52b   :  { %6434 = vmatpush3.xpose.msk.msra.mxu1 %vm391_vm2, %v1110_v50 }
 0x52c   :  { %6438 = vmatprep.subr.mxu1 %v7370_v13 }
 0x52e   :  { %6436 = vmatmul.mubr.msk.f32.vlgmr.msra.gmra.mrb[16].mxu1 %vm391_vm2, %v1108_v51 }
 0x52f   :  { %6440 = vmatprep.mubr.msk.f32.mxu1 %vm7371_vm1, %v7370_v13 }
 0x5ee   :  { %v790_v58 = vpop.f32.mrb[10].mxu1 }
 0x5ef   :  { %v6400_v59 = vpop.f32.mrb[11].mxu1 }
 0x5f6   :  { %v863_v60 = vpop.f32.mrb[12].mxu1 }
 0x5f7   :  { %v864_v61 = vadd.f32 %v863_v60, %v790_v58  ;;  %v6411_v62 = vpop.f32.mrb[13].mxu1 }
 0x5fa   :  { %v1029_v63 = vpop.f32.mrb[14].mxu1 }
 0x5fb   :  { %v6421_v0 = vpop.f32.mrb[15].mxu1  ;;  %6431 = vmatmul.mubr.msk.f32.vlgmr.msra.gmra.mrb[8].mxu0 %vm391_vm2, %v1029_v63 }
 0x5fc   :  { %6451 = vmatprep.mubr.msk.f32.mxu0 %vm7371_vm1, %v7370_v13 }
 0x601   :  { %v1181_v1 = vpop.f32.mrb[16].mxu1 }
 0x602   :  { %v1185_v2 = vmul.f32 0.17677669, %v1181_v1  ;;  %v6437_v3 = vpop.f32.mrb[17].mxu1 }
 0x604   :  { %v1186_v4 = vsel %vm469_vm3, %v1185_v2, -inf }
 0x605   :  { %1187 = vmax.xlane.f32.xlu1 %v1186_v4 }
 0x616   :  { %1197 = vrot.lane.b32.xlu1 %v7673_v38, %s7374_s30  ;;  %v387_v38 = vld [vmem:[%s9362_s6 + $0x60] sm:$0xff] }
 0x617   :  { %v7815_v14 = vpack.c.bf16 %v388_v11, %v387_v38 }
 0x619   :  { %6864 = vmatpush3.bf16.msra.mxu0 %v7815_v14 }
 0x61a   :  { %1508 = vrot.lane.b32.xlu1 %v7677_v40, %s7373_s29  ;;  %6865 = vmatprep.subr.bf16.mxu0 %v7375_v19 }
 0x61d   :  { %6867 = vmatpush3.bf16.msra.mxu0 %v7821_v16 }
 0x61e   :  { %6464 = vmatprep.subr.mxu0 %v7370_v13 }
 0x692   :  { %v1188_v5 = vpop.xlane.xlu1 %1187 }
 0x693   :  { %v1189_v6 = vsub.f32 %v1185_v2, %v1188_v5 }
 0x695   :  { %v1190_v7 = vmul.f32 1.442695, %v1189_v6 }
 0x696   :  { %v1198_v8 = vpop.permute.xlu1 %1197 }
 0x697   :  { %7302 = vpow2.f32 %v1190_v7  ;;  %6439 = vmatpush3.msra.mxu1 %v1198_v8 }
 0x698   :  { %6454 = vmatprep.subr.mxu1 %v7370_v13 }
 0x69a   :  { %v1509_v35 = vpop.permute.xlu1 %1508 }
 0x6a1   :  { %v7303_v9 = vpop.eup %7302 }
 0x6a2   :  { %v1192_v10 = vsel %vm469_vm3, %v7303_v9, 0.0 }
 0x6a3   :  { %1193 = vadd.xlane.f32.xlu0 %v1192_v10 }
 0x6b9   :  { %1510 = vrot.lane.b32.xlu0 %v7681_v43, %s7373_s29 }
 0x6ce   :  { %v1102_v17 = vpop.f32.mrb[8].mxu0 }
 0x6cf   :  { %v1106_v18 = vadd.f32 %v1102_v17, %v864_v61  ;;  %v6432_v20 = vpop.f32.mrb[9].mxu0 }
 0x730   :  { %v1194_v23 = vpop.xlane.xlu0 %1193 }
 0x731   :  { %7304 = vrcp.f32 %v1194_v23 }
 0x734   :  { %v1511_v33 = vpop.permute.xlu0 %1510 }
 0x73b   :  { %v7305_v27 = vpop.eup %7304 }
 0x73c   :  { %v1196_v30 = vmul.f32 %v7305_v27, %v7303_v9 }
 0x73e   :  { %6441 = vmatmul.mubr.msk.f32.vlgmr.msra.gmra.mrb[18].mxu1 %vm469_vm3, %v1196_v30 }
 0x73f   :  { %6455 = vmatpush3.xpose.msk.msra.mxu1 %vm391_vm2, %v7681_v43  ;;  %6456 = vmatprep.mubr.msk.f32.mxu1 %vm7371_vm1, %v7370_v13 }
 0x740   :  { %6459 = vmatprep.subr.mxu1 %v7370_v13 }
 0x742   :  { %6457 = vmatmul.mubr.msk.f32.vlgmr.msra.gmra.mrb[20].mxu1 %vm391_vm2, %v7677_v40 }
 0x743   :  { %6460 = vmatpush3.msra.mxu1 %v7671_v36  ;;  %6461 = vmatprep.mubr.msk.f32.mxu1 %vm7371_vm1, %v7370_v13 }
 0x744   :  { %6469 = vmatprep.subr.mxu1 %v7370_v13 }
 0x811   :  { %v1269_v32 = vpop.f32.mrb[18].mxu1 }
 0x812   :  { %v6442_v34 = vpop.f32.mrb[19].mxu1  ;;  %6452 = vmatmul.mubr.msk.f32.vlgmr.msra.gmra.mrb[10].mxu0 %vm391_vm2, %v1269_v32 }
 0x813   :  { %6465 = vmatpush3.xpose.msk.msra.mxu0 %vm391_vm2, %v1511_v33  ;;  %6466 = vmatprep.mubr.msk.f32.mxu0 %vm7371_vm1, %v7370_v13 }
 0x814   :  { %6868 = vmatprep.subr.bf16.mxu0 %v7375_v19 }
 0x815   :  { %v1419_v37 = vpop.f32.mrb[20].mxu1 }
 0x816   :  { %v1423_v41 = vmul.f32 0.17677669, %v1419_v37  ;;  %v6458_v42 = vpop.f32.mrb[21].mxu1  ;;  %6467 = vmatmul.mubr.msk.f32.vlgmr.msra.gmra.mrb[12].mxu0 %vm391_vm2, %v1509_v35 }
 0x817   :  { %6870 = vmatpush3.bf16.msra.mxu0 %v7728_v29  ;;  %6482 = vmatprep.mubr.msk.f32.mxu0 %vm7371_vm1, %v7370_v13 }
 0x818   :  { %v1424_v44 = vsel %vm469_vm3, %v1423_v41, -inf  ;;  %6871 = vmatprep.subr.bf16.mxu0 %v7375_v19 }
 0x819   :  { %1425 = vmax.xlane.f32.xlu1 %v1424_v44  ;;  %v7914_v44 = vld [vmem:[%s9363_s7] ss:$0 sm:$0xff] }
 0x81b   :  { %6873 = vmatpush3.bf16.msra.mxu0 %v7734_v31 }
 0x81c   :  { %6496 = vmatprep.subr.mxu0 %v7370_v13 }
 0x8a6   :  { %v1426_v45 = vpop.xlane.xlu1 %1425 }
 0x8a7   :  { %v1427_v47 = vsub.f32 %v1423_v41, %v1426_v45 }
 0x8a9   :  { %v1428_v48 = vmul.f32 1.442695, %v1427_v47 }
 0x8ab   :  { %7306 = vpow2.f32 %v1428_v48 }
 0x8b5   :  { %v7307_v56 = vpop.eup %7306 }
 0x8b6   :  { %v1430_v58 = vsel %vm469_vm3, %v7307_v56, 0.0 }
 0x8e5   :  { %v1342_v49 = vpop.f32.mrb[10].mxu0 }
 0x8e6   :  { %v7851_v50 = vadd.f32 %v1342_v49, %v1106_v18  ;;  %v6453_v29 = vpop.f32.mrb[11].mxu0 }
 0x8e8   :  { %v2308_v49 = vadd.f32 %v7914_v44, %v7851_v50 }
 0x8e9   :  { %v1582_v51 = vpop.f32.mrb[12].mxu0 }
 0x8ea   :  { %v1586_v52 = vmul.f32 0.17677669, %v1582_v51  ;;  %v6468_v53 = vpop.f32.mrb[13].mxu0  ;;  %v2310_v29 = vadd.f32 %v2308_v49, %v7641_v21  ;;  %v2397_v49 = vld [vmem:[%s9364_s10 + $0x160] sm:$0xff] }
 0x8ec   :  { %v1587_v55 = vsel %vm469_vm3, %v1586_v52, -inf }
 0x8ed   :  { %1588 = vmax.xlane.f32.xlu0 %v1587_v55 }
 0x8f1   :  { %1431 = vadd.xlane.f32.xlu0 %v1430_v58 }
 0x907   :  { %1599 = vrot.lane.b32.xlu0 %v7671_v36, %s7373_s29 }
 0x97a   :  { %v1589_v31 = vpop.xlane.xlu0 %1588 }
 0x97b   :  { %v1590_v59 = vsub.f32 %v1586_v52, %v1589_v31 }
 0x97d   :  { %v1591_v60 = vmul.f32 1.442695, %v1590_v59 }
 0x97e   :  { %v1432_v61 = vpop.xlane.xlu0 %1431 }
 0x97f   :  { %7308 = vpow2.f32 %v1591_v60 }
 0x980   :  { %7310 = vrcp.f32 %v1432_v61  ;;  %v2354_v61 = vld [vmem:[%s9364_s10 + $0x8] sm:$0xff] }
 0x982   :  { %v1600_v2 = vpop.permute.xlu0 %1599 }
 0x989   :  { %v7309_v62 = vpop.eup %7308 }
 0x98a   :  { %v7311_v63 = vpop.eup %7310  ;;  %v1593_v0 = vsel %vm469_vm3, %v7309_v62, 0.0 }
 0x98b   :  { %v1434_v1 = vmul.f32 %v7311_v63, %v7307_v56  ;;  %1594 = vadd.xlane.f32.xlu1 %v1593_v0 }
 0x98d   :  { %6462 = vmatmul.mubr.msk.f32.vlgmr.msra.gmra.mrb[22].mxu1 %vm469_vm3, %v1434_v1 }
 0x98e   :  { %6470 = vmatpush3.msra.mxu1 %v1600_v2  ;;  %6471 = vmatprep.mubr.msk.f32.mxu1 %vm7371_vm1, %v7370_v13  ;;  %v2357_v2 = vld [vmem:[%s9364_s10 + $0x20] sm:$0xff] }
 0x98f   :  { %6874 = vmatprep.subr.bf16.mxu1 %v7375_v19 }
 0x99c   :  { %1823 = vrot.lane.b32.xlu1 %v7681_v43, %s7372_s28 }
 0x9a0   :  { %1821 = vrot.lane.b32.xlu1 %v7677_v40, %s7372_s28 }
 0xa18   :  { %v1595_v3 = vpop.xlane.xlu1 %1594 }
 0xa19   :  { %7312 = vrcp.f32 %v1595_v3  ;;  %v2362_v3 = vld [vmem:[%s9364_s10 + $0x48] sm:$0xff] }
 0xa1c   :  { %v1824_v8 = vpop.permute.xlu1 %1823 }
 0xa23   :  { %v7313_v4 = vpop.eup %7312 }
 0xa24   :  { %v1597_v5 = vmul.f32 %v7313_v4, %v7309_v62  ;;  %v2358_v62 = vld [vmem:[%s9364_s10 + $0x28] sm:$0xff] }
 0xa25   :  { %v6892_v0 = vpack.c.bf16 %v2358_v62, %v2354_v61  ;;  %v2366_v4 = vld [vmem:[%s9364_s10 + $0x68] sm:$0xff]  ;;  %v2413_v61 = vld [vmem:[%s9364_s10 + $0x1e0] sm:$0xff] }
 0xa26   :  { %6472 = vmatmul.mubr.msk.f32.vlgmr.msra.gmra.mrb[24].mxu1 %vm469_vm3, %v1597_v5 }
 0xa27   :  { %6876 = vmatpush3.bf16.msra.mxu1 %v7745_v39  ;;  %6493 = vmatprep.mubr.msk.f32.mxu1 %vm7371_vm1, %v7370_v13  ;;  %v1822_v39 = vpop.permute.xlu1 %1821 }
 0xa28   :  { %6877 = vmatprep.subr.bf16.mxu1 %v7375_v19 }
 0xa2b   :  { %6879 = vmatpush3.bf16.msra.mxu1 %v7755_v46 }
 0xa2c   :  { %6501 = vmatprep.subr.mxu1 %v7370_v13 }
 0xa60   :  { %v1504_v6 = vpop.f32.mrb[22].mxu1 }
 0xa61   :  { %v6463_v7 = vpop.f32.mrb[23].mxu1  ;;  %6494 = vmatmul.mubr.msk.f32.vlgmr.msra.gmra.mrb[26].mxu1 %vm391_vm2, %v1504_v6 }
 0xa62   :  { %6503 = vmatprep.mubr.msk.f32.mxu1 %vm7371_vm1, %v7370_v13 }
 0xaf9   :  { %v1671_v9 = vpop.f32.mrb[24].mxu1 }
 0xafa   :  { %v6473_v10 = vpop.f32.mrb[25].mxu1  ;;  %6483 = vmatmul.mubr.msk.f32.vlgmr.msra.gmra.mrb[14].mxu0 %vm391_vm2, %v1671_v9  ;;  %v6896_v9 = vpack.c.bf16 %v2366_v4, %v2362_v3  ;;  %v2360_v3 = vld [vmem:[%s9364_s10 + $0x38] sm:$0xff] }
 0xafb   :  { %6497 = vmatpush3.xpose.msk.msra.mxu0 %vm391_vm2, %v1824_v8  ;;  %6498 = vmatprep.mubr.msk.f32.mxu0 %vm7371_vm1, %v7370_v13  ;;  %v2361_v10 = vld [vmem:[%s9364_s10 + $0x40] sm:$0xff] }
 0xafc   :  { %6880 = vmatprep.subr.bf16.mxu0 %v7375_v19 }
 0xafe   :  { %6499 = vmatmul.mubr.msk.f32.vlgmr.msra.gmra.mrb[16].mxu0 %vm391_vm2, %v1822_v39  ;;  %v2365_v39 = vld [vmem:[%s9364_s10 + $0x60] sm:$0xff] }
 0xaff   :  { %6882 = vmatpush3.bf16.msra.mxu0 %v7780_v54  ;;  %6514 = vmatprep.mubr.msk.f32.mxu0 %vm7371_vm1, %v7370_v13 }
 0xb00   :  { %6883 = vmatprep.subr.bf16.mxu0 %v7375_v19 }
 0xb03   :  { %6885 = vmatpush3.bf16.msra.mxu0 %v7790_v57 }
 0xb04   :  { %6886 = vmatprep.subr.bf16.mxu0 %v7375_v19 }
 0xb34   :  { %v1817_v46 = vpop.f32.mrb[26].mxu1 }
 0xb35   :  { %v6495_v38 = vpop.f32.mrb[27].mxu1 }
 0xb36   :  { %v2374_v38 = vld [vmem:[%s9364_s10 + $0xa8] sm:$0xff] }
 0xbcd   :  { %v1744_v11 = vpop.f32.mrb[14].mxu0 }
 0xbce   :  { %v7888_v12 = vadd.f32 %v1817_v46, %v1744_v11  ;;  %v6484_v15 = vpop.f32.mrb[15].mxu0  ;;  %v2370_v46 = vld [vmem:[%s9364_s10 + $0x88] sm:$0xff] }
 0xbcf   :  { %v6900_v15 = vpack.c.bf16 %v2374_v38, %v2370_v46  ;;  %v2367_v46 = vld [vmem:[%s9364_s10 + $0x70] sm:$0xff] }
 0xbd1   :  { %v1895_v17 = vpop.f32.mrb[16].mxu0 }
 0xbd2   :  { %v1899_v18 = vmul.f32 0.17677669, %v1895_v17  ;;  %v6500_v20 = vpop.f32.mrb[17].mxu0  ;;  %v2369_v17 = vld [vmem:[%s9364_s10 + $0x80] sm:$0xff] }
 0xbd3   :  { %v2378_v20 = vld [vmem:[%s9364_s10 + $0xc8] sm:$0xff] }
 0xbd4   :  { %v1900_v54 = vsel %vm469_vm3, %v1899_v18, -inf }
 0xbd5   :  { %1901 = vmax.xlane.f32.xlu0 %v1900_v54  ;;  %v2382_v54 = vld [vmem:[%s9364_s10 + $0xe8] sm:$0xff] }
 0xbeb   :  { %1911 = vrot.lane.b32.xlu0 %v7671_v36, %s7372_s28 }
 0xbef   :  { %2061 = vrot.lane.b32.xlu0 %v7677_v40, %s7374_s30 }
 0xc62   :  { %v1902_v57 = vpop.xlane.xlu0 %1901 }
 0xc63   :  { %v1903_v23 = vsub.f32 %v1899_v18, %v1902_v57  ;;  %v2373_v18 = vld [vmem:[%s9364_s10 + $0xa0] sm:$0xff] }
 0xc65   :  { %v1904_v27 = vmul.f32 1.442695, %v1903_v23  ;;  %v6902_v23 = vpack.c.bf16 %v2373_v18, %v2369_v17 }
 0xc66   :  { %v1912_v30 = vpop.permute.xlu0 %1911 }
 0xc67   :  { %7314 = vpow2.f32 %v1904_v27  ;;  %6502 = vmatpush3.msra.mxu1 %v1912_v30  ;;  %v6904_v27 = vpack.c.bf16 %v2382_v54, %v2378_v20  ;;  %v2377_v30 = vld [vmem:[%s9364_s10 + $0xc0] sm:$0xff]  ;;  %v2371_v20 = vld [vmem:[%s9364_s10 + $0x90] sm:$0xff] }
 0xc68   :  { %6517 = vmatprep.subr.mxu1 %v7370_v13  ;;  %v2375_v54 = vld [vmem:[%s9364_s10 + $0xb0] sm:$0xff] }
 0xc6a   :  { %v2062_v41 = vpop.permute.xlu0 %2061 }
 0xc71   :  { %v7315_v32 = vpop.eup %7314 }
 0xc72   :  { %v1906_v33 = vsel %vm469_vm3, %v7315_v32, 0.0 }
 0xc73   :  { %1907 = vadd.xlane.f32.xlu1 %v1906_v33  ;;  %v2386_v33 = vld [vmem:[%s9364_s10 + $0x108] sm:$0xff] }
 0xc84   :  { %2063 = vrot.lane.b32.xlu1 %v7681_v43, %s7374_s30 }
 0xd00   :  { %v1908_v34 = vpop.xlane.xlu1 %1907 }
 0xd01   :  { %7316 = vrcp.f32 %v1908_v34  ;;  %v2390_v34 = vld [vmem:[%s9364_s10 + $0x128] sm:$0xff] }
 0xd04   :  { %v2064_v40 = vpop.permute.xlu1 %2063 }
 0xd0b   :  { %v7317_v35 = vpop.eup %7316 }
 0xd0c   :  { %v1910_v37 = vmul.f32 %v7317_v35, %v7315_v32  ;;  %v2381_v32 = vld [vmem:[%s9364_s10 + $0xe0] sm:$0xff] }
 0xd0d   :  { %v6906_v35 = vpack.c.bf16 %v2381_v32, %v2377_v30  ;;  %v2379_v32 = vld [vmem:[%s9364_s10 + $0xd0] sm:$0xff] }
 0xd0e   :  { %6504 = vmatmul.mubr.msk.f32.vlgmr.msra.gmra.mrb[28].mxu1 %vm469_vm3, %v1910_v37  ;;  %v6908_v37 = vpack.c.bf16 %v2390_v34, %v2386_v33  ;;  %v2383_v33 = vld [vmem:[%s9364_s10 + $0xf0] sm:$0xff]  ;;  %v2388_v34 = vld [vmem:[%s9364_s10 + $0x118] sm:$0xff] }
 0xd0f   :  { %6518 = vmatpush3.xpose.msk.msra.mxu1 %vm391_vm2, %v2064_v40  ;;  %6519 = vmatprep.mubr.msk.f32.mxu1 %vm7371_vm1, %v7370_v13  ;;  %v2385_v40 = vld [vmem:[%s9364_s10 + $0x100] sm:$0xff] }
 0xd10   :  { %6522 = vmatprep.subr.mxu1 %v7370_v13 }
 0xd12   :  { %6520 = vmatmul.mubr.msk.f32.vlgmr.msra.gmra.mrb[30].mxu1 %vm391_vm2, %v2062_v41  ;;  %v2389_v41 = vld [vmem:[%s9364_s10 + $0x120] sm:$0xff] }
 0xd13   :  { %6524 = vmatprep.mubr.msk.f32.mxu1 %vm7371_vm1, %v7370_v13 }
 0xde1   :  { %v1983_v43 = vpop.f32.mrb[28].mxu1 }
 0xde2   :  { %v6505_v42 = vpop.f32.mrb[29].mxu1  ;;  %6515 = vmatmul.mubr.msk.f32.vlgmr.msra.gmra.mrb[18].mxu0 %vm391_vm2, %v1983_v43  ;;  %v2394_v43 = vld [vmem:[%s9364_s10 + $0x148] sm:$0xff] }
 0xde3   :  { %6888 = vmatpush3.bf16.msra.mxu0 %v7815_v14  ;;  %6535 = vmatprep.mubr.msk.f32.mxu0 %vm7371_vm1, %v7370_v13  ;;  %v2398_v42 = vld [vmem:[%s9364_s10 + $0x168] sm:$0xff] }
 0xde4   :  { %6889 = vmatprep.subr.bf16.mxu0 %v7375_v19 }
 0xde5   :  { %v2135_v45 = vpop.f32.mrb[30].mxu1 }
 0xde6   :  { %v2139_v47 = vmul.f32 0.17677669, %v2135_v45  ;;  %v6521_v48 = vpop.f32.mrb[31].mxu1  ;;  %v6910_v45 = vpack.c.bf16 %v2389_v41, %v2385_v40  ;;  %v2387_v41 = vld [vmem:[%s9364_s10 + $0x110] sm:$0xff] }
 0xde7   :  { %6891 = vmatpush3.bf16.msra.mxu0 %v7821_v16  ;;  %v2393_v48 = vld [vmem:[%s9364_s10 + $0x140] sm:$0xff] }
 0xde8   :  { %v2140_v14 = vsel %vm469_vm3, %v2139_v47, -inf }
 0xde9   :  { %2141 = vmax.xlane.f32.xlu1 %v2140_v14  ;;  %v2402_v14 = vld [vmem:[%s9364_s10 + $0x188] sm:$0xff] }
 0xded   :  { %2314 = vadd.xlane.f32.xlu1 %v2310_v29 }
 0xe76   :  { %v2142_v51 = vpop.xlane.xlu1 %2141 }
 0xe77   :  { %v2143_v52 = vsub.f32 %v2139_v47, %v2142_v51  ;;  %v6912_v47 = vpack.c.bf16 %v2398_v42, %v2394_v43  ;;  %v6914_v51 = vpack.c.bf16 %v2397_v49, %v2393_v48  ;;  %v2391_v43 = vld [vmem:[%s9364_s10 + $0x130] sm:$0xff]  ;;  %v2396_v42 = vld [vmem:[%s9364_s10 + $0x158] sm:$0xff] }
 0xe78   :  { %v2395_v49 = vld [vmem:[%s9364_s10 + $0x150] sm:$0xff] }
 0xe79   :  { %v2144_v53 = vmul.f32 1.442695, %v2143_v52 }
 0xe7a   :  { %v2315_v55 = vpop.xlane.xlu1 %2314 }
 0xe7b   :  { %7318 = vpow2.f32 %v2144_v53  ;;  %v2319_v56 = vmul.f32 0.0078125, %v2315_v55  ;;  %v2401_v53 = vld [vmem:[%s9364_s10 + $0x180] sm:$0xff] }
 0xe7c   :  { %v2405_v55 = vld [vmem:[%s9364_s10 + $0x1a0] sm:$0xff] }
 0xe7d   :  { %v7922_v58 = vsub.f32 %v2310_v29, %v2319_v56  ;;  %v2406_v29 = vld [vmem:[%s9364_s10 + $0x1a8] sm:$0xff] }
 0xe7e   :  { %v6916_v52 = vpack.c.bf16 %v2406_v29, %v2402_v14  ;;  %v2399_v14 = vld [vmem:[%s9364_s10 + $0x170] sm:$0xff]  ;;  %v2404_v29 = vld [vmem:[%s9364_s10 + $0x198] sm:$0xff] }
 0xe7f   :  { %v2323_v31 = vmul.f32 %v7922_v58, %v7922_v58 }
 0xe81   :  { %2325 = vadd.xlane.f32.xlu1 %v2323_v31  ;;  %v2410_v31 = vld [vmem:[%s9364_s10 + $0x1c8] sm:$0xff] }
 0xe85   :  { %v7319_v50 = vpop.eup %7318 }
 0xe86   :  { %v2146_v16 = vsel %vm469_vm3, %v7319_v50, 0.0 }
 0xe87   :  { %2147 = vadd.xlane.f32.xlu0 %v2146_v16  ;;  %v6918_v16 = vpack.c.bf16 %v2405_v55, %v2401_v53  ;;  %v2403_v55 = vld [vmem:[%s9364_s10 + $0x190] sm:$0xff] }
 0xe9d   :  { %2151 = vrot.lane.b32.xlu0 %v7671_v36, %s7374_s30  ;;  %v2353_v36 = vld [vmem:[%s9364_s10] sm:$0xff] }
 0xe9e   :  { %v6894_v6 = vpack.c.bf16 %v2357_v2, %v2353_v36  ;;  %v8040_v36 = vld [vmem:[%s9366_s9] ss:$0 sm:$0xff] }
 0xeb5   :  { %v2056_v21 = vpop.f32.mrb[18].mxu0 }
 0xeb6   :  { %v7930_v59 = vadd.f32 %v2056_v21, %v7888_v12  ;;  %v6516_v60 = vpop.f32.mrb[19].mxu0  ;;  %v6898_v12 = vpack.c.bf16 %v2365_v39, %v2361_v10  ;;  %v2363_v39 = vld [vmem:[%s9364_s10 + $0x50] sm:$0xff] }
 0xeb7   :  { %v2409_v60 = vld [vmem:[%s9364_s10 + $0x1c0] sm:$0xff]  ;;  %v6930_v17 = vpack.c.bf16 %v2367_v46, %v2363_v39 }
 0xf0e   :  { %v2326_v7 = vpop.xlane.xlu1 %2325 }
 0xf0f   :  { %v2329_v11 = vmul.f32 0.0078125, %v2326_v7  ;;  %v2364_v7 = vld [vmem:[%s9364_s10 + $0x58] sm:$0xff] }
 0xf11   :  { %v2331_v57 = vadd.f32 1e-05, %v2329_v11  ;;  %v2372_v11 = vld [vmem:[%s9364_s10 + $0x98] sm:$0xff] }
 0xf14   :  { %v2148_v63 = vpop.xlane.xlu0 %2147 }
 0xf15   :  { %7320 = vrcp.f32 %v2148_v63  ;;  %v8034_v63 = vld [vmem:[%s9365_s8] ss:$0 sm:$0xff] }
 0xf16   :  { %7322 = vrsqrt.f32 %v2331_v57  ;;  %v2380_v57 = vld [vmem:[%s9364_s10 + $0xd8] sm:$0xff] }
 0xf18   :  { %v2152_v1 = vpop.permute.xlu0 %2151 }
 0xf19   :  { %6523 = vmatpush3.msra.mxu1 %v2152_v1 }
 0xf1a   :  { %6893 = vmatprep.subr.bf16.mxu1 %v6892_v0  ;;  %v6922_v0 = vpack.c.bf16 %v2413_v61, %v2409_v60  ;;  %v2411_v60 = vld [vmem:[%s9364_s10 + $0x1d0] sm:$0xff] }
 0xf1b   :  { %v2415_v61 = vld [vmem:[%s9364_s10 + $0x1f0] sm:$0xff] }
 0xf1f   :  { %v7321_v5 = vpop.eup %7320 }
 0xf20   :  { %v2150_v8 = vmul.f32 %v7321_v5, %v7319_v50  ;;  %v7323_v56 = vpop.eup %7322  ;;  %v2414_v50 = vld [vmem:[%s9364_s10 + $0x1e8] sm:$0xff]  ;;  %v2355_v5 = vld [vmem:[%s9364_s10 + $0x10] sm:$0xff] }
 0xf21   :  { %v6920_v21 = vpack.c.bf16 %v2414_v50, %v2410_v31  ;;  %v2335_v62 = vmul.f32 %v7323_v56, %v7922_v58  ;;  %v2356_v58 = vld [vmem:[%s9364_s10 + $0x18] sm:$0xff]  ;;  %v2407_v56 = vld [vmem:[%s9364_s10 + $0x1b0] sm:$0xff] }
 0xf22   :  { %6525 = vmatmul.mubr.msk.f32.vlgmr.msra.gmra.mrb[32].mxu1 %vm469_vm3, %v2150_v8  ;;  %v6924_v4 = vpack.c.bf16 %v2360_v3, %v2356_v58  ;;  %v2368_v8 = vld [vmem:[%s9364_s10 + $0x78] sm:$0xff] }
 0xf23   :  { %6895 = vmatpush1.bf16.msra.mxu1 %v6894_v6  ;;  %2503 = vmatprep.mubr.f32.mxu1 %v7370_v13  ;;  %v2343_v1 = vmul.f32 %v8034_v63, %v2335_v62  ;;  %v2359_v6 = vld [vmem:[%s9364_s10 + $0x30] sm:$0xff]  ;;  %v6928_v10 = vpack.c.bf16 %v2368_v8, %v2364_v7  ;;  %v2412_v31 = vld [vmem:[%s9364_s10 + $0x1d8] sm:$0xff]  ;;  %v6954_v62 = vpack.c.bf16 %v2415_v61, %v2411_v60  ;;  %v2617_v7 = vld [vmem:[%s9367_s12 + $0x80] sm:$0xff] }
 0xf24   :  { %6897 = vmatprep.subr.bf16.mxu1 %v6896_v9  ;;  %6925 = vmatprep.subr.bf16.mxu0 %v6924_v4  ;;  %v6926_v9 = vpack.c.bf16 %v2359_v6, %v2355_v5  ;;  %v2416_v50 = vld [vmem:[%s9364_s10 + $0x1f8] sm:$0xff]  ;;  %v2618_v8 = vld [vmem:[%s9367_s12 + $0x88] sm:$0xff] }
 0xf25   :  { %v8043_v2 = vadd.f32 %v8040_v36, %v2343_v1  ;;  %v2656_v61 = vld [vmem:[%s9367_s12 + $0x1b8] sm:$0xff] }
 0xf27   :  { %6899 = vmatpush1.bf16.msra.mxu1 %v6898_v12  ;;  %v2376_v12 = vld [vmem:[%s9364_s10 + $0xb8] sm:$0xff] }
 0xf28   :  { %6901 = vmatprep.subr.bf16.mxu1 %v6900_v15  ;;  %v6932_v18 = vpack.c.bf16 %v2376_v12, %v2372_v11  ;;  %v2634_v11 = vld [vmem:[%s9367_s12 + $0x108] sm:$0xff]  ;;  %v2619_v12 = vld [vmem:[%s9367_s12 + $0x90] sm:$0xff] }
 0xf2b   :  { %6903 = vmatpush1.bf16.msra.mxu1 %v6902_v23  ;;  %v2384_v23 = vld [vmem:[%s9364_s10 + $0xf8] sm:$0xff] }
 0xf2c   :  { %6905 = vmatprep.subr.bf16.mxu1 %v6904_v27  ;;  %v6934_v27 = vpack.c.bf16 %v2375_v54, %v2371_v20  ;;  %v6936_v30 = vpack.c.bf16 %v2384_v23, %v2380_v57  ;;  %v2652_v20 = vld [vmem:[%s9367_s12 + $0x198] sm:$0xff] }
 0xf2f   :  { %6907 = vmatpush1.bf16.msra.mxu1 %v6906_v35  ;;  %v2392_v35 = vld [vmem:[%s9364_s10 + $0x138] sm:$0xff] }
 0xf30   :  { %6909 = vmatprep.subr.bf16.mxu1 %v6908_v37  ;;  %v6938_v37 = vpack.c.bf16 %v2383_v33, %v2379_v32  ;;  %v6940_v40 = vpack.c.bf16 %v2392_v35, %v2388_v34  ;;  %v2635_v32 = vld [vmem:[%s9367_s12 + $0x110] sm:$0xff]  ;;  %v2636_v35 = vld [vmem:[%s9367_s12 + $0x118] sm:$0xff] }
 0xf33   :  { %6911 = vmatpush1.bf16.msra.mxu1 %v6910_v45  ;;  %v2400_v45 = vld [vmem:[%s9364_s10 + $0x178] sm:$0xff] }
 0xf34   :  { %6913 = vmatprep.subr.bf16.mxu1 %v6912_v47  ;;  %v6942_v47 = vpack.c.bf16 %v2391_v43, %v2387_v41  ;;  %v6944_v48 = vpack.c.bf16 %v2400_v45, %v2396_v42  ;;  %v2621_v45 = vld [vmem:[%s9367_s12 + $0xa0] sm:$0xff] }
 0xf37   :  { %6915 = vmatpush1.bf16.msra.mxu1 %v6914_v51  ;;  %v2408_v51 = vld [vmem:[%s9364_s10 + $0x1b8] sm:$0xff] }
 0xf38   :  { %6917 = vmatprep.subr.bf16.mxu1 %v6916_v52  ;;  %v6946_v52 = vpack.c.bf16 %v2399_v14, %v2395_v49  ;;  %v6948_v53 = vpack.c.bf16 %v2408_v51, %v2404_v29  ;;  %v2654_v14 = vld [vmem:[%s9367_s12 + $0x1a8] sm:$0xff]  ;;  %v2605_v29 = vld [vmem:[%s9367_s12 + $0x20] sm:$0xff] }
 0xf39   :  { %v2606_v51 = vld [vmem:[%s9367_s12 + $0x28] sm:$0xff] }
 0xf3b   :  { %6919 = vmatpush1.bf16.msra.mxu1 %v6918_v16  ;;  %v6950_v16 = vpack.c.bf16 %v2407_v56, %v2403_v55  ;;  %v2637_v55 = vld [vmem:[%s9367_s12 + $0x120] sm:$0xff]  ;;  %v2638_v56 = vld [vmem:[%s9367_s12 + $0x128] sm:$0xff] }
 0xf3c   :  { %6921 = vmatprep.subr.bf16.mxu1 %v6920_v21  ;;  %v6952_v21 = vpack.c.bf16 %v2416_v50, %v2412_v31  ;;  %v6998_v31 = vpack.c.bf16 %v2638_v56, %v2637_v55  ;;  %v2623_v50 = vld [vmem:[%s9367_s12 + $0xb0] sm:$0xff] }
 0xf3d   :  { %v2631_v56 = vld [vmem:[%s9367_s12 + $0xf0] sm:$0xff] }
 0xf3f   :  { %6923 = vmatpush1.bf16.msra.mxu1 %v6922_v0 }
 0xf42   :  { %2504 = vmatmul.mubr.f32.vlgmr.msra.gmra.mrb[34].mxu1 %v8043_v2 }
 0xf43   :  { %2509 = vmatprep.mubr.f32.mxu1 %v7370_v13 }
 0xff5   :  { %v2223_v38 = vpop.f32.mrb[32].mxu1 }
 0xff6   :  { %v6526_v15 = vpop.f32.mrb[33].mxu1  ;;  %6536 = vmatmul.mubr.msk.f32.vlgmr.msra.gmra.mrb[20].mxu0 %vm391_vm2, %v2223_v38  ;;  %v2633_v38 = vld [vmem:[%s9367_s12 + $0x100] sm:$0xff] }
 0xff7   :  { %6927 = vmatpush1.bf16.msra.mxu0 %v6926_v9  ;;  %2580 = vmatprep.mubr.f32.mxu0 %v7370_v13  ;;  %v2649_v9 = vld [vmem:[%s9367_s12 + $0x180] sm:$0xff]  ;;  %v6990_v15 = vpack.c.bf16 %v2634_v11, %v2633_v38 }
 0xff8   :  { %6929 = vmatprep.subr.bf16.mxu0 %v6928_v10  ;;  %v6956_v10 = vpack.c.bf16 %v2618_v8, %v2617_v7  ;;  %v2625_v7 = vld [vmem:[%s9367_s12 + $0xc0] sm:$0xff] }
 0xff9   :  { %v2641_v38 = vld [vmem:[%s9367_s12 + $0x140] sm:$0xff] }
 0xffa   :  { %6957 = vmatprep.subr.bf16.mxu1 %v6956_v10  ;;  %v2657_v10 = vld [vmem:[%s9367_s12 + $0x1c0] sm:$0xff] }
 0xffb   :  { %6931 = vmatpush1.bf16.msra.mxu0 %v6930_v17  ;;  %v2620_v17 = vld [vmem:[%s9367_s12 + $0x98] sm:$0xff] }
 0xffc   :  { %6933 = vmatprep.subr.bf16.mxu0 %v6932_v18  ;;  %v2651_v18 = vld [vmem:[%s9367_s12 + $0x190] sm:$0xff]  ;;  %v6960_v57 = vpack.c.bf16 %v2620_v17, %v2619_v12  ;;  %v2642_v12 = vld [vmem:[%s9367_s12 + $0x148] sm:$0xff]  ;;  %v2628_v17 = vld [vmem:[%s9367_s12 + $0xd8] sm:$0xff] }
 0xffd   :  { %v6992_v23 = vpack.c.bf16 %v2652_v20, %v2651_v18  ;;  %v7006_v18 = vpack.c.bf16 %v2642_v12, %v2641_v38 }
 0xfff   :  { %6935 = vmatpush1.bf16.msra.mxu0 %v6934_v27  ;;  %v2603_v27 = vld [vmem:[%s9367_s12 + $0x10] sm:$0xff] }
0x1000   :  { %6937 = vmatprep.subr.bf16.mxu0 %v6936_v30  ;;  %v2604_v30 = vld [vmem:[%s9367_s12 + $0x18] sm:$0xff] }
0x1001   :  { %v6962_v34 = vpack.c.bf16 %v2604_v30, %v2603_v27  ;;  %v2611_v27 = vld [vmem:[%s9367_s12 + $0x50] sm:$0xff] }
0x1003   :  { %6939 = vmatpush1.bf16.msra.mxu0 %v6938_v37  ;;  %v6994_v37 = vpack.c.bf16 %v2636_v35, %v2635_v32  ;;  %v2612_v32 = vld [vmem:[%s9367_s12 + $0x58] sm:$0xff] }
0x1004   :  { %6941 = vmatprep.subr.bf16.mxu0 %v6940_v40  ;;  %v2644_v35 = vld [vmem:[%s9367_s12 + $0x158] sm:$0xff] }
0x1007   :  { %6943 = vmatpush1.bf16.msra.mxu0 %v6942_v47  ;;  %v2622_v47 = vld [vmem:[%s9367_s12 + $0xa8] sm:$0xff] }
0x1008   :  { %6945 = vmatprep.subr.bf16.mxu0 %v6944_v48  ;;  %v2653_v48 = vld [vmem:[%s9367_s12 + $0x1a0] sm:$0xff]  ;;  %v6964_v49 = vpack.c.bf16 %v2622_v47, %v2621_v45 }
0x100b   :  { %6947 = vmatpush1.bf16.msra.mxu0 %v6946_v52  ;;  %v6996_v52 = vpack.c.bf16 %v2654_v14, %v2653_v48  ;;  %v2662_v48 = vld [vmem:[%s9367_s12 + $0x1e8] sm:$0xff] }
0x100c   :  { %6949 = vmatprep.subr.bf16.mxu0 %v6948_v53  ;;  %v6966_v53 = vpack.c.bf16 %v2606_v51, %v2605_v29  ;;  %v2614_v14 = vld [vmem:[%s9367_s12 + $0x68] sm:$0xff]  ;;  %v2645_v51 = vld [vmem:[%s9367_s12 + $0x160] sm:$0xff] }
0x100f   :  { %6951 = vmatpush1.bf16.msra.mxu0 %v6950_v16  ;;  %v2624_v16 = vld [vmem:[%s9367_s12 + $0xb8] sm:$0xff] }
0x1010   :  { %6953 = vmatprep.subr.bf16.mxu0 %v6952_v21  ;;  %v2655_v21 = vld [vmem:[%s9367_s12 + $0x1b0] sm:$0xff]  ;;  %v6968_v60 = vpack.c.bf16 %v2624_v16, %v2623_v50 }
0x1011   :  { %v2663_v50 = vld [vmem:[%s9367_s12 + $0x1f0] sm:$0xff] }
0x1013   :  { %6955 = vmatpush1.bf16.msra.mxu0 %v6954_v62  ;;  %v2607_v62 = vld [vmem:[%s9367_s12 + $0x30] sm:$0xff] }
0x1015   :  { %v8145_v0 = vpop.f32.mrb[34].mxu1 }
0x1016   :  { %v8147_v1 = vpop.f32.mrb[35].mxu1  ;;  %2581 = vmatmul.mubr.f32.vlgmr.msra.gmra.mrb[22].mxu0 %v8043_v2 }
0x1017   :  { %2586 = vmatprep.mubr.f32.mxu0 %v7370_v13 }
0x10c9   :  { %v2296_v58 = vpop.f32.mrb[20].mxu0 }
0x10ca   :  { %v2300_v3 = vadd.f32 %v2296_v58, %v7930_v59  ;;  %v6537_v4 = vpop.f32.mrb[21].mxu0  ;;  %v2602_v59 = vld [vmem:[%s9367_s12 + $0x8] sm:$0xff]  ;;  %v2608_v58 = vld [vmem:[%s9367_s12 + $0x38] sm:$0xff] }
0x10cb   :  { %v6970_v4 = vpack.c.bf16 %v2608_v58, %v2607_v62 }
0x10cc   :  { %v2309_v5 = vadd.f32 %v7914_v44, %v2300_v3  ;;  %v2650_v44 = vld [vmem:[%s9367_s12 + $0x188] sm:$0xff]  ;;  %v7000_v3 = vpack.c.bf16 %v2656_v61, %v2655_v21  ;;  %v2664_v21 = vld [vmem:[%s9367_s12 + $0x1f8] sm:$0xff] }
0x10cd   :  { %v6988_v39 = vpack.c.bf16 %v2650_v44, %v2649_v9  ;;  %v2626_v9 = vld [vmem:[%s9367_s12 + $0xc8] sm:$0xff]  ;;  %v2616_v61 = vld [vmem:[%s9367_s12 + $0x78] sm:$0xff]  ;;  %v7016_v62 = vpack.c.bf16 %v2664_v21, %v2663_v50 }
0x10ce   :  { %v2311_v6 = vadd.f32 %v2309_v5, %v7643_v22  ;;  %v2601_v22 = vld [vmem:[%s9367_s12] sm:$0xff]  ;;  %v2639_v5 = vld [vmem:[%s9367_s12 + $0x130] sm:$0xff]  ;;  %v2658_v44 = vld [vmem:[%s9367_s12 + $0x1c8] sm:$0xff] }
0x10cf   :  { %v6958_v46 = vpack.c.bf16 %v2602_v59, %v2601_v22  ;;  %6989 = vmatprep.subr.bf16.mxu0 %v6988_v39  ;;  %v6972_v22 = vpack.c.bf16 %v2626_v9, %v2625_v7  ;;  %v7004_v59 = vpack.c.bf16 %v2658_v44, %v2657_v10  ;;  %v2609_v39 = vld [vmem:[%s9367_s12 + $0x40] sm:$0xff]  ;;  %v2433_v9 = vsub.s32 3, %v7654_v24  ;;  %v5739_v50 = vld [vmem:[%s9383_s4 + $0x198] sm:$0xff] }
0x10d0   :  { %2316 = vadd.xlane.f32.xlu1 %v2311_v6  ;;  %6991 = vmatpush3.bf16.msra.mxu0 %v6990_v15  ;;  %v2627_v15 = vld [vmem:[%s9367_s12 + $0xd0] sm:$0xff]  ;;  %v2417_v10 = vld [vmem:[%s9368_s11] sm:$0xf] }
0x10d1   :  { %6959 = vmatpush3.bf16.msra.mxu1 %v6958_v46  ;;  %6993 = vmatprep.subr.bf16.mxu0 %v6992_v23  ;;  %v2610_v46 = vld [vmem:[%s9367_s12 + $0x48] sm:$0xff]  ;;  %v6976_v20 = vpack.c.bf16 %v2628_v17, %v2627_v15  ;;  %v2660_v23 = vld [vmem:[%s9367_s12 + $0x1d8] sm:$0xff]  ;;  %v2426_v44 = vrot.slane %v2417_v10, %v7657_v25 }
0x10d2   :  { %6961 = vmatprep.subr.bf16.mxu1 %v6960_v57  ;;  %v6974_v11 = vpack.c.bf16 %v2610_v46, %v2609_v39  ;;  %v2659_v57 = vld [vmem:[%s9367_s12 + $0x1d0] sm:$0xff]  ;;  %v2422_v39 = vrot.slane %v2417_v10, %v7666_v28  ;;  %v2430_v46 = vrot.slane %v2417_v10, %v7660_v26 }
0x10d3   :  { %v7008_v30 = vpack.c.bf16 %v2660_v23, %v2659_v57 }
0x10d4   :  { %6995 = vmatpush3.bf16.msra.mxu0 %v6994_v37  ;;  %v6978_v37 = vpack.c.bf16 %v2612_v32, %v2611_v27  ;;  %v2506_v17 = vadd.f32 %v8145_v0, %v2422_v39 }
0x10d5   :  { %6963 = vmatpush3.bf16.msra.mxu1 %v6962_v34  ;;  %6997 = vmatprep.subr.bf16.mxu0 %v6996_v52  ;;  %v2643_v34 = vld [vmem:[%s9367_s12 + $0x150] sm:$0xff]  ;;  %v2646_v52 = vld [vmem:[%s9367_s12 + $0x168] sm:$0xff] }
0x10d6   :  { %6965 = vmatprep.subr.bf16.mxu1 %v6964_v49  ;;  %v7010_v45 = vpack.c.bf16 %v2644_v35, %v2643_v34  ;;  %v2613_v49 = vld [vmem:[%s9367_s12 + $0x60] sm:$0xff]  ;;  %v7014_v55 = vpack.c.bf16 %v2646_v52, %v2645_v51 }
0x10d8   :  { %6999 = vmatpush3.bf16.msra.mxu0 %v6998_v31  ;;  %v2632_v31 = vld [vmem:[%s9367_s12 + $0xf8] sm:$0xff] }
0x10d9   :  { %6967 = vmatpush3.bf16.msra.mxu1 %v6966_v53  ;;  %7001 = vmatprep.subr.bf16.mxu0 %v7000_v3  ;;  %v6982_v53 = vpack.c.bf16 %v2614_v14, %v2613_v49  ;;  %v6984_v16 = vpack.c.bf16 %v2632_v31, %v2631_v56  ;;  %v2647_v3 = vld [vmem:[%s9367_s12 + $0x170] sm:$0xff]  ;;  %v5736_v56 = vld [vmem:[%s9383_s4 + $0x180] sm:$0xff] }
0x10da   :  { %6969 = vmatprep.subr.bf16.mxu1 %v6968_v60  ;;  %v2615_v60 = vld [vmem:[%s9367_s12 + $0x70] sm:$0xff]  ;;  %v7022_v21 = vpack.c.bf16 %v5739_v50, %v5736_v56 }
0x10db   :  { %v6986_v58 = vpack.c.bf16 %v2616_v61, %v2615_v60  ;;  %v5742_v61 = vld [vmem:[%s9383_s4 + $0x1b0] sm:$0xff] }
0x10dd   :  { %6971 = vmatpush3.bf16.msra.mxu1 %v6970_v4  ;;  %v2648_v4 = vld [vmem:[%s9367_s12 + $0x178] sm:$0xff] }
0x10de   :  { %6973 = vmatprep.subr.bf16.mxu1 %v6972_v22  ;;  %v2434_v22 = vrot.slane %v2417_v10, %v2433_v9 }
0x10e1   :  { %6975 = vmatpush3.bf16.msra.mxu1 %v6974_v11  ;;  %v2508_v11 = vadd.f32 %v8147_v1, %v2426_v44  ;;  %v2593_v1 = vmax.f32 %v2506_v17, 0.0  ;;  %v5761_v17 = vld [vmem:[%s9383_s4 + $0x248] sm:$0xff] }
0x10e2   :  { %6977 = vmatprep.subr.bf16.mxu1 %v6976_v20 }
0x10e3   :  { %v2594_v57 = vmax.f32 %v2508_v11, 0.0  ;;  %v5754_v11 = vld [vmem:[%s9383_s4 + $0x210] sm:$0xff] }
0x10e5   :  { %6979 = vmatpush3.bf16.msra.mxu1 %v6978_v37 }
0x10e9   :  { %v8190_v54 = vpop.f32.mrb[22].mxu0 }
0x10ea   :  { %v8201_v33 = vpop.f32.mrb[23].mxu0 }
0x10eb   :  { %v2585_v12 = vadd.f32 %v8201_v33, %v2434_v22 }
0x10ed   :  { %v2596_v23 = vmax.f32 %v2585_v12, 0.0  ;;  %v5757_v12 = vld [vmem:[%s9383_s4 + $0x228] sm:$0xff] }
0x115d   :  { %v2317_v40 = vpop.xlane.xlu1 %2316 }
0x115e   :  { %v2320_v41 = vmul.f32 0.0078125, %v2317_v40  ;;  %v2629_v40 = vld [vmem:[%s9367_s12 + $0xe0] sm:$0xff] }
0x1160   :  { %v8206_v43 = vsub.f32 %v2311_v6, %v2320_v41  ;;  %v2640_v6 = vld [vmem:[%s9367_s12 + $0x138] sm:$0xff]  ;;  %v2630_v41 = vld [vmem:[%s9367_s12 + $0xe8] sm:$0xff] }
0x1161   :  { %v7002_v8 = vpack.c.bf16 %v2640_v6, %v2639_v5  ;;  %v6980_v47 = vpack.c.bf16 %v2630_v41, %v2629_v40  ;;  %v7018_v5 = vpack.c.bf16 %v2648_v4, %v2647_v3  ;;  %v5752_v3 = vld [vmem:[%s9383_s4 + $0x200] sm:$0xff] }
0x1162   :  { %v2324_v42 = vmul.f32 %v8206_v43, %v8206_v43 }
0x1163   :  { %7003 = vmatpush3.bf16.msra.mxu0 %v7002_v8  ;;  %6981 = vmatprep.subr.bf16.mxu1 %v6980_v47 }
0x1164   :  { %2327 = vadd.xlane.f32.xlu1 %v2324_v42  ;;  %7005 = vmatprep.subr.bf16.mxu0 %v7004_v59  ;;  %v2661_v42 = vld [vmem:[%s9367_s12 + $0x1e0] sm:$0xff] }
0x1165   :  { %v7012_v29 = vpack.c.bf16 %v2662_v48, %v2661_v42  ;;  %6983 = vmatpush3.bf16.msra.mxu1 %v6982_v53  ;;  %v5737_v53 = vld [vmem:[%s9383_s4 + $0x188] sm:$0xff] }
0x1166   :  { %6985 = vmatprep.subr.bf16.mxu1 %v6984_v16  ;;  %v5746_v16 = vld [vmem:[%s9383_s4 + $0x1d0] sm:$0xff] }
0x1167   :  { %7007 = vmatpush3.bf16.msra.mxu0 %v7006_v18  ;;  %v2583_v18 = vadd.f32 %v8190_v54, %v2430_v46 }
0x1168   :  { %7009 = vmatprep.subr.bf16.mxu0 %v7008_v30 }
0x1169   :  { %6987 = vmatpush3.bf16.msra.mxu1 %v6986_v58  ;;  %v5749_v58 = vld [vmem:[%s9383_s4 + $0x1e8] sm:$0xff] }
0x116b   :  { %7011 = vmatpush3.bf16.msra.mxu0 %v7010_v45  ;;  %v8377_v45 = vld [vmem:[%s9369_s13] ss:$0 sm:$0xff] }
0x116c   :  { %7013 = vmatprep.subr.bf16.mxu0 %v7012_v29 }
0x116f   :  { %7015 = vmatpush3.bf16.msra.mxu0 %v7014_v55  ;;  %v5740_v55 = vld [vmem:[%s9383_s4 + $0x1a0] sm:$0xff] }
0x1170   :  { %7017 = vmatprep.subr.bf16.mxu0 %v7016_v62  ;;  %v7020_v31 = vpack.c.bf16 %v5740_v55, %v5737_v53  ;;  %v5745_v62 = vld [vmem:[%s9383_s4 + $0x1c8] sm:$0xff] }
0x1171   :  { %v7026_v4 = vpack.c.bf16 %v5745_v62, %v5742_v61 }
0x1172   :  { %7021 = vmatprep.subr.bf16.mxu1 %v7020_v31 }
0x1173   :  { %7019 = vmatpush3.bf16.msra.mxu0 %v7018_v5  ;;  %v7028_v5 = vpack.c.bf16 %v5752_v3, %v5749_v58  ;;  %v5753_v58 = vld [vmem:[%s9383_s4 + $0x208] sm:$0xff] }
0x11f1   :  { %v2328_v6 = vpop.xlane.xlu1 %2327 }
0x11f2   :  { %v2330_v7 = vmul.f32 0.0078125, %v2328_v6  ;;  %v5748_v6 = vld [vmem:[%s9383_s4 + $0x1e0] sm:$0xff] }
0x11f4   :  { %v2332_v8 = vadd.f32 1e-05, %v2330_v7  ;;  %v5751_v7 = vld [vmem:[%s9383_s4 + $0x1f8] sm:$0xff] }
0x11f6   :  { %7324 = vrsqrt.f32 %v2332_v8  ;;  %v7030_v8 = vpack.c.bf16 %v5751_v7, %v5748_v6 }
0x1200   :  { %v7325_v59 = vpop.eup %7324 }
0x1201   :  { %v2336_v38 = vmul.f32 %v7325_v59, %v8206_v43  ;;  %v2595_v43 = vmax.f32 %v2583_v18, 0.0  ;;  %v5764_v18 = vld [vmem:[%s9383_s4 + $0x260] sm:$0xff] }
0x1203   :  { %v2344_v15 = vmul.f32 %v8034_v63, %v2336_v38 }
0x1205   :  { %v8370_v20 = vadd.f32 %v8040_v36, %v2344_v15  ;;  %v7034_v15 = vpack.c.bf16 %v5757_v12, %v5754_v11 }
0x1207   :  { %2510 = vmatmul.mubr.f32.gmra.mrb[36].mxu1 %v8370_v20  ;;  %2587 = vmatmul.mubr.f32.gmra.mrb[24].mxu0 %v8370_v20 }
0x1208   :  { %2736 = vmatprep.mubr.f32.mxu1 %v2594_v57  ;;  %2811 = vmatprep.mubr.f32.mxu0 %v2596_v23  ;;  %v7036_v57 = vpack.c.bf16 %v5764_v18, %v5761_v17  ;;  %v5760_v23 = vld [vmem:[%s9383_s4 + $0x240] sm:$0xff]  ;;  %v5762_v18 = vld [vmem:[%s9383_s4 + $0x250] sm:$0xff] }
0x120b   :  { %2737 = vmatmul.mubr.f32.vlgmr.msra.gmra.mrb[38].mxu1 %v2593_v1  ;;  %2812 = vmatmul.mubr.f32.vlgmr.msra.gmra.mrb[26].mxu0 %v2595_v43  ;;  %v5763_v1 = vld [vmem:[%s9383_s4 + $0x258] sm:$0xff] }
0x120c   :  { %7023 = vmatpush1.bf16.msra.mxu1 %v7022_v21  ;;  %v7038_v43 = vpack.c.bf16 %v5763_v1, %v5760_v23  ;;  %v5741_v21 = vld [vmem:[%s9383_s4 + $0x1a8] sm:$0xff]  ;;  %v5768_v23 = vld [vmem:[%s9383_s4 + $0x280] sm:$0xff] }
0x12da   :  { %v2511_v63 = vpop.f32.mrb[36].mxu1  ;;  %v2588_v33 = vpop.f32.mrb[24].mxu0 }
0x12db   :  { %v2512_v0 = vadd.f32 %v2511_v63, %v2422_v39  ;;  %v2589_v27 = vadd.f32 %v2588_v33, %v2430_v46  ;;  %v2513_v54 = vpop.f32.mrb[37].mxu1  ;;  %v2590_v30 = vpop.f32.mrb[25].mxu0  ;;  %v5755_v39 = vld [vmem:[%s9383_s4 + $0x218] sm:$0xff]  ;;  %v5758_v46 = vld [vmem:[%s9383_s4 + $0x230] sm:$0xff] }
0x12dc   :  { %v2514_v36 = vadd.f32 %v2513_v54, %v2426_v44  ;;  %v2591_v32 = vadd.f32 %v2590_v30, %v2434_v22  ;;  %v7032_v38 = vpack.c.bf16 %v5758_v46, %v5755_v39  ;;  %v5767_v63 = vld [vmem:[%s9383_s4 + $0x278] sm:$0xff]  ;;  %v5770_v33 = vld [vmem:[%s9383_s4 + $0x290] sm:$0xff]  ;;  %v5769_v54 = vld [vmem:[%s9383_s4 + $0x288] sm:$0xff] }
0x12dd   :  { %v2597_v41 = vmax.f32 %v2512_v0, 0.0  ;;  %v2599_v42 = vmax.f32 %v2589_v27, 0.0  ;;  %v7040_v0 = vpack.c.bf16 %v5770_v33, %v5767_v63  ;;  %v5766_v27 = vld [vmem:[%s9383_s4 + $0x270] sm:$0xff] }
0x12de   :  { %v2598_v34 = vmax.f32 %v2514_v36, 0.0  ;;  %v2600_v35 = vmax.f32 %v2591_v32, 0.0  ;;  %v6101_v37 = vpop.f32.mrb[38].mxu1  ;;  %v6139_v40 = vpop.f32.mrb[26].mxu0  ;;  %v7042_v30 = vpack.c.bf16 %v5769_v54, %v5766_v27  ;;  %v5773_v36 = vld [vmem:[%s9383_s4 + $0x2a8] sm:$0xff]  ;;  %v5776_v32 = vld [vmem:[%s9383_s4 + $0x2c0] sm:$0xff] }
0x12df   :  { %v6102_v47 = vpop.f32.mrb[39].mxu1  ;;  %v6140_v48 = vpop.f32.mrb[27].mxu0  ;;  %v5774_v33 = vld [vmem:[%s9383_s4 + $0x2b0] sm:$0xff]  ;;  %v5780_v54 = vld [vmem:[%s9383_s4 + $0x2e0] sm:$0xff] }
0x12e0   :  { %v6103_v49 = vadd.f32 %v6102_v47, %v6101_v37  ;;  %v6141_v14 = vadd.f32 %v6140_v48, %v6139_v40  ;;  %2741 = vmatprep.mubr.f32.mxu1 %v2598_v34  ;;  %2816 = vmatprep.mubr.f32.mxu0 %v2600_v35  ;;  %v7044_v34 = vpack.c.bf16 %v5776_v32, %v5773_v36  ;;  %v5772_v35 = vld [vmem:[%s9383_s4 + $0x2a0] sm:$0xff]  ;;  %v5775_v37 = vld [vmem:[%s9383_s4 + $0x2b8] sm:$0xff]  ;;  %v5778_v47 = vld [vmem:[%s9383_s4 + $0x2d0] sm:$0xff] }
0x12e1   :  { %2742 = vmatmul.mubr.f32.gmra.mrb[40].mxu1 %v2597_v41  ;;  %2817 = vmatmul.mubr.f32.gmra.mrb[28].mxu0 %v2599_v42  ;;  %v7046_v40 = vpack.c.bf16 %v5775_v37, %v5772_v35  ;;  %v5779_v41 = vld [vmem:[%s9383_s4 + $0x2d8] sm:$0xff]  ;;  %v5782_v42 = vld [vmem:[%s9383_s4 + $0x2f0] sm:$0xff]  ;;  %v5784_v37 = vld [vmem:[%s9361_s5 + $0x3] sm:$0x7] }
0x12e2   :  { %v2739_v29 = vadd.f32 %v6103_v49, %v8377_v45  ;;  %2995 = vmatprep.mubr.f32.mxu1 %v7370_v13  ;;  %v7048_v48 = vpack.c.bf16 %v5782_v42, %v5779_v41  ;;  %v5781_v49 = vld [vmem:[%s9383_s4 + $0x2e8] sm:$0xff]  ;;  %v8550_v42 = vrot.slane %v5784_v37, %v7657_v25 }
0x12e4   :  { %v2814_v51 = vadd.f32 %v6141_v14, %v2739_v29  ;;  %v7050_v14 = vpack.c.bf16 %v5781_v49, %v5778_v47  ;;  %v8553_v49 = vrot.slane %v5784_v37, %v7666_v28 }
0x12e6   :  { %v2822_v52 = vadd.f32 %v2814_v51, %v8043_v2  ;;  %v5743_v2 = vld [vmem:[%s9383_s4 + $0x1b8] sm:$0xff] }
0x12e7   :  { %v7024_v60 = vpack.c.bf16 %v5746_v16, %v5743_v2  ;;  %v5738_v16 = vld [vmem:[%s9383_s4 + $0x190] sm:$0xff] }
0x12e8   :  { %2826 = vadd.xlane.f32.xlu1 %v2822_v52  ;;  %v7052_v61 = vpack.c.bf16 %v5741_v21, %v5738_v16 }
0x12e9   :  { %7025 = vmatprep.subr.bf16.mxu1 %v7024_v60  ;;  %v5744_v60 = vld [vmem:[%s9383_s4 + $0x1c0] sm:$0xff] }
0x12ea   :  { %7027 = vmatpush1.bf16.msra.mxu1 %v7026_v4  ;;  %7053 = vmatprep.subr.bf16.mxu0 %v7052_v61 }
0x12eb   :  { %7029 = vmatprep.subr.bf16.mxu1 %v7028_v5  ;;  %7055 = vmatpush3.bf16.msra.mxu0 %v7052_v61 }
0x12ee   :  { %7031 = vmatpush1.bf16.msra.mxu1 %v7030_v8  ;;  %v5734_v8 = vld [vmem:[%s9370_s14] ss:$0 sm:$0xff] }
0x12ef   :  { %7033 = vmatprep.subr.bf16.mxu1 %v7032_v38 }
0x12f2   :  { %7035 = vmatpush1.bf16.msra.mxu1 %v7034_v15  ;;  %v5759_v15 = vld [vmem:[%s9383_s4 + $0x238] sm:$0xff] }
0x12f3   :  { %7037 = vmatprep.subr.bf16.mxu1 %v7036_v57  ;;  %v5765_v57 = vld [vmem:[%s9383_s4 + $0x268] sm:$0xff] }
0x12f4   :  { %v7068_v1 = vpack.c.bf16 %v5765_v57, %v5762_v18  ;;  %v5789_v18 = vld [vmem:[%s9362_s6 + $0xa0] sm:$0xff]  ;;  %v5790_v57 = vld [vmem:[%s9362_s6 + $0xa8] sm:$0xff] }
0x12f6   :  { %7039 = vmatpush1.bf16.msra.mxu1 %v7038_v43  ;;  %v5771_v43 = vld [vmem:[%s9383_s4 + $0x298] sm:$0xff] }
0x12f7   :  { %7041 = vmatprep.subr.bf16.mxu1 %v7040_v0  ;;  %v7072_v63 = vpack.c.bf16 %v5771_v43, %v5768_v23  ;;  %v5777_v0 = vld [vmem:[%s9383_s4 + $0x2c8] sm:$0xff]  ;;  %v5791_v23 = vld [vmem:[%s9362_s6 + $0xb0] sm:$0xff]  ;;  %v5792_v43 = vld [vmem:[%s9362_s6 + $0xb8] sm:$0xff] }
0x12f8   :  { %v7076_v27 = vpack.c.bf16 %v5777_v0, %v5774_v33 }
0x12fa   :  { %7043 = vmatpush1.bf16.msra.mxu1 %v7042_v30  ;;  %v5783_v30 = vld [vmem:[%s9383_s4 + $0x2f8] sm:$0xff] }
0x12fb   :  { %7045 = vmatprep.subr.bf16.mxu1 %v7044_v34  ;;  %v7080_v36 = vpack.c.bf16 %v5783_v30, %v5780_v54  ;;  %v5786_v54 = vld [vmem:[%s9362_s6 + $0x88] sm:$0xff] }
0x12fe   :  { %7047 = vmatpush1.bf16.msra.mxu1 %v7046_v40 }
0x12ff   :  { %7049 = vmatprep.subr.bf16.mxu1 %v7048_v48 }
0x1302   :  { %7051 = vmatpush1.bf16.msra.mxu1 %v7050_v14 }
0x1303   :  { %6573 = vmatprep.subr.mxu1 %v7370_v13 }
0x1375   :  { %v2827_v10 = vpop.xlane.xlu1 %2826 }
0x1376   :  { %v2830_v44 = vmul.f32 0.0078125, %v2827_v10 }
0x1378   :  { %v8418_v22 = vsub.f32 %v2822_v52, %v2830_v44  ;;  %v5735_v44 = vld [vmem:[%s9371_s15] ss:$0 sm:$0xff] }
0x137a   :  { %v2834_v59 = vmul.f32 %v8418_v22, %v8418_v22 }
0x137c   :  { %2836 = vadd.xlane.f32.xlu1 %v2834_v59 }
0x13b4   :  { %v6104_v29 = vpop.f32.mrb[40].mxu1  ;;  %v6142_v51 = vpop.f32.mrb[28].mxu0 }
0x13b5   :  { %v6105_v52 = vpop.f32.mrb[41].mxu1  ;;  %v6143_v53 = vpop.f32.mrb[29].mxu0 }
0x13b6   :  { %v6106_v55 = vadd.f32 %v6105_v52, %v6104_v29  ;;  %v6144_v56 = vadd.f32 %v6143_v53, %v6142_v51 }
0x13b8   :  { %v2744_v31 = vadd.f32 %v6106_v55, %v8377_v45  ;;  %v5747_v45 = vld [vmem:[%s9383_s4 + $0x1d8] sm:$0xff] }
0x13b9   :  { %v7056_v62 = vpack.c.bf16 %v5747_v45, %v5744_v60 }
0x13ba   :  { %v2819_v50 = vadd.f32 %v6144_v56, %v2744_v31  ;;  %v2927_v56 = vrot.slane %v5784_v37, %v7660_v26 }
0x13bb   :  { %7057 = vmatprep.subr.bf16.mxu0 %v7056_v62 }
0x13bc   :  { %v2823_v2 = vadd.f32 %v2819_v50, %v8370_v20  ;;  %v5750_v20 = vld [vmem:[%s9383_s4 + $0x1f0] sm:$0xff]  ;;  %7059 = vmatpush3.bf16.msra.mxu0 %v7056_v62 }
0x13bd   :  { %v7060_v3 = vpack.c.bf16 %v5753_v58, %v5750_v20 }
0x13be   :  { %2828 = vadd.xlane.f32.xlu0 %v2823_v2 }
0x13bf   :  { %7061 = vmatprep.subr.bf16.mxu0 %v7060_v3 }
0x13c0   :  { %7063 = vmatpush3.bf16.msra.mxu0 %v7060_v3 }
0x1409   :  { %v2837_v4 = vpop.xlane.xlu1 %2836 }
0x140a   :  { %v2840_v5 = vmul.f32 0.0078125, %v2837_v4 }
0x140c   :  { %v2842_v6 = vadd.f32 1e-05, %v2840_v5 }
0x140e   :  { %7326 = vrsqrt.f32 %v2842_v6 }
0x1418   :  { %v7327_v7 = vpop.eup %7326 }
0x1419   :  { %v2846_v10 = vmul.f32 %v7327_v7, %v8418_v22  ;;  %v5756_v22 = vld [vmem:[%s9383_s4 + $0x220] sm:$0xff] }
0x141a   :  { %v7064_v17 = vpack.c.bf16 %v5759_v15, %v5756_v22 }
0x141b   :  { %v2854_v59 = vmul.f32 %v5734_v8, %v2846_v10 }
0x141c   :  { %7065 = vmatprep.subr.bf16.mxu0 %v7064_v17 }
0x141d   :  { %v8510_v39 = vadd.f32 %v5735_v44, %v2854_v59  ;;  %7067 = vmatpush3.bf16.msra.mxu0 %v7064_v17 }
0x141e   :  { %7069 = vmatprep.subr.bf16.mxu0 %v7068_v1 }
0x141f   :  { %2996 = vmatmul.mubr.f32.vlgmr.msra.gmra.mrb[42].mxu1 %v8510_v39  ;;  %6570 = vmatprep.mubr.f32.mxu0 %v8510_v39 }
0x1420   :  { %3001 = vmatprep.mubr.f32.mxu1 %v7370_v13 }
0x1421   :  { %7071 = vmatpush3.bf16.msra.mxu0 %v7068_v1  ;;  %v8618_v1 = vpack.c.bf16 %v5790_v57, %v5789_v18 }
0x1422   :  { %7073 = vmatprep.subr.bf16.mxu0 %v7072_v63 }
0x1425   :  { %7075 = vmatpush3.bf16.msra.mxu0 %v7072_v63  ;;  %v8624_v63 = vpack.c.bf16 %v5792_v43, %v5791_v23 }
0x1426   :  { %7077 = vmatprep.subr.bf16.mxu0 %v7076_v27 }
0x1429   :  { %7079 = vmatpush3.bf16.msra.mxu0 %v7076_v27  ;;  %v5785_v27 = vld [vmem:[%s9362_s6 + $0x80] sm:$0xff] }
0x142a   :  { %7081 = vmatprep.subr.bf16.mxu0 %v7080_v36 }
0x142d   :  { %7083 = vmatpush3.bf16.msra.mxu0 %v7080_v36  ;;  %v8636_v36 = vpack.c.bf16 %v5786_v54, %v5785_v27 }
0x142e   :  { %6578 = vmatprep.subr.mxu0 %v7370_v13 }
0x144b   :  { %v2829_v46 = vpop.xlane.xlu0 %2828 }
0x144c   :  { %v2831_v38 = vmul.f32 0.0078125, %v2829_v46 }
0x144e   :  { %v2833_v11 = vsub.f32 %v2823_v2, %v2831_v38 }
0x1450   :  { %v2835_v12 = vmul.f32 %v2833_v11, %v2833_v11 }
0x1452   :  { %2838 = vadd.xlane.f32.xlu1 %v2835_v12 }
0x14df   :  { %v2839_v32 = vpop.xlane.xlu1 %2838 }
0x14e0   :  { %v2841_v34 = vmul.f32 0.0078125, %v2839_v32 }
0x14e2   :  { %v2843_v35 = vadd.f32 1e-05, %v2841_v34  ;;  %v5787_v34 = vld [vmem:[%s9362_s6 + $0x90] sm:$0xff] }
0x14e4   :  { %7328 = vrsqrt.f32 %v2843_v35  ;;  %v5788_v35 = vld [vmem:[%s9362_s6 + $0x98] sm:$0xff] }
0x14e5   :  { %v8646_v37 = vpack.c.bf16 %v5788_v35, %v5787_v34 }
0x14ee   :  { %v7329_v40 = vpop.eup %7328 }
0x14ef   :  { %v2847_v41 = vmul.f32 %v7329_v40, %v2833_v11 }
0x14f1   :  { %v2855_v47 = vmul.f32 %v5734_v8, %v2847_v41 }
0x14f2   :  { %v2997_v48 = vpop.f32.mrb[42].mxu1 }
0x14f3   :  { %v2999_v14 = vpop.f32.mrb[43].mxu1  ;;  %v8555_v29 = vadd.f32 %v5735_v44, %v2855_v47  ;;  %v8567_v52 = vadd.f32 %v2997_v48, %v8553_v49 }
0x14f4   :  { %v8558_v51 = vadd.f32 %v2999_v14, %v8550_v42 }
0x14f5   :  { %3002 = vmatmul.mubr.f32.gmra.mrb[44].mxu1 %v8555_v29  ;;  %6571 = vmatmul.mubr.f32.vlgmr.msra.gmra.mrb[30].mxu0 %v8555_v29 }
0x14f6   :  { %3263 = vrot.lane.b32.xlu1 %v8558_v51, %s7373_s29  ;;  %6574 = vmatpush3.xpose.msk.msra.mxu1 %vm391_vm2, %v8558_v51 }
0x14f7   :  { %6575 = vmatprep.mubr.msk.f32.mxu1 %vm7371_vm1, %v7370_v13  ;;  %6583 = vmatprep.subr.mxu1 %v7370_v13 }
0x14f8   :  { %6580 = vmatprep.mubr.msk.f32.mxu0 %vm7371_vm1, %v7370_v13 }
0x14f9   :  { %6576 = vmatmul.mubr.msk.f32.vlgmr.msra.gmra.mrb[46].mxu1 %vm391_vm2, %v8567_v52 }
0x14fa   :  { %3261 = vrot.lane.b32.xlu1 %v8567_v52, %s7373_s29  ;;  %6585 = vmatprep.mubr.msk.f32.mxu1 %vm7371_vm1, %v7370_v13 }
0x1568   :  { %v3264_v53 = vpop.permute.xlu1 %3263 }
0x1569   :  { %6584 = vmatpush3.xpose.msk.msra.mxu1 %vm391_vm2, %v3264_v53 }
0x156a   :  { %7084 = vmatprep.subr.bf16.mxu1 %v7375_v19 }
0x156c   :  { %v3262_v55 = vpop.permute.xlu1 %3261 }
0x156d   :  { %6586 = vmatmul.mubr.msk.f32.vlgmr.msra.gmra.mrb[48].mxu1 %vm391_vm2, %v3262_v55 }
0x156e   :  { %6601 = vmatprep.mubr.msk.f32.mxu1 %vm7371_vm1, %v7370_v13  ;;  %7086 = vmatpush3.bf16.msra.mxu1 %v8618_v1 }
0x156f   :  { %7087 = vmatprep.subr.bf16.mxu1 %v7375_v19 }
0x1572   :  { %7089 = vmatpush3.bf16.msra.mxu1 %v8624_v63 }
0x1573   :  { %6615 = vmatprep.subr.mxu1 %v7370_v13 }
0x15c8   :  { %v8586_v31 = vpop.f32.mrb[44].mxu1  ;;  %v6572_v50 = vpop.f32.mrb[30].mxu0 }
0x15c9   :  { %v8588_v2 = vadd.f32 %v6572_v50, %v2927_v56  ;;  %v8590_v16 = vpop.f32.mrb[45].mxu1  ;;  %v3074_v21 = vpop.f32.mrb[31].mxu0 }
0x15ca   :  { %v8592_v60 = vadd.f32 %v3074_v21, %v2927_v56 }
0x15cc   :  { %v3172_v61 = vpop.f32.mrb[46].mxu1  ;;  %6579 = vmatpush3.msra.mxu0 %v8592_v60 }
0x15cd   :  { %v3176_v45 = vmul.f32 0.17677669, %v3172_v61  ;;  %v6577_v62 = vpop.f32.mrb[47].mxu1  ;;  %6588 = vmatprep.subr.mxu0 %v7370_v13 }
0x15cf   :  { %v3177_v20 = vsel %vm469_vm3, %v3176_v45, -inf }
0x15d0   :  { %3178 = vmax.xlane.f32.xlu1 %v3177_v20 }
0x15e1   :  { %3576 = vrot.lane.b32.xlu1 %v8558_v51, %s7372_s28 }
0x1640   :  { %v3335_v58 = vpop.f32.mrb[48].mxu1 }
0x1641   :  { %v3339_v3 = vmul.f32 0.17677669, %v3335_v58  ;;  %v6587_v4 = vpop.f32.mrb[49].mxu1 }
0x1643   :  { %v3340_v5 = vsel %vm469_vm3, %v3339_v3, -inf }
0x1644   :  { %3341 = vmax.xlane.f32.xlu0 %v3340_v5 }
0x165d   :  { %v3179_v6 = vpop.xlane.xlu1 %3178 }
0x165e   :  { %v3180_v7 = vsub.f32 %v3176_v45, %v3179_v6 }
0x1660   :  { %v3181_v8 = vmul.f32 1.442695, %v3180_v7 }
0x1661   :  { %v3577_v48 = vpop.permute.xlu1 %3576 }
0x1662   :  { %7330 = vpow2.f32 %v3181_v8 }
0x166c   :  { %v7331_v10 = vpop.eup %7330 }
0x166d   :  { %v3183_v44 = vsel %vm469_vm3, %v7331_v10, 0.0 }
0x166e   :  { %3184 = vadd.xlane.f32.xlu0 %v3183_v44  ;;  %v5795_v44 = vld [vmem:[%s9362_s6 + $0xd0] sm:$0xff] }
0x16d1   :  { %v3342_v59 = vpop.xlane.xlu0 %3341 }
0x16d2   :  { %v3343_v46 = vsub.f32 %v3339_v3, %v3342_v59 }
0x16d4   :  { %v3344_v38 = vmul.f32 1.442695, %v3343_v46  ;;  %v5796_v46 = vld [vmem:[%s9362_s6 + $0xd8] sm:$0xff] }
0x16d6   :  { %7332 = vpow2.f32 %v3344_v38 }
0x16e0   :  { %v7333_v11 = vpop.eup %7332 }
0x16e1   :  { %v3346_v12 = vsel %vm469_vm3, %v7333_v11, 0.0 }
0x16e2   :  { %3347 = vadd.xlane.f32.xlu0 %v3346_v12 }
0x16f8   :  { %3352 = vrot.lane.b32.xlu0 %v8592_v60, %s7373_s29 }
0x16fb   :  { %v3185_v22 = vpop.xlane.xlu0 %3184 }
0x16fc   :  { %7334 = vrcp.f32 %v3185_v22  ;;  %3574 = vrot.lane.b32.xlu0 %v8567_v52, %s7372_s28 }
0x1706   :  { %v7335_v15 = vpop.eup %7334 }
0x1707   :  { %v3187_v17 = vmul.f32 %v7335_v15, %v7331_v10  ;;  %v5793_v10 = vld [vmem:[%s9362_s6 + $0xc0] sm:$0xff] }
0x1709   :  { %6581 = vmatmul.mubr.msk.f32.vlgmr.msra.gmra.mrb[32].mxu0 %vm469_vm3, %v3187_v17 }
0x170a   :  { %6590 = vmatprep.mubr.msk.f32.mxu0 %vm7371_vm1, %v7370_v13 }
0x176f   :  { %v3348_v33 = vpop.xlane.xlu0 %3347 }
0x1770   :  { %7336 = vrcp.f32 %v3348_v33 }
0x1773   :  { %v3353_v0 = vpop.permute.xlu0 %3352 }
0x1774   :  { %6589 = vmatpush3.msra.mxu0 %v3353_v0  ;;  %v8711_v0 = vadd.f32 %v8586_v31, %v8553_v49  ;;  %v5797_v49 = vld [vmem:[%s9362_s6 + $0xe0] sm:$0xff]  ;;  %v5798_v31 = vld [vmem:[%s9362_s6 + $0xe8] sm:$0xff] }
0x1775   :  { %7090 = vmatprep.subr.bf16.mxu0 %v7375_v19 }
0x1777   :  { %v3575_v53 = vpop.permute.xlu0 %3574 }
0x177a   :  { %v7337_v30 = vpop.eup %7336 }
0x177b   :  { %v3350_v32 = vmul.f32 %v7337_v30, %v7333_v11 }
0x177d   :  { %6591 = vmatmul.mubr.msk.f32.vlgmr.msra.gmra.mrb[34].mxu0 %vm469_vm3, %v3350_v32 }
0x177e   :  { %7092 = vmatpush3.bf16.msra.mxu0 %v8636_v36  ;;  %6612 = vmatprep.mubr.msk.f32.mxu0 %vm7371_vm1, %v7370_v13 }
0x177f   :  { %7093 = vmatprep.subr.bf16.mxu0 %v7375_v19 }
0x1782   :  { %7095 = vmatpush3.bf16.msra.mxu0 %v8646_v37 }
0x1783   :  { %6620 = vmatprep.subr.mxu0 %v7370_v13 }
0x17dc   :  { %v3257_v40 = vpop.f32.mrb[32].mxu0 }
0x17dd   :  { %v6582_v41 = vpop.f32.mrb[33].mxu0  ;;  %6613 = vmatmul.mubr.msk.f32.vlgmr.msra.gmra.mrb[36].mxu0 %vm391_vm2, %v3257_v40  ;;  %v5799_v40 = vld [vmem:[%s9362_s6 + $0xf0] sm:$0xff] }
0x17de   :  { %6622 = vmatprep.mubr.msk.f32.mxu0 %vm7371_vm1, %v7370_v13  ;;  %v8732_v41 = vpack.c.bf16 %v5798_v31, %v5797_v49 }
0x1850   :  { %v3424_v47 = vpop.f32.mrb[34].mxu0 }
0x1851   :  { %v6592_v14 = vpop.f32.mrb[35].mxu0  ;;  %6602 = vmatmul.mubr.msk.f32.vlgmr.msra.gmra.mrb[50].mxu1 %vm391_vm2, %v3424_v47 }
0x1852   :  { %6616 = vmatpush3.xpose.msk.msra.mxu1 %vm391_vm2, %v3577_v48  ;;  %6617 = vmatprep.mubr.msk.f32.mxu1 %vm7371_vm1, %v7370_v13 }
0x1853   :  { %7096 = vmatprep.subr.bf16.mxu1 %v7375_v19 }
0x1855   :  { %6618 = vmatmul.mubr.msk.f32.vlgmr.msra.gmra.mrb[52].mxu1 %vm391_vm2, %v3575_v53 }
0x1856   :  { %6633 = vmatprep.mubr.msk.f32.mxu1 %vm7371_vm1, %v7370_v13 }
0x18b0   :  { %v3570_v55 = vpop.f32.mrb[36].mxu0 }
0x18b1   :  { %v6614_v56 = vpop.f32.mrb[37].mxu0 }
0x1924   :  { %v3497_v50 = vpop.f32.mrb[50].mxu1 }
0x1925   :  { %v8664_v21 = vadd.f32 %v3570_v55, %v3497_v50  ;;  %v6603_v61 = vpop.f32.mrb[51].mxu1 }
0x1928   :  { %v3648_v45 = vpop.f32.mrb[52].mxu1 }
0x1929   :  { %v3652_v62 = vmul.f32 0.17677669, %v3648_v45  ;;  %v6619_v20 = vpop.f32.mrb[53].mxu1 }
0x192b   :  { %v3653_v58 = vsel %vm469_vm3, %v3652_v62, -inf }
0x192c   :  { %3654 = vmax.xlane.f32.xlu0 %v3653_v58 }
0x1942   :  { %3664 = vrot.lane.b32.xlu0 %v8592_v60, %s7372_s28 }
0x1946   :  { %3814 = vrot.lane.b32.xlu0 %v8567_v52, %s7374_s30  ;;  %v5794_v52 = vld [vmem:[%s9362_s6 + $0xc8] sm:$0xff] }
0x1947   :  { %v8684_v59 = vpack.c.bf16 %v5794_v52, %v5793_v10 }
0x1949   :  { %7098 = vmatpush3.bf16.msra.mxu1 %v8684_v59 }
0x194a   :  { %7099 = vmatprep.subr.bf16.mxu1 %v7375_v19 }
0x19b9   :  { %v3655_v3 = vpop.xlane.xlu0 %3654 }
0x19ba   :  { %v3656_v4 = vsub.f32 %v3652_v62, %v3655_v3 }
0x19bc   :  { %v3657_v5 = vmul.f32 1.442695, %v3656_v4 }
0x19bd   :  { %v3665_v6 = vpop.permute.xlu0 %3664 }
0x19be   :  { %7338 = vpow2.f32 %v3657_v5  ;;  %6621 = vmatpush3.msra.mxu0 %v3665_v6 }
0x19bf   :  { %6636 = vmatprep.subr.mxu0 %v7370_v13 }
0x19c1   :  { %v3815_v15 = vpop.permute.xlu0 %3814 }
0x19c8   :  { %v7339_v7 = vpop.eup %7338 }
0x19c9   :  { %v3659_v8 = vsel %vm469_vm3, %v7339_v7, 0.0 }
0x19ca   :  { %3660 = vadd.xlane.f32.xlu1 %v3659_v8 }
0x19db   :  { %3816 = vrot.lane.b32.xlu1 %v8558_v51, %s7374_s30  ;;  %v8690_v51 = vpack.c.bf16 %v5796_v46, %v5795_v44 }
0x19dd   :  { %7101 = vmatpush3.bf16.msra.mxu1 %v8690_v51 }
0x19de   :  { %7102 = vmatprep.subr.bf16.mxu1 %v7375_v19 }
0x1a57   :  { %v3661_v38 = vpop.xlane.xlu1 %3660 }
0x1a58   :  { %7340 = vrcp.f32 %v3661_v38 }
0x1a5b   :  { %v3817_v22 = vpop.permute.xlu1 %3816 }
0x1a62   :  { %v7341_v11 = vpop.eup %7340 }
0x1a63   :  { %v3663_v12 = vmul.f32 %v7341_v11, %v7339_v7 }
0x1a65   :  { %6623 = vmatmul.mubr.msk.f32.vlgmr.msra.gmra.mrb[38].mxu0 %vm469_vm3, %v3663_v12 }
0x1a66   :  { %6637 = vmatpush3.xpose.msk.msra.mxu0 %vm391_vm2, %v3817_v22  ;;  %6638 = vmatprep.mubr.msk.f32.mxu0 %vm7371_vm1, %v7370_v13 }
0x1a67   :  { %6641 = vmatprep.subr.mxu0 %v7370_v13 }
0x1a69   :  { %6639 = vmatmul.mubr.msk.f32.vlgmr.msra.gmra.mrb[40].mxu0 %vm391_vm2, %v3815_v15 }
0x1a6a   :  { %6643 = vmatprep.mubr.msk.f32.mxu0 %vm7371_vm1, %v7370_v13 }
0x1b38   :  { %v3736_v17 = vpop.f32.mrb[38].mxu0 }
0x1b39   :  { %v6624_v18 = vpop.f32.mrb[39].mxu0  ;;  %6634 = vmatmul.mubr.msk.f32.vlgmr.msra.gmra.mrb[54].mxu1 %vm391_vm2, %v3736_v17 }
0x1b3a   :  { %6654 = vmatprep.mubr.msk.f32.mxu1 %vm7371_vm1, %v7370_v13  ;;  %7104 = vmatpush3.bf16.msra.mxu1 %v8732_v41 }
0x1b3b   :  { %7105 = vmatprep.subr.bf16.mxu1 %v7375_v19 }
0x1b3c   :  { %v3888_v57 = vpop.f32.mrb[40].mxu0 }
0x1b3d   :  { %v3892_v23 = vmul.f32 0.17677669, %v3888_v57  ;;  %v6640_v43 = vpop.f32.mrb[41].mxu0 }
0x1b3f   :  { %v3893_v33 = vsel %vm469_vm3, %v3892_v23, -inf }
0x1b40   :  { %3894 = vmax.xlane.f32.xlu0 %v3893_v33 }
0x1b56   :  { %3904 = vrot.lane.b32.xlu0 %v8592_v60, %s7374_s30  ;;  %v8719_v60 = vadd.f32 %v8590_v16, %v8550_v42  ;;  %v5800_v42 = vld [vmem:[%s9362_s6 + $0xf8] sm:$0xff] }
0x1b57   :  { %v8738_v16 = vpack.c.bf16 %v5800_v42, %v5799_v40 }
0x1b59   :  { %7107 = vmatpush3.bf16.msra.mxu1 %v8738_v16 }
0x1b5a   :  { %4215 = vrot.lane.b32.xlu0 %v8711_v0, %s7373_s29  ;;  %6667 = vmatprep.subr.mxu1 %v7370_v13 }
0x1bcd   :  { %v3895_v27 = vpop.xlane.xlu0 %3894 }
0x1bce   :  { %v3896_v54 = vsub.f32 %v3892_v23, %v3895_v27 }
0x1bd0   :  { %v3897_v30 = vmul.f32 1.442695, %v3896_v54 }
0x1bd1   :  { %v3905_v32 = vpop.permute.xlu0 %3904 }
0x1bd2   :  { %7342 = vpow2.f32 %v3897_v30  ;;  %6642 = vmatpush3.msra.mxu0 %v3905_v32 }
0x1bd3   :  { %6657 = vmatprep.subr.mxu0 %v7370_v13 }
0x1bd5   :  { %v4216_v45 = vpop.permute.xlu0 %4215 }
0x1bdc   :  { %v7343_v34 = vpop.eup %7342 }
0x1bdd   :  { %v3899_v35 = vsel %vm469_vm3, %v7343_v34, 0.0 }
0x1bde   :  { %3900 = vadd.xlane.f32.xlu1 %v3899_v35 }
0x1bef   :  { %4217 = vrot.lane.b32.xlu1 %v8719_v60, %s7373_s29 }
0x1c0c   :  { %v3809_v47 = vpop.f32.mrb[54].mxu1 }
0x1c0d   :  { %v3813_v48 = vadd.f32 %v3809_v47, %v8664_v21  ;;  %v6635_v14 = vpop.f32.mrb[55].mxu1 }
0x1c6b   :  { %v3901_v53 = vpop.xlane.xlu1 %3900 }
0x1c6c   :  { %7344 = vrcp.f32 %v3901_v53 }
0x1c6f   :  { %v4218_v21 = vpop.permute.xlu1 %4217 }
0x1c76   :  { %v7345_v55 = vpop.eup %7344 }
0x1c77   :  { %v3903_v56 = vmul.f32 %v7345_v55, %v7343_v34 }
0x1c79   :  { %6644 = vmatmul.mubr.msk.f32.vlgmr.msra.gmra.mrb[42].mxu0 %vm469_vm3, %v3903_v56 }
0x1c7a   :  { %6658 = vmatpush3.xpose.msk.msra.mxu0 %vm391_vm2, %v8719_v60  ;;  %6659 = vmatprep.mubr.msk.f32.mxu0 %vm7371_vm1, %v7370_v13 }
0x1c7b   :  { %6662 = vmatprep.subr.mxu0 %v7370_v13 }
0x1c7d   :  { %6660 = vmatmul.mubr.msk.f32.vlgmr.msra.gmra.mrb[44].mxu0 %vm391_vm2, %v8711_v0 }
0x1c7e   :  { %6663 = vmatpush3.msra.mxu0 %v8588_v2  ;;  %6664 = vmatprep.mubr.msk.f32.mxu0 %vm7371_vm1, %v7370_v13 }
0x1c7f   :  { %6672 = vmatprep.subr.mxu0 %v7370_v13 }
0x1d4c   :  { %v3976_v50 = vpop.f32.mrb[42].mxu0 }
0x1d4d   :  { %v6645_v61 = vpop.f32.mrb[43].mxu0  ;;  %6655 = vmatmul.mubr.msk.f32.vlgmr.msra.gmra.mrb[56].mxu1 %vm391_vm2, %v3976_v50 }
0x1d4e   :  { %6668 = vmatpush3.xpose.msk.msra.mxu1 %vm391_vm2, %v4218_v21  ;;  %6669 = vmatprep.mubr.msk.f32.mxu1 %vm7371_vm1, %v7370_v13 }
0x1d4f   :  { %7108 = vmatprep.subr.bf16.mxu1 %v7375_v19 }
0x1d50   :  { %v4126_v62 = vpop.f32.mrb[44].mxu0 }
0x1d51   :  { %v4130_v20 = vmul.f32 0.17677669, %v4126_v62  ;;  %v6661_v58 = vpop.f32.mrb[45].mxu0  ;;  %6670 = vmatmul.mubr.msk.f32.vlgmr.msra.gmra.mrb[58].mxu1 %vm391_vm2, %v4216_v45 }
0x1d52   :  { %7110 = vmatpush3.bf16.msra.mxu1 %v8618_v1  ;;  %6685 = vmatprep.mubr.msk.f32.mxu1 %vm7371_vm1, %v7370_v13 }
0x1d53   :  { %v4131_v3 = vsel %vm469_vm3, %v4130_v20, -inf  ;;  %7111 = vmatprep.subr.bf16.mxu1 %v7375_v19 }
0x1d54   :  { %4132 = vmax.xlane.f32.xlu0 %v4131_v3 }
0x1d56   :  { %7113 = vmatpush3.bf16.msra.mxu1 %v8624_v63 }
0x1d57   :  { %6699 = vmatprep.subr.mxu1 %v7370_v13 }
0x1de1   :  { %v4133_v4 = vpop.xlane.xlu0 %4132 }
0x1de2   :  { %v4134_v5 = vsub.f32 %v4130_v20, %v4133_v4  ;;  %v8830_v4 = vld [vmem:[%s9363_s7 + $0x1] ss:$0 sm:$0xff] }
0x1de4   :  { %v4135_v6 = vmul.f32 1.442695, %v4134_v5 }
0x1de6   :  { %7346 = vpow2.f32 %v4135_v6 }
0x1df0   :  { %v7347_v7 = vpop.eup %7346 }
0x1df1   :  { %v4137_v8 = vsel %vm469_vm3, %v7347_v7, 0.0 }
0x1df2   :  { %4138 = vadd.xlane.f32.xlu0 %v4137_v8 }
0x1e20   :  { %v4049_v1 = vpop.f32.mrb[56].mxu1 }
0x1e21   :  { %v8770_v10 = vadd.f32 %v4049_v1, %v3813_v48  ;;  %v6656_v52 = vpop.f32.mrb[57].mxu1 }
0x1e23   :  { %v5016_v8 = vadd.f32 %v8830_v4, %v8770_v10 }
0x1e24   :  { %v4289_v44 = vpop.f32.mrb[58].mxu1 }
0x1e25   :  { %v4293_v46 = vmul.f32 0.17677669, %v4289_v44  ;;  %v6671_v38 = vpop.f32.mrb[59].mxu1  ;;  %v8838_v1 = vadd.f32 %v5016_v8, %v8510_v39 }
0x1e27   :  { %v4294_v11 = vsel %vm469_vm3, %v4293_v46, -inf }
0x1e28   :  { %4295 = vmax.xlane.f32.xlu1 %v4294_v11 }
0x1e39   :  { %4530 = vrot.lane.b32.xlu1 %v8719_v60, %s7372_s28 }
0x1e3d   :  { %4528 = vrot.lane.b32.xlu1 %v8711_v0, %s7372_s28 }
0x1e7f   :  { %v4139_v63 = vpop.xlane.xlu0 %4138 }
0x1e80   :  { %7348 = vrcp.f32 %v4139_v63 }
0x1e8a   :  { %v7349_v12 = vpop.eup %7348 }
0x1e8b   :  { %v4141_v22 = vmul.f32 %v7349_v12, %v7347_v7 }
0x1e8d   :  { %6665 = vmatmul.mubr.msk.f32.vlgmr.msra.gmra.mrb[46].mxu0 %vm469_vm3, %v4141_v22 }
0x1e8e   :  { %6674 = vmatprep.mubr.msk.f32.mxu0 %vm7371_vm1, %v7370_v13 }
0x1eb5   :  { %v4296_v15 = vpop.xlane.xlu1 %4295 }
0x1eb6   :  { %v4297_v17 = vsub.f32 %v4293_v46, %v4296_v15 }
0x1eb8   :  { %v4298_v18 = vmul.f32 1.442695, %v4297_v17 }
0x1eb9   :  { %v4531_v34 = vpop.permute.xlu1 %4530 }
0x1eba   :  { %7350 = vpow2.f32 %v4298_v18 }
0x1ec4   :  { %v7351_v57 = vpop.eup %7350 }
0x1ec5   :  { %v4300_v23 = vsel %vm469_vm3, %v7351_v57, 0.0 }
0x1ec6   :  { %4301 = vadd.xlane.f32.xlu0 %v4300_v23  ;;  %v5842_v23 = vld [vmem:[%s9364_s10 + $0x218] sm:$0xff] }
0x1edc   :  { %4306 = vrot.lane.b32.xlu0 %v8588_v2, %s7373_s29 }
0x1f53   :  { %v4302_v43 = vpop.xlane.xlu0 %4301 }
0x1f54   :  { %7352 = vrcp.f32 %v4302_v43 }
0x1f57   :  { %v4307_v33 = vpop.permute.xlu0 %4306 }
0x1f58   :  { %6673 = vmatpush3.msra.mxu0 %v4307_v33  ;;  %v5846_v33 = vld [vmem:[%s9364_s10 + $0x238] sm:$0xff] }
0x1f59   :  { %7114 = vmatprep.subr.bf16.mxu0 %v7375_v19 }
0x1f5e   :  { %v7353_v27 = vpop.eup %7352 }
0x1f5f   :  { %v4304_v54 = vmul.f32 %v7353_v27, %v7351_v57  ;;  %v5844_v57 = vld [vmem:[%s9364_s10 + $0x228] sm:$0xff]  ;;  %v5839_v27 = vld [vmem:[%s9364_s10 + $0x200] sm:$0xff] }
0x1f60   :  { %v4211_v30 = vpop.f32.mrb[46].mxu0 }
0x1f61   :  { %v6666_v32 = vpop.f32.mrb[47].mxu0  ;;  %6675 = vmatmul.mubr.msk.f32.vlgmr.msra.gmra.mrb[48].mxu0 %vm469_vm3, %v4304_v54  ;;  %v5843_v54 = vld [vmem:[%s9364_s10 + $0x220] sm:$0xff] }
0x1f62   :  { %7116 = vmatpush3.bf16.msra.mxu0 %v8636_v36  ;;  %6696 = vmatprep.mubr.msk.f32.mxu0 %vm7371_vm1, %v7370_v13  ;;  %v4529_v36 = vpop.permute.xlu1 %4528  ;;  %v7134_v32 = vpack.c.bf16 %v5843_v54, %v5839_v27  ;;  %v5871_v27 = vld [vmem:[%s9364_s10 + $0x300] sm:$0xff] }
0x1f63   :  { %7117 = vmatprep.subr.bf16.mxu0 %v7375_v19  ;;  %v5875_v54 = vld [vmem:[%s9364_s10 + $0x320] sm:$0xff] }
0x1f66   :  { %7119 = vmatpush3.bf16.msra.mxu0 %v8646_v37 }
0x1f67   :  { %6704 = vmatprep.subr.mxu0 %v7370_v13 }
0x1f69   :  { %6697 = vmatmul.mubr.msk.f32.vlgmr.msra.gmra.mrb[50].mxu0 %vm391_vm2, %v4211_v30  ;;  %v7164_v30 = vpack.c.bf16 %v5846_v33, %v5842_v23  ;;  %v5874_v23 = vld [vmem:[%s9364_s10 + $0x318] sm:$0xff] }
0x1f6a   :  { %6706 = vmatprep.mubr.msk.f32.mxu0 %vm7371_vm1, %v7370_v13  ;;  %v5878_v33 = vld [vmem:[%s9364_s10 + $0x338] sm:$0xff] }
0x2034   :  { %v4378_v35 = vpop.f32.mrb[48].mxu0 }
0x2035   :  { %v6676_v49 = vpop.f32.mrb[49].mxu0  ;;  %6686 = vmatmul.mubr.msk.f32.vlgmr.msra.gmra.mrb[60].mxu1 %vm391_vm2, %v4378_v35  ;;  %v5845_v35 = vld [vmem:[%s9364_s10 + $0x230] sm:$0xff] }
0x2036   :  { %6700 = vmatpush3.xpose.msk.msra.mxu1 %vm391_vm2, %v4531_v34  ;;  %6701 = vmatprep.mubr.msk.f32.mxu1 %vm7371_vm1, %v7370_v13  ;;  %v5841_v34 = vld [vmem:[%s9364_s10 + $0x210] sm:$0xff]  ;;  %v5848_v49 = vld [vmem:[%s9364_s10 + $0x248] sm:$0xff] }
0x2037   :  { %7120 = vmatprep.subr.bf16.mxu1 %v7375_v19 }
0x2039   :  { %6702 = vmatmul.mubr.msk.f32.vlgmr.msra.gmra.mrb[62].mxu1 %vm391_vm2, %v4529_v36  ;;  %v7166_v36 = vpack.c.bf16 %v5845_v35, %v5841_v34  ;;  %v5873_v34 = vld [vmem:[%s9364_s10 + $0x310] sm:$0xff] }
0x203a   :  { %7122 = vmatpush3.bf16.msra.mxu1 %v8684_v59  ;;  %6717 = vmatprep.mubr.msk.f32.mxu1 %vm7371_vm1, %v7370_v13  ;;  %v5877_v35 = vld [vmem:[%s9364_s10 + $0x330] sm:$0xff] }
0x203b   :  { %7123 = vmatprep.subr.bf16.mxu1 %v7375_v19 }
0x203c   :  { %v4524_v37 = vpop.f32.mrb[50].mxu0 }
0x203d   :  { %v6698_v31 = vpop.f32.mrb[51].mxu0 }
0x203e   :  { %7125 = vmatpush3.bf16.msra.mxu1 %v8690_v51  ;;  %v5850_v31 = vld [vmem:[%s9364_s10 + $0x258] sm:$0xff] }
0x203f   :  { %7126 = vmatprep.subr.bf16.mxu1 %v7375_v19 }
0x2108   :  { %v4451_v40 = vpop.f32.mrb[60].mxu1 }
0x2109   :  { %v4525_v42 = vadd.f32 %v4524_v37, %v4451_v40  ;;  %v6687_v47 = vpop.f32.mrb[61].mxu1  ;;  %v5852_v37 = vld [vmem:[%s9364_s10 + $0x268] sm:$0xff]  ;;  %v5854_v40 = vld [vmem:[%s9364_s10 + $0x278] sm:$0xff] }
0x210a   :  { %v7168_v47 = vpack.c.bf16 %v5854_v40, %v5850_v31  ;;  %v5882_v31 = vld [vmem:[%s9364_s10 + $0x358] sm:$0xff] }
0x210b   :  { %v5886_v40 = vld [vmem:[%s9364_s10 + $0x378] sm:$0xff] }
0x210c   :  { %v4602_v48 = vpop.f32.mrb[62].mxu1 }
0x210d   :  { %v4606_v14 = vmul.f32 0.17677669, %v4602_v48  ;;  %v6703_v53 = vpop.f32.mrb[63].mxu1  ;;  %v5847_v48 = vld [vmem:[%s9364_s10 + $0x240] sm:$0xff] }
0x210e   :  { %v5849_v53 = vld [vmem:[%s9364_s10 + $0x250] sm:$0xff] }
0x210f   :  { %v4607_v55 = vsel %vm469_vm3, %v4606_v14, -inf }
0x2110   :  { %4608 = vmax.xlane.f32.xlu0 %v4607_v55 }
0x2126   :  { %4618 = vrot.lane.b32.xlu0 %v8588_v2, %s7372_s28 }
0x212a   :  { %4768 = vrot.lane.b32.xlu0 %v8711_v0, %s7374_s30 }
0x219d   :  { %v4609_v59 = vpop.xlane.xlu0 %4608 }
0x219e   :  { %v4610_v56 = vsub.f32 %v4606_v14, %v4609_v59  ;;  %v5851_v14 = vld [vmem:[%s9364_s10 + $0x260] sm:$0xff]  ;;  %v5853_v59 = vld [vmem:[%s9364_s10 + $0x270] sm:$0xff] }
0x219f   :  { %v7138_v55 = vpack.c.bf16 %v5851_v14, %v5847_v48  ;;  %v5879_v48 = vld [vmem:[%s9364_s10 + $0x340] sm:$0xff] }
0x21a0   :  { %v4611_v51 = vmul.f32 1.442695, %v4610_v56  ;;  %v7170_v56 = vpack.c.bf16 %v5853_v59, %v5849_v53  ;;  %v5883_v14 = vld [vmem:[%s9364_s10 + $0x360] sm:$0xff]  ;;  %v5881_v53 = vld [vmem:[%s9364_s10 + $0x350] sm:$0xff] }
0x21a1   :  { %v4619_v50 = vpop.permute.xlu0 %4618  ;;  %v5885_v59 = vld [vmem:[%s9364_s10 + $0x370] sm:$0xff] }
0x21a2   :  { %7354 = vpow2.f32 %v4611_v51  ;;  %6705 = vmatpush3.msra.mxu0 %v4619_v50 }
0x21a3   :  { %6720 = vmatprep.subr.mxu0 %v7370_v13 }
0x21a5   :  { %v4769_v58 = vpop.permute.xlu0 %4768 }
0x21ac   :  { %v7355_v21 = vpop.eup %7354 }
0x21ad   :  { %v4613_v61 = vsel %vm469_vm3, %v7355_v21, 0.0 }
0x21ae   :  { %4614 = vadd.xlane.f32.xlu1 %v4613_v61 }
0x21bf   :  { %4770 = vrot.lane.b32.xlu1 %v8719_v60, %s7374_s30 }
0x223b   :  { %v4615_v45 = vpop.xlane.xlu1 %4614 }
0x223c   :  { %7356 = vrcp.f32 %v4615_v45 }
0x223f   :  { %v4771_v0 = vpop.permute.xlu1 %4770 }
0x2246   :  { %v7357_v62 = vpop.eup %7356 }
0x2247   :  { %v4617_v20 = vmul.f32 %v7357_v62, %v7355_v21 }
0x2249   :  { %6707 = vmatmul.mubr.msk.f32.vlgmr.msra.gmra.mrb[52].mxu0 %vm469_vm3, %v4617_v20 }
0x224a   :  { %6721 = vmatpush3.xpose.msk.msra.mxu0 %vm391_vm2, %v4771_v0  ;;  %6722 = vmatprep.mubr.msk.f32.mxu0 %vm7371_vm1, %v7370_v13 }
0x224b   :  { %6725 = vmatprep.subr.mxu0 %v7370_v13 }
0x224d   :  { %6723 = vmatmul.mubr.msk.f32.vlgmr.msra.gmra.mrb[54].mxu0 %vm391_vm2, %v4769_v58 }
0x224e   :  { %6727 = vmatprep.mubr.msk.f32.mxu0 %vm7371_vm1, %v7370_v13 }
0x231c   :  { %v4690_v60 = vpop.f32.mrb[52].mxu0 }
0x231d   :  { %v6708_v3 = vpop.f32.mrb[53].mxu0  ;;  %6718 = vmatmul.mubr.msk.f32.vlgmr.msra.gmra.mrb[64].mxu1 %vm391_vm2, %v4690_v60  ;;  %v5856_v60 = vld [vmem:[%s9364_s10 + $0x288] sm:$0xff] }
0x231e   :  { %7128 = vmatpush3.bf16.msra.mxu1 %v8732_v41  ;;  %6738 = vmatprep.mubr.msk.f32.mxu1 %vm7371_vm1, %v7370_v13  ;;  %v5860_v3 = vld [vmem:[%s9364_s10 + $0x2a8] sm:$0xff] }
0x231f   :  { %7129 = vmatprep.subr.bf16.mxu1 %v7375_v19 }
0x2320   :  { %v4842_v5 = vpop.f32.mrb[54].mxu0 }
0x2321   :  { %v4846_v6 = vmul.f32 0.17677669, %v4842_v5  ;;  %v6724_v7 = vpop.f32.mrb[55].mxu0  ;;  %v5862_v5 = vld [vmem:[%s9364_s10 + $0x2b8] sm:$0xff] }
0x2322   :  { %7131 = vmatpush3.bf16.msra.mxu1 %v8738_v16  ;;  %v5859_v7 = vld [vmem:[%s9364_s10 + $0x2a0] sm:$0xff] }
0x2323   :  { %v4847_v41 = vsel %vm469_vm3, %v4846_v6, -inf  ;;  %7165 = vmatprep.subr.bf16.mxu1 %v7164_v30  ;;  %v7180_v30 = vpack.c.bf16 %v5878_v33, %v5874_v23 }
0x2324   :  { %4848 = vmax.xlane.f32.xlu1 %v4847_v41 }
0x2328   :  { %5024 = vadd.xlane.f32.xlu1 %v8838_v1 }
0x23b1   :  { %v4849_v52 = vpop.xlane.xlu1 %4848 }
0x23b2   :  { %v4850_v44 = vsub.f32 %v4846_v6, %v4849_v52  ;;  %v5855_v6 = vld [vmem:[%s9364_s10 + $0x280] sm:$0xff]  ;;  %v5861_v52 = vld [vmem:[%s9364_s10 + $0x2b0] sm:$0xff] }
0x23b3   :  { %v7142_v41 = vpack.c.bf16 %v5859_v7, %v5855_v6  ;;  %v5900_v6 = vld [vmem:[%s9364_s10 + $0x3e8] sm:$0xff]  ;;  %v5898_v7 = vld [vmem:[%s9364_s10 + $0x3d8] sm:$0xff] }
0x23b4   :  { %v4851_v46 = vmul.f32 1.442695, %v4850_v44 }
0x23b5   :  { %v5025_v51 = vpop.xlane.xlu1 %5024 }
0x23b6   :  { %7358 = vpow2.f32 %v4851_v46  ;;  %v5028_v21 = vmul.f32 0.0078125, %v5025_v51  ;;  %v5864_v46 = vld [vmem:[%s9364_s10 + $0x2c8] sm:$0xff] }
0x23b7   :  { %v5892_v51 = vld [vmem:[%s9364_s10 + $0x3a8] sm:$0xff] }
0x23b8   :  { %v8898_v20 = vsub.f32 %v8838_v1, %v5028_v21  ;;  %v5857_v1 = vld [vmem:[%s9364_s10 + $0x290] sm:$0xff] }
0x23b9   :  { %v7174_v44 = vpack.c.bf16 %v5861_v52, %v5857_v1  ;;  %v5902_v1 = vld [vmem:[%s9364_s10 + $0x3f8] sm:$0xff]  ;;  %v5895_v52 = vld [vmem:[%s9364_s10 + $0x3c0] sm:$0xff] }
0x23ba   :  { %v5032_v58 = vmul.f32 %v8898_v20, %v8898_v20 }
0x23c0   :  { %v7359_v38 = vpop.eup %7358 }
0x23c1   :  { %v4853_v11 = vsel %vm469_vm3, %v7359_v38, 0.0 }
0x23c2   :  { %4854 = vadd.xlane.f32.xlu0 %v4853_v11  ;;  %v5866_v11 = vld [vmem:[%s9364_s10 + $0x2d8] sm:$0xff] }
0x23d8   :  { %4858 = vrot.lane.b32.xlu0 %v8588_v2, %s7374_s30  ;;  %v5840_v2 = vld [vmem:[%s9364_s10 + $0x208] sm:$0xff] }
0x23d9   :  { %v7132_v43 = vpack.c.bf16 %v5844_v57, %v5840_v2  ;;  %v5872_v2 = vld [vmem:[%s9364_s10 + $0x308] sm:$0xff] }
0x23da   :  { %v5876_v57 = vld [vmem:[%s9364_s10 + $0x328] sm:$0xff] }
0x23f0   :  { %v4763_v16 = vpop.f32.mrb[64].mxu1 }
0x23f1   :  { %v4767_v10 = vadd.f32 %v4763_v16, %v4525_v42  ;;  %v6719_v63 = vpop.f32.mrb[65].mxu1  ;;  %v7136_v42 = vpack.c.bf16 %v5852_v37, %v5848_v49  ;;  %v5880_v49 = vld [vmem:[%s9364_s10 + $0x348] sm:$0xff] }
0x23f2   :  { %v5863_v63 = vld [vmem:[%s9364_s10 + $0x2c0] sm:$0xff]  ;;  %v5884_v37 = vld [vmem:[%s9364_s10 + $0x368] sm:$0xff] }
0x244f   :  { %v4855_v12 = vpop.xlane.xlu0 %4854 }
0x2450   :  { %7360 = vrcp.f32 %v4855_v12  ;;  %v5867_v12 = vld [vmem:[%s9364_s10 + $0x2e0] sm:$0xff] }
0x2453   :  { %v4859_v39 = vpop.permute.xlu0 %4858 }
0x2454   :  { %6726 = vmatpush3.msra.mxu0 %v4859_v39 }
0x2455   :  { %7133 = vmatprep.subr.bf16.mxu0 %v7132_v43  ;;  %v7148_v43 = vpack.c.bf16 %v5876_v57, %v5872_v2  ;;  %v9058_v57 = vld [vmem:[%s9365_s8 + $0x1] ss:$0 sm:$0xff] }
0x245a   :  { %v7361_v22 = vpop.eup %7360 }
0x245b   :  { %v4857_v15 = vmul.f32 %v7361_v22, %v7359_v38  ;;  %v5868_v38 = vld [vmem:[%s9364_s10 + $0x2e8] sm:$0xff]  ;;  %v7146_v22 = vpack.c.bf16 %v5867_v12, %v5863_v63 }
0x245c   :  { %v7144_v16 = vpack.c.bf16 %v5868_v38, %v5864_v46  ;;  %v7192_v46 = vpack.c.bf16 %v5902_v1, %v5898_v7  ;;  %v5897_v38 = vld [vmem:[%s9364_s10 + $0x3d0] sm:$0xff]  ;;  %v5941_v7 = vld [vmem:[%s9367_s12 + $0x328] sm:$0xff]  ;;  %v5927_v1 = vld [vmem:[%s9367_s12 + $0x2b8] sm:$0xff] }
0x245d   :  { %6728 = vmatmul.mubr.msk.f32.vlgmr.msra.gmra.mrb[56].mxu0 %vm469_vm3, %v4857_v15  ;;  %v5865_v15 = vld [vmem:[%s9364_s10 + $0x2d0] sm:$0xff] }
0x245e   :  { %5214 = vmatprep.mubr.f32.mxu0 %v7370_v13  ;;  %7135 = vmatpush1.bf16.msra.mxu0 %v7134_v32  ;;  %v7150_v32 = vpack.c.bf16 %v5875_v54, %v5871_v27  ;;  %v5921_v27 = vld [vmem:[%s9367_s12 + $0x288] sm:$0xff]  ;;  %v5952_v54 = vld [vmem:[%s9367_s12 + $0x380] sm:$0xff] }
0x245f   :  { %7137 = vmatprep.subr.bf16.mxu0 %v7136_v42  ;;  %v7152_v42 = vpack.c.bf16 %v5884_v37, %v5880_v49  ;;  %v5936_v37 = vld [vmem:[%s9367_s12 + $0x300] sm:$0xff] }
0x2462   :  { %7139 = vmatpush1.bf16.msra.mxu0 %v7138_v55  ;;  %v7154_v55 = vpack.c.bf16 %v5883_v14, %v5879_v48  ;;  %v5954_v48 = vld [vmem:[%s9367_s12 + $0x390] sm:$0xff]  ;;  %v5955_v14 = vld [vmem:[%s9367_s12 + $0x398] sm:$0xff] }
0x2530   :  { %v4930_v17 = vpop.f32.mrb[56].mxu0 }
0x2531   :  { %v6729_v18 = vpop.f32.mrb[57].mxu0  ;;  %6739 = vmatmul.mubr.msk.f32.vlgmr.msra.gmra.mrb[66].mxu1 %vm391_vm2, %v4930_v17  ;;  %v5869_v17 = vld [vmem:[%s9364_s10 + $0x2f0] sm:$0xff] }
0x2532   :  { %5291 = vmatprep.mubr.f32.mxu1 %v7370_v13  ;;  %7167 = vmatpush1.bf16.msra.mxu1 %v7166_v36  ;;  %v7178_v18 = vpack.c.bf16 %v5869_v17, %v5865_v15  ;;  %v7182_v36 = vpack.c.bf16 %v5877_v35, %v5873_v34  ;;  %v5904_v34 = vld [vmem:[%s9367_s12 + $0x200] sm:$0xff]  ;;  %v5905_v35 = vld [vmem:[%s9367_s12 + $0x208] sm:$0xff] }
0x2533   :  { %7169 = vmatprep.subr.bf16.mxu1 %v7168_v47  ;;  %v7184_v47 = vpack.c.bf16 %v5886_v40, %v5882_v31  ;;  %v5937_v31 = vld [vmem:[%s9367_s12 + $0x308] sm:$0xff]  ;;  %v5922_v40 = vld [vmem:[%s9367_s12 + $0x290] sm:$0xff] }
0x2536   :  { %7171 = vmatpush1.bf16.msra.mxu1 %v7170_v56  ;;  %v5888_v56 = vld [vmem:[%s9364_s10 + $0x388] sm:$0xff] }
0x2537   :  { %v7156_v21 = vpack.c.bf16 %v5892_v51, %v5888_v56  ;;  %v5907_v56 = vld [vmem:[%s9367_s12 + $0x218] sm:$0xff]  ;;  %v5938_v51 = vld [vmem:[%s9367_s12 + $0x310] sm:$0xff] }
0x2604   :  { %v5003_v50 = vpop.f32.mrb[66].mxu1 }
0x2605   :  { %v5007_v61 = vadd.f32 %v5003_v50, %v4767_v10  ;;  %v6740_v45 = vpop.f32.mrb[67].mxu1  ;;  %v5870_v10 = vld [vmem:[%s9364_s10 + $0x2f8] sm:$0xff]  ;;  %v7186_v50 = vpack.c.bf16 %v5885_v59, %v5881_v53  ;;  %v5906_v59 = vld [vmem:[%s9367_s12 + $0x210] sm:$0xff] }
0x2606   :  { %v7176_v39 = vpack.c.bf16 %v5870_v10, %v5866_v11  ;;  %v5894_v45 = vld [vmem:[%s9364_s10 + $0x3b8] sm:$0xff]  ;;  %v5901_v11 = vld [vmem:[%s9364_s10 + $0x3f0] sm:$0xff] }
0x2607   :  { %v5017_v62 = vadd.f32 %v8830_v4, %v5007_v61  ;;  %v5858_v4 = vld [vmem:[%s9364_s10 + $0x298] sm:$0xff]  ;;  %v7194_v10 = vpack.c.bf16 %v5901_v11, %v5897_v38  ;;  %v5910_v11 = vld [vmem:[%s9367_s12 + $0x230] sm:$0xff] }
0x2608   :  { %v7172_v8 = vpack.c.bf16 %v5862_v5, %v5858_v4  ;;  %v5890_v61 = vld [vmem:[%s9364_s10 + $0x398] sm:$0xff]  ;;  %v5893_v4 = vld [vmem:[%s9364_s10 + $0x3b0] sm:$0xff]  ;;  %v5896_v5 = vld [vmem:[%s9364_s10 + $0x3c8] sm:$0xff] }
0x2609   :  { %v8901_v0 = vadd.f32 %v5017_v62, %v8555_v29  ;;  %v7140_v29 = vpack.c.bf16 %v5860_v3, %v5856_v60  ;;  %v5887_v62 = vld [vmem:[%s9364_s10 + $0x380] sm:$0xff]  ;;  %v5889_v3 = vld [vmem:[%s9364_s10 + $0x390] sm:$0xff]  ;;  %v5959_v38 = vld [vmem:[%s9367_s12 + $0x3b8] sm:$0xff] }
0x260a   :  { %7173 = vmatprep.subr.bf16.mxu1 %v7172_v8  ;;  %v5891_v60 = vld [vmem:[%s9364_s10 + $0x3a0] sm:$0xff]  ;;  %v7190_v8 = vpack.c.bf16 %v5893_v4, %v5889_v3  ;;  %v5957_v3 = vld [vmem:[%s9367_s12 + $0x3a8] sm:$0xff] }
0x260b   :  { %5026 = vadd.xlane.f32.xlu1 %v8901_v0  ;;  %7141 = vmatprep.subr.bf16.mxu0 %v7140_v29  ;;  %v7158_v29 = vpack.c.bf16 %v5891_v60, %v5887_v62  ;;  %v5956_v60 = vld [vmem:[%s9367_s12 + $0x3a0] sm:$0xff] }
0x260c   :  { %7143 = vmatpush1.bf16.msra.mxu0 %v7142_v41  ;;  %7175 = vmatpush1.bf16.msra.mxu1 %v7174_v44  ;;  %v7160_v41 = vpack.c.bf16 %v5900_v6, %v5896_v5  ;;  %v5899_v44 = vld [vmem:[%s9364_s10 + $0x3e0] sm:$0xff]  ;;  %v5909_v5 = vld [vmem:[%s9367_s12 + $0x228] sm:$0xff] }
0x260d   :  { %7145 = vmatprep.subr.bf16.mxu0 %v7144_v16  ;;  %7177 = vmatprep.subr.bf16.mxu1 %v7176_v39  ;;  %v7162_v16 = vpack.c.bf16 %v5899_v44, %v5895_v52  ;;  %v5908_v4 = vld [vmem:[%s9367_s12 + $0x220] sm:$0xff]  ;;  %v5958_v52 = vld [vmem:[%s9367_s12 + $0x3b0] sm:$0xff] }
0x260e   :  { %v5940_v6 = vld [vmem:[%s9367_s12 + $0x320] sm:$0xff] }
0x260f   :  { %5034 = vadd.xlane.f32.xlu1 %v5032_v58  ;;  %v7188_v58 = vpack.c.bf16 %v5894_v45, %v5890_v61  ;;  %v5924_v61 = vld [vmem:[%s9367_s12 + $0x2a0] sm:$0xff]  ;;  %v5925_v45 = vld [vmem:[%s9367_s12 + $0x2a8] sm:$0xff]  ;;  %v7238_v44 = vpack.c.bf16 %v5941_v7, %v5940_v6  ;;  %v5935_v6 = vld [vmem:[%s9367_s12 + $0x2f8] sm:$0xff] }
0x2610   :  { %7147 = vmatpush1.bf16.msra.mxu0 %v7146_v22  ;;  %7179 = vmatpush1.bf16.msra.mxu1 %v7178_v18  ;;  %v5966_v7 = vld [vmem:[%s9367_s12 + $0x3f0] sm:$0xff] }
0x2611   :  { %7149 = vmatprep.subr.bf16.mxu0 %v7148_v43  ;;  %7181 = vmatprep.subr.bf16.mxu1 %v7180_v30 }
0x2614   :  { %7151 = vmatpush1.bf16.msra.mxu0 %v7150_v32  ;;  %7183 = vmatpush1.bf16.msra.mxu1 %v7182_v36  ;;  %v5953_v32 = vld [vmem:[%s9367_s12 + $0x388] sm:$0xff]  ;;  %v7198_v36 = vpack.c.bf16 %v5905_v35, %v5904_v34  ;;  %v5930_v34 = vld [vmem:[%s9367_s12 + $0x2d0] sm:$0xff]  ;;  %v5931_v35 = vld [vmem:[%s9367_s12 + $0x2d8] sm:$0xff] }
0x2615   :  { %7153 = vmatprep.subr.bf16.mxu0 %v7152_v42  ;;  %7185 = vmatprep.subr.bf16.mxu1 %v7184_v47  ;;  %v7228_v49 = vpack.c.bf16 %v5953_v32, %v5952_v54  ;;  %v7230_v42 = vpack.c.bf16 %v5937_v31, %v5936_v37  ;;  %v5923_v47 = vld [vmem:[%s9367_s12 + $0x298] sm:$0xff]  ;;  %v5944_v54 = vld [vmem:[%s9367_s12 + $0x340] sm:$0xff]  ;;  %v5945_v32 = vld [vmem:[%s9367_s12 + $0x348] sm:$0xff] }
0x2616   :  { %v7200_v53 = vpack.c.bf16 %v5923_v47, %v5922_v40  ;;  %v7246_v31 = vpack.c.bf16 %v5945_v32, %v5944_v54  ;;  %v7216_v40 = vpack.c.bf16 %v5931_v35, %v5930_v34  ;;  %v5915_v47 = vld [vmem:[%s9367_s12 + $0x258] sm:$0xff] }
0x2618   :  { %7155 = vmatpush1.bf16.msra.mxu0 %v7154_v55  ;;  %7187 = vmatpush1.bf16.msra.mxu1 %v7186_v50  ;;  %v7232_v55 = vpack.c.bf16 %v5955_v14, %v5954_v48  ;;  %v7202_v50 = vpack.c.bf16 %v5907_v56, %v5906_v59  ;;  %v5946_v48 = vld [vmem:[%s9367_s12 + $0x350] sm:$0xff]  ;;  %v5933_v59 = vld [vmem:[%s9367_s12 + $0x2e8] sm:$0xff]  ;;  %v5964_v56 = vld [vmem:[%s9367_s12 + $0x3e0] sm:$0xff] }
0x2619   :  { %7157 = vmatprep.subr.bf16.mxu0 %v7156_v21  ;;  %7189 = vmatprep.subr.bf16.mxu1 %v7188_v58  ;;  %v5939_v21 = vld [vmem:[%s9367_s12 + $0x318] sm:$0xff]  ;;  %v7204_v58 = vpack.c.bf16 %v5925_v45, %v5924_v61 }
0x261a   :  { %v7234_v62 = vpack.c.bf16 %v5939_v21, %v5938_v51  ;;  %v5965_v51 = vld [vmem:[%s9367_s12 + $0x3e8] sm:$0xff] }
0x261b   :  { %v7252_v45 = vpack.c.bf16 %v5965_v51, %v5964_v56  ;;  %v5969_v51 = vld [vmem:[%s9369_s13 + $0x1] ss:$0 sm:$0xff] }
0x261c   :  { %7159 = vmatpush1.bf16.msra.mxu0 %v7158_v29  ;;  %7191 = vmatpush1.bf16.msra.mxu1 %v7190_v8  ;;  %v7236_v29 = vpack.c.bf16 %v5957_v3, %v5956_v60  ;;  %v7206_v8 = vpack.c.bf16 %v5909_v5, %v5908_v4  ;;  %v5948_v60 = vld [vmem:[%s9367_s12 + $0x360] sm:$0xff]  ;;  %v5949_v4 = vld [vmem:[%s9367_s12 + $0x368] sm:$0xff]  ;;  %v5934_v5 = vld [vmem:[%s9367_s12 + $0x2f0] sm:$0xff] }
0x261d   :  { %7161 = vmatprep.subr.bf16.mxu0 %v7160_v41  ;;  %7193 = vmatprep.subr.bf16.mxu1 %v7192_v46  ;;  %v5926_v41 = vld [vmem:[%s9367_s12 + $0x2b0] sm:$0xff] }
0x261e   :  { %v7208_v46 = vpack.c.bf16 %v5927_v1, %v5926_v41  ;;  %v5967_v41 = vld [vmem:[%s9367_s12 + $0x3f8] sm:$0xff]  ;;  %v5918_v1 = vld [vmem:[%s9367_s12 + $0x270] sm:$0xff] }
0x2620   :  { %7163 = vmatpush1.bf16.msra.mxu0 %v7162_v16  ;;  %7195 = vmatpush1.bf16.msra.mxu1 %v7194_v10  ;;  %v5911_v16 = vld [vmem:[%s9367_s12 + $0x238] sm:$0xff]  ;;  %v7240_v10 = vpack.c.bf16 %v5959_v38, %v5958_v52  ;;  %v5950_v38 = vld [vmem:[%s9367_s12 + $0x370] sm:$0xff] }
0x2621   :  { %7229 = vmatprep.subr.bf16.mxu1 %v7228_v49  ;;  %v5962_v49 = vld [vmem:[%s9367_s12 + $0x3d0] sm:$0xff]  ;;  %v5919_v52 = vld [vmem:[%s9367_s12 + $0x278] sm:$0xff] }
0x2698   :  { %v5027_v63 = vpop.xlane.xlu1 %5026 }
0x2699   :  { %v5029_v12 = vmul.f32 0.0078125, %v5027_v63  ;;  %v5942_v63 = vld [vmem:[%s9367_s12 + $0x330] sm:$0xff] }
0x269b   :  { %v9051_v39 = vsub.f32 %v8901_v0, %v5029_v12  ;;  %v9064_v0 = vld [vmem:[%s9366_s9 + $0x1] ss:$0 sm:$0xff]  ;;  %v5943_v12 = vld [vmem:[%s9367_s12 + $0x338] sm:$0xff] }
0x269c   :  { %v5035_v22 = vpop.xlane.xlu1 %5034 }
0x269d   :  { %v5038_v15 = vmul.f32 0.0078125, %v5035_v22  ;;  %v5033_v17 = vmul.f32 %v9051_v39, %v9051_v39  ;;  %v5928_v22 = vld [vmem:[%s9367_s12 + $0x2c0] sm:$0xff] }
0x269f   :  { %v5040_v18 = vadd.f32 1e-05, %v5038_v15  ;;  %5036 = vadd.xlane.f32.xlu1 %v5033_v17  ;;  %v5929_v15 = vld [vmem:[%s9367_s12 + $0x2c8] sm:$0xff]  ;;  %v5960_v17 = vld [vmem:[%s9367_s12 + $0x3c0] sm:$0xff] }
0x26a1   :  { %7362 = vrsqrt.f32 %v5040_v18  ;;  %v5961_v18 = vld [vmem:[%s9367_s12 + $0x3c8] sm:$0xff] }
0x26ab   :  { %v7363_v2 = vpop.eup %7362 }
0x26ac   :  { %v5044_v23 = vmul.f32 %v7363_v2, %v8898_v20  ;;  %v5920_v20 = vld [vmem:[%s9367_s12 + $0x280] sm:$0xff]  ;;  %v7210_v2 = vpack.c.bf16 %v5911_v16, %v5910_v11  ;;  %v5951_v11 = vld [vmem:[%s9367_s12 + $0x378] sm:$0xff] }
0x26ad   :  { %v7196_v30 = vpack.c.bf16 %v5921_v27, %v5920_v20  ;;  %v5912_v20 = vld [vmem:[%s9367_s12 + $0x240] sm:$0xff]  ;;  %v5913_v27 = vld [vmem:[%s9367_s12 + $0x248] sm:$0xff]  ;;  %v7258_v16 = vpack.c.bf16 %v5951_v11, %v5950_v38 }
0x26ae   :  { %v5052_v43 = vmul.f32 %v9058_v57, %v5044_v23  ;;  %v7242_v23 = vpack.c.bf16 %v5943_v12, %v5942_v63  ;;  %v7214_v37 = vpack.c.bf16 %v5913_v27, %v5912_v20 }
0x26af   :  { %7197 = vmatprep.subr.bf16.mxu0 %v7196_v30  ;;  %v7244_v30 = vpack.c.bf16 %v5961_v18, %v5960_v17 }
0x26b0   :  { %v9068_v33 = vadd.f32 %v9064_v0, %v5052_v43  ;;  %v7212_v43 = vpack.c.bf16 %v5929_v15, %v5928_v22 }
0x26b2   :  { %5215 = vmatmul.mubr.f32.vlgmr.msra.gmra.mrb[58].mxu0 %v9068_v33  ;;  %5292 = vmatmul.mubr.f32.vlgmr.msra.gmra.mrb[68].mxu1 %v9068_v33 }
0x26b3   :  { %5220 = vmatprep.mubr.f32.mxu0 %v7370_v13  ;;  %5297 = vmatprep.mubr.f32.mxu1 %v7370_v13 }
0x26b4   :  { %7199 = vmatpush3.bf16.msra.mxu0 %v7198_v36  ;;  %7231 = vmatpush3.bf16.msra.mxu1 %v7230_v42  ;;  %v5963_v36 = vld [vmem:[%s9367_s12 + $0x3d8] sm:$0xff]  ;;  %v5914_v42 = vld [vmem:[%s9367_s12 + $0x250] sm:$0xff] }
0x26b5   :  { %7201 = vmatprep.subr.bf16.mxu0 %v7200_v53  ;;  %7233 = vmatprep.subr.bf16.mxu1 %v7232_v55  ;;  %v7248_v14 = vpack.c.bf16 %v5963_v36, %v5962_v49  ;;  %v5947_v53 = vld [vmem:[%s9367_s12 + $0x358] sm:$0xff]  ;;  %v5932_v55 = vld [vmem:[%s9367_s12 + $0x2e0] sm:$0xff] }
0x26b6   :  { %v7250_v21 = vpack.c.bf16 %v5947_v53, %v5946_v48  ;;  %v7220_v61 = vpack.c.bf16 %v5933_v59, %v5932_v55 }
0x26b8   :  { %7203 = vmatpush3.bf16.msra.mxu0 %v7202_v50  ;;  %7235 = vmatpush3.bf16.msra.mxu1 %v7234_v62  ;;  %v7218_v50 = vpack.c.bf16 %v5915_v47, %v5914_v42  ;;  %v5916_v62 = vld [vmem:[%s9367_s12 + $0x260] sm:$0xff] }
0x26b9   :  { %7205 = vmatprep.subr.bf16.mxu0 %v7204_v58  ;;  %7237 = vmatprep.subr.bf16.mxu1 %v7236_v29  ;;  %v5917_v58 = vld [vmem:[%s9367_s12 + $0x268] sm:$0xff]  ;;  %v7254_v29 = vpack.c.bf16 %v5949_v4, %v5948_v60 }
0x26ba   :  { %v7222_v3 = vpack.c.bf16 %v5917_v58, %v5916_v62 }
0x26bc   :  { %7207 = vmatpush3.bf16.msra.mxu0 %v7206_v8  ;;  %7239 = vmatpush3.bf16.msra.mxu1 %v7238_v44  ;;  %v7224_v8 = vpack.c.bf16 %v5935_v6, %v5934_v5  ;;  %v7256_v44 = vpack.c.bf16 %v5967_v41, %v5966_v7 }
0x26bd   :  { %7209 = vmatprep.subr.bf16.mxu0 %v7208_v46  ;;  %7241 = vmatprep.subr.bf16.mxu1 %v7240_v10  ;;  %v7226_v46 = vpack.c.bf16 %v5919_v52, %v5918_v1 }
0x26c0   :  { %7211 = vmatpush3.bf16.msra.mxu0 %v7210_v2  ;;  %7243 = vmatpush3.bf16.msra.mxu1 %v7242_v23  ;;  %v5903_v2 = vld [vmem:[%s9368_s11 + $0x4] sm:$0xf] }
0x26c1   :  { %7213 = vmatprep.subr.bf16.mxu0 %v7212_v43  ;;  %7245 = vmatprep.subr.bf16.mxu1 %v7244_v30  ;;  %v5133_v23 = vrot.slane %v5903_v2, %v7666_v28  ;;  %v5141_v43 = vrot.slane %v5903_v2, %v7660_v26  ;;  %v5137_v20 = vrot.slane %v5903_v2, %v7657_v25 }
0x26c2   :  { %v5145_v27 = vrot.slane %v5903_v2, %v2433_v9  ;;  %v5601_v2 = vld [vmem:[%s9372_s16 + $0x28] sm:$0xff] }
0x26c4   :  { %7215 = vmatpush3.bf16.msra.mxu0 %v7214_v37  ;;  %7247 = vmatpush3.bf16.msra.mxu1 %v7246_v31 }
0x26c5   :  { %7217 = vmatprep.subr.bf16.mxu0 %v7216_v40  ;;  %7249 = vmatprep.subr.bf16.mxu1 %v7248_v14 }
0x26c8   :  { %7219 = vmatpush3.bf16.msra.mxu0 %v7218_v50  ;;  %7251 = vmatpush3.bf16.msra.mxu1 %v7250_v21 }
0x26c9   :  { %7221 = vmatprep.subr.bf16.mxu0 %v7220_v61  ;;  %7253 = vmatprep.subr.bf16.mxu1 %v7252_v45 }
0x26cc   :  { %7223 = vmatpush3.bf16.msra.mxu0 %v7222_v3  ;;  %7255 = vmatpush3.bf16.msra.mxu1 %v7254_v29 }
0x26cd   :  { %7225 = vmatprep.subr.bf16.mxu0 %v7224_v8  ;;  %7257 = vmatprep.subr.bf16.mxu1 %v7256_v44 }
0x26d0   :  { %7227 = vmatpush3.bf16.msra.mxu0 %v7226_v46  ;;  %7259 = vmatpush3.bf16.msra.mxu1 %v7258_v16 }
0x26d1   :  { %7260 = vmatprep.subr.bf16.mxu0 %v7375_v19 }
0x272c   :  { %v5037_v10 = vpop.xlane.xlu1 %5036 }
0x272d   :  { %v5039_v63 = vmul.f32 0.0078125, %v5037_v10  ;;  %v5596_v10 = vld [vmem:[%s9372_s16] sm:$0xff] }
0x272f   :  { %v5041_v12 = vadd.f32 1e-05, %v5039_v63  ;;  %v5597_v63 = vld [vmem:[%s9372_s16 + $0x8] sm:$0xff] }
0x2731   :  { %7364 = vrsqrt.f32 %v5041_v12  ;;  %v7261_v12 = vpack.c.bf16 %v5597_v63, %v5596_v10 }
0x273b   :  { %v7365_v22 = vpop.eup %7364 }
0x273c   :  { %v5045_v15 = vmul.f32 %v7365_v22, %v9051_v39  ;;  %v5598_v22 = vld [vmem:[%s9372_s16 + $0x10] sm:$0xff] }
0x273e   :  { %v5053_v17 = vmul.f32 %v9058_v57, %v5045_v15  ;;  %v5599_v15 = vld [vmem:[%s9372_s16 + $0x18] sm:$0xff] }
0x2740   :  { %v5061_v18 = vadd.f32 %v9064_v0, %v5053_v17  ;;  %v7264_v17 = vpack.c.bf16 %v5599_v15, %v5598_v22 }
0x2742   :  { %5221 = vmatmul.mubr.f32.gmra.mrb[60].mxu0 %v5061_v18  ;;  %5298 = vmatmul.mubr.f32.gmra.mrb[70].mxu1 %v5061_v18 }
0x2785   :  { %v5216_v39 = vpop.f32.mrb[58].mxu0  ;;  %v5293_v54 = vpop.f32.mrb[68].mxu1 }
0x2786   :  { %v5217_v57 = vadd.f32 %v5216_v39, %v5133_v23  ;;  %v5294_v30 = vadd.f32 %v5293_v54, %v5141_v43  ;;  %v5218_v0 = vpop.f32.mrb[59].mxu0  ;;  %v5295_v32 = vpop.f32.mrb[69].mxu1  ;;  %v5604_v39 = vld [vmem:[%s9372_s16 + $0x40] sm:$0xff]  ;;  %v5605_v54 = vld [vmem:[%s9372_s16 + $0x48] sm:$0xff] }
0x2787   :  { %v5219_v34 = vadd.f32 %v5218_v0, %v5137_v20  ;;  %v5296_v35 = vadd.f32 %v5295_v32, %v5145_v27  ;;  %v5607_v0 = vld [vmem:[%s9372_s16 + $0x58] sm:$0xff] }
0x2788   :  { %v5304_v37 = vmax.f32 %v5217_v57, 0.0  ;;  %v5306_v31 = vmax.f32 %v5294_v30, 0.0  ;;  %v7273_v57 = vpack.c.bf16 %v5605_v54, %v5604_v39  ;;  %v5606_v30 = vld [vmem:[%s9372_s16 + $0x50] sm:$0xff] }
0x2789   :  { %v5305_v49 = vmax.f32 %v5219_v34, 0.0  ;;  %v5307_v36 = vmax.f32 %v5296_v35, 0.0  ;;  %v7276_v32 = vpack.c.bf16 %v5607_v0, %v5606_v30  ;;  %v5608_v34 = vld [vmem:[%s9372_s16 + $0x60] sm:$0xff]  ;;  %v5609_v35 = vld [vmem:[%s9372_s16 + $0x68] sm:$0xff] }
0x278b   :  { %5449 = vmatprep.mubr.f32.mxu0 %v5305_v49  ;;  %5524 = vmatprep.mubr.f32.mxu1 %v5307_v36  ;;  %v7279_v49 = vpack.c.bf16 %v5609_v35, %v5608_v34  ;;  %v5610_v36 = vld [vmem:[%s9372_s16 + $0x70] sm:$0xff] }
0x278c   :  { %5450 = vmatmul.mubr.f32.vlgmr.msra.gmra.mrb[62].mxu0 %v5304_v37  ;;  %5525 = vmatmul.mubr.f32.vlgmr.msra.gmra.mrb[72].mxu1 %v5306_v31  ;;  %v5611_v37 = vld [vmem:[%s9372_s16 + $0x78] sm:$0xff] }
0x278d   :  { %7262 = vmatpush3.bf16.msra.mxu0 %v7261_v12  ;;  %v7282_v31 = vpack.c.bf16 %v5611_v37, %v5610_v36 }
0x278e   :  { %7263 = vmatprep.subr.bf16.mxu0 %v7375_v19 }
0x2791   :  { %7265 = vmatpush3.bf16.msra.mxu0 %v7264_v17 }
0x2792   :  { %7266 = vmatprep.subr.bf16.mxu0 %v7375_v19 }
0x2815   :  { %v5222_v25 = vpop.f32.mrb[60].mxu0  ;;  %v5299_v26 = vpop.f32.mrb[70].mxu1 }
0x2816   :  { %v5223_v24 = vadd.f32 %v5222_v25, %v5133_v23  ;;  %v5300_v28 = vadd.f32 %v5299_v26, %v5141_v43  ;;  %v5224_v9 = vpop.f32.mrb[61].mxu0  ;;  %v5301_v40 = vpop.f32.mrb[71].mxu1  ;;  %v5602_v43 = vld [vmem:[%s9372_s16 + $0x30] sm:$0xff]  ;;  %v23_v25 = vstv %s9373_s17 }
0x2817   :  { %v5225_v42 = vadd.f32 %v5224_v9, %v5137_v20  ;;  %v5302_v47 = vadd.f32 %v5301_v40, %v5145_v27  ;;  %v5603_v20 = vld [vmem:[%s9372_s16 + $0x38] sm:$0xff]  ;;  %24 = vst [vmem:[#allocation2] sm:$0x1] %v23_v25 }
0x2818   :  { %v5308_v53 = vmax.f32 %v5223_v24, 0.0  ;;  %v5310_v55 = vmax.f32 %v5300_v28, 0.0  ;;  %v7270_v27 = vpack.c.bf16 %v5603_v20, %v5602_v43 }
0x2819   :  { %v5309_v48 = vmax.f32 %v5225_v42, 0.0  ;;  %v5311_v14 = vmax.f32 %v5302_v47, 0.0  ;;  %v5972_v42 = vld [vmem:[%s9370_s14 + $0x1] ss:$0 sm:$0xff] }
0x281b   :  { %5454 = vmatprep.mubr.f32.mxu0 %v5309_v48  ;;  %5529 = vmatprep.mubr.f32.mxu1 %v5311_v14 }
0x281c   :  { %5455 = vmatmul.mubr.f32.gmra.mrb[64].mxu0 %v5308_v53  ;;  %5530 = vmatmul.mubr.f32.gmra.mrb[74].mxu1 %v5310_v55 }
0x281d   :  { %6773 = vmatprep.mubr.msk.f32.mxu0 %vm7371_vm1, %v7370_v13 }
0x285f   :  { %v6267_v59 = vpop.f32.mrb[62].mxu0  ;;  %v6305_v56 = vpop.f32.mrb[72].mxu1 }
0x2860   :  { %v6268_v50 = vpop.f32.mrb[63].mxu0  ;;  %v6306_v21 = vpop.f32.mrb[73].mxu1 }
0x2861   :  { %v6269_v61 = vadd.f32 %v6268_v50, %v6267_v59  ;;  %v6307_v45 = vadd.f32 %v6306_v21, %v6305_v56 }
0x2863   :  { %v5452_v62 = vadd.f32 %v6269_v61, %v5969_v51 }
0x2865   :  { %v5527_v58 = vadd.f32 %v6307_v45, %v5452_v62 }
0x2867   :  { %v5535_v60 = vadd.f32 %v5527_v58, %v9068_v33 }
0x2869   :  { %5541 = vadd.xlane.f32.xlu1 %v5535_v60 }
0x28ef   :  { %v6270_v3 = vpop.f32.mrb[64].mxu0  ;;  %v6308_v4 = vpop.f32.mrb[74].mxu1 }
0x28f0   :  { %v6271_v29 = vpop.f32.mrb[65].mxu0  ;;  %v6309_v5 = vpop.f32.mrb[75].mxu1 }
0x28f1   :  { %v6272_v13 = vadd.f32 %v6271_v29, %v6270_v3  ;;  %v6310_v6 = vadd.f32 %v6309_v5, %v6308_v4 }
0x28f3   :  { %v5457_v7 = vadd.f32 %v6272_v13, %v5969_v51 }
0x28f5   :  { %v5532_v8 = vadd.f32 %v6310_v6, %v5457_v7 }
0x28f6   :  { %v5542_v41 = vpop.xlane.xlu1 %5541 }
0x28f7   :  { %v5545_v1 = vmul.f32 0.0078125, %v5542_v41  ;;  %v5536_v52 = vadd.f32 %v5532_v8, %v5061_v18  ;;  %v5600_v18 = vld [vmem:[%s9372_s16 + $0x20] sm:$0xff] }
0x28f8   :  { %v7267_v23 = vpack.c.bf16 %v5601_v2, %v5600_v18 }
0x28f9   :  { %v5547_v44 = vsub.f32 %v5535_v60, %v5545_v1  ;;  %5543 = vadd.xlane.f32.xlu1 %v5536_v52  ;;  %v5974_v1 = vld [vmem:[#allocation2] ss:$0 sm:$0xff] }
0x28fa   :  { %7268 = vmatpush3.bf16.msra.mxu0 %v7267_v23 }
0x28fb   :  { %v5549_v46 = vmul.f32 %v5547_v44, %v5547_v44  ;;  %7269 = vmatprep.subr.bf16.mxu0 %v7375_v19 }
0x28fd   :  { %5551 = vadd.xlane.f32.xlu0 %v5549_v46 }
0x28fe   :  { %7271 = vmatpush3.bf16.msra.mxu0 %v7270_v27 }
0x28ff   :  { %7272 = vmatprep.subr.bf16.mxu0 %v7375_v19 }
0x2902   :  { %7274 = vmatpush3.bf16.msra.mxu0 %v7273_v57 }
0x2903   :  { %7275 = vmatprep.subr.bf16.mxu0 %v7375_v19 }
0x2906   :  { %7277 = vmatpush3.bf16.msra.mxu0 %v7276_v32 }
0x2907   :  { %7278 = vmatprep.subr.bf16.mxu0 %v7375_v19 }
0x290a   :  { %7280 = vmatpush3.bf16.msra.mxu0 %v7279_v49 }
0x290b   :  { %7281 = vmatprep.subr.bf16.mxu0 %v7375_v19  ;;  %v5973_v19 = vld [vmem:[%s9371_s15 + $0x1] ss:$0 sm:$0xff] }
0x290e   :  { %7283 = vmatpush3.bf16.msra.mxu0 %v7282_v31 }
0x2986   :  { %v5544_v38 = vpop.xlane.xlu1 %5543 }
0x2987   :  { %v5546_v11 = vmul.f32 0.0078125, %v5544_v38 }
0x2989   :  { %v9284_v16 = vsub.f32 %v5536_v52, %v5546_v11 }
0x298a   :  { %v5552_v26 = vpop.xlane.xlu0 %5551 }
0x298b   :  { %v5550_v33 = vmul.f32 %v9284_v16, %v9284_v16  ;;  %v5555_v24 = vmul.f32 0.0078125, %v5552_v26 }
0x298d   :  { %5553 = vadd.xlane.f32.xlu1 %v5550_v33  ;;  %v5557_v28 = vadd.f32 1e-05, %v5555_v24 }
0x298f   :  { %7366 = vrsqrt.f32 %v5557_v28 }
0x2999   :  { %v7367_v9 = vpop.eup %7366 }
0x299a   :  { %v5561_v40 = vmul.f32 %v7367_v9, %v5547_v44 }
0x299c   :  { %v5569_v14 = vmul.f32 %v5972_v42, %v5561_v40 }
0x299e   :  { %v5577_v55 = vadd.f32 %v5973_v19, %v5569_v14 }
0x29a0   :  { %v5579_v59 = vrot.slane %v5577_v55, 4 }
0x29a2   :  { %v5580_v56 = vadd.f32 %v5579_v59, %v5577_v55 }
0x29a4   :  { %v5581_v61 = vrot.slane %v5580_v56, 2 }
0x29a6   :  { %v5582_v62 = vadd.f32 %v5581_v61, %v5580_v56 }
0x29a8   :  { %v5583_v3 = vrot.slane %v5582_v62, 1 }
0x29aa   :  { %v5584_v5 = vadd.f32 %v5583_v3, %v5582_v62 }
0x29ac   :  { %v5586_v7 = vmul.f32 0.125, %v5584_v5 }
0x2a1a   :  { %v5554_v47 = vpop.xlane.xlu1 %5553 }
0x2a1b   :  { %v5556_v48 = vmul.f32 0.0078125, %v5554_v47 }
0x2a1d   :  { %v5558_v53 = vadd.f32 1e-05, %v5556_v48 }
0x2a1f   :  { %7368 = vrsqrt.f32 %v5558_v53 }
0x2a29   :  { %v7369_v51 = vpop.eup %7368 }
0x2a2a   :  { %v5562_v50 = vmul.f32 %v7369_v51, %v9284_v16 }
0x2a2c   :  { %v5570_v21 = vmul.f32 %v5972_v42, %v5562_v50 }
0x2a2e   :  { %v5578_v45 = vadd.f32 %v5973_v19, %v5570_v21 }
0x2a30   :  { %v5587_v58 = vrot.slane %v5578_v45, 4 }
0x2a32   :  { %v5588_v60 = vadd.f32 %v5587_v58, %v5578_v45 }
0x2a34   :  { %v5589_v4 = vrot.slane %v5588_v60, 2 }
0x2a36   :  { %v5590_v29 = vadd.f32 %v5589_v4, %v5588_v60 }
0x2a38   :  { %v5591_v13 = vrot.slane %v5590_v29, 1 }
0x2a3a   :  { %v5592_v6 = vadd.f32 %v5591_v13, %v5590_v29 }
0x2a3c   :  { %v5593_v8 = vmul.f32 0.125, %v5592_v6 }
0x2a3e   :  { %v5595_v41 = vsel %vm5594_vm4, %v5586_v7, %v5593_v8 }
0x2a3f   :  { %6774 = vmatmul.mubr.f32.vlgmr.msra.gmra.mrb[66].mxu0 %v5595_v41 }
0x2b12   :  { %v5685_v52 = vpop.f32.mrb[66].mxu0 }
0x2b13   :  { %v5686_v44 = vadd.f32 %v5974_v1, %v5685_v52  ;;  %v6775_v46 = vpop.f32.mrb[67].mxu0 }
0x2b15   :  { %5690 = vst.msk [vmem:[%s9374_s18] sm:$0x3] %vm5689_vm5, %v5686_v44 }

</bundles_post_ra>
